<compile_context>
chip_gen: v5e
topology: v5e:2x2
jax: 0.10.0
libtpu: 0.0.40
codegen_flags: <defaults>
</compile_context>

<pallas_src>
import functools

import jax
import jax.numpy as jnp
import numpy as np
from jax import lax
from jax.experimental import pallas as pl
from jax.experimental.pallas import tpu as pltpu


# ----------------------------------------------------------------------------
# Fused forward kernel.
# ----------------------------------------------------------------------------
def _fused_forward_kernel(t_max, b_pad, hidden, *refs):
    """refs layout:
      x (T*B_pad, S_pad), pairs (B_pad, 8),
      5 x (se_w, se_b), 3 x (pe_w, pe_b),
      wih_s (64, 4H), wih_p (64, 4H), whh (H, 4H), lstm_b (1, 4H),
      fc1_w, fc1_b, fc2_w, fc2_b, ap_w (H,128), ap_b (1,128),
      out (T*B_pad, 128),
      scratch: gin (T*B_pad, 4H), hseq (T*B_pad, H)
    """
    n_se, n_pe = 5, 3
    idx = 0
    x_ref = refs[idx]; idx += 1
    pair_ref = refs[idx]; idx += 1
    se = refs[idx: idx + 2 * n_se]; idx += 2 * n_se
    pe = refs[idx: idx + 2 * n_pe]; idx += 2 * n_pe
    wih_s_ref, wih_p_ref, whh_ref, lb_ref = refs[idx: idx + 4]; idx += 4
    fc1_w, fc1_b, fc2_w, fc2_b, ap_w, ap_b = refs[idx: idx + 6]; idx += 6
    out_ref = refs[idx]; idx += 1
    gin_scr, hseq_scr = refs[idx: idx + 2]

    f32 = jnp.float32

    # ---- state encoder: all (T*B_pad) rows in one matmul per layer ----
    h = x_ref[...]
    for l in range(n_se):
        h = jnp.maximum(
            jnp.dot(h, se[2 * l][...], preferred_element_type=f32)
            + se[2 * l + 1][...], 0.0)
    es = h                                              # (T*B_pad, 64)

    # ---- pair encoder: (B_pad) rows ----
    p = pair_ref[...]
    for l in range(n_pe):
        p = jnp.maximum(
            jnp.dot(p, pe[2 * l][...], preferred_element_type=f32)
            + pe[2 * l + 1][...], 0.0)
    ep = p                                              # (B_pad, 64)

    # ---- hoisted LSTM input projection ----
    # Time-invariant per-sample term: enc_pair part of W_ih plus combined bias.
    pterm = jnp.dot(ep, wih_p_ref[...], preferred_element_type=f32) \
        + lb_ref[...]                                   # (B_pad, 4H)
    # Time-varying term for every (t, b) row at once.
    gin_scr[...] = jnp.dot(es, wih_s_ref[...], preferred_element_type=f32)

    # ---- recurrence: only h @ W_hh + elementwise per step ----
    whh = whh_ref[...]

    def step(t, carry):
        h_t, c_t = carry
        r0 = pl.multiple_of(t * b_pad, b_pad)
        gates = gin_scr[pl.ds(r0, b_pad), :] + pterm + \
            jnp.dot(h_t, whh, preferred_element_type=f32)   # (B_pad, 4H)
        i_g = jax.nn.sigmoid(gates[:, 0 * hidden:1 * hidden])
        f_g = jax.nn.sigmoid(gates[:, 1 * hidden:2 * hidden])
        g_g = jnp.tanh(gates[:, 2 * hidden:3 * hidden])
        o_g = jax.nn.sigmoid(gates[:, 3 * hidden:4 * hidden])
        c_n = f_g * c_t + i_g * g_g
        h_n = o_g * jnp.tanh(c_n)
        hseq_scr[pl.ds(r0, b_pad), :] = h_n
        return (h_n, c_n)

    h0 = jnp.zeros((b_pad, hidden), f32)
    c0 = jnp.zeros((b_pad, hidden), f32)
    lax.fori_loop(0, t_max, step, (h0, c0), unroll=True)

    # ---- prediction head on all rows (valid rows selected in wrapper) ----
    hh = hseq_scr[...]
    hh = jnp.maximum(
        jnp.dot(hh, fc1_w[...], preferred_element_type=f32) + fc1_b[...], 0.0)
    hh = jnp.maximum(
        jnp.dot(hh, fc2_w[...], preferred_element_type=f32) + fc2_b[...], 0.0)
    # ap_w/ap_b are lane-padded to 128 cols; padded cols carry a -1e30 bias so
    # they contribute nothing to the log-softmax over the 4 real actions.
    logits = jnp.dot(hh, ap_w[...], preferred_element_type=f32) + ap_b[...]
    m = jnp.max(logits, axis=-1, keepdims=True)
    z = logits - m
    lse = jnp.log(jnp.sum(jnp.exp(z), axis=-1, keepdims=True))
    out_ref[...] = z - lse


# ----------------------------------------------------------------------------
# Parameter construction (deterministic, PyTorch-style uniform init).
# ----------------------------------------------------------------------------
def _linear_params(key, in_dim, out_dim):
    k_w, k_b = jax.random.split(key)
    bound = 1.0 / np.sqrt(in_dim)
    w = jax.random.uniform(k_w, (in_dim, out_dim), jnp.float32, -bound, bound)
    b = jax.random.uniform(k_b, (1, out_dim), jnp.float32, -bound, bound)
    return w, b


def init_params(key, state_dim=145, hidden_dim=128, output_dim=4):
    keys = iter(jax.random.split(key, 32))
    p = {}

    # StateEncoder(state_dim, hidden_dim, hidden_dim // 2)
    se_dims = [state_dim, hidden_dim, 2 * hidden_dim, 2 * hidden_dim,
               hidden_dim, hidden_dim // 2]
    p["se_w"], p["se_b"] = [], []
    for i in range(5):
        w, b = _linear_params(next(keys), se_dims[i], se_dims[i + 1])
        p["se_w"].append(w)
        p["se_b"].append(b)

    # PairEncoder(2, hidden_dim // 4, hidden_dim // 2)
    pe_dims = [2, hidden_dim // 4, hidden_dim // 4, hidden_dim // 2]
    p["pe_w"], p["pe_b"] = [], []
    for i in range(3):
        w, b = _linear_params(next(keys), pe_dims[i], pe_dims[i + 1])
        p["pe_w"].append(w)
        p["pe_b"].append(b)

    # LSTM(hidden_dim, hidden_dim): gate order i, f, g, o (PyTorch).
    bound = 1.0 / np.sqrt(hidden_dim)
    p["w_ih_t"] = jax.random.uniform(next(keys), (hidden_dim, 4 * hidden_dim),
                                     jnp.float32, -bound, bound)
    p["w_hh_t"] = jax.random.uniform(next(keys), (hidden_dim, 4 * hidden_dim),
                                     jnp.float32, -bound, bound)
    b_ih = jax.random.uniform(next(keys), (1, 4 * hidden_dim),
                              jnp.float32, -bound, bound)
    b_hh = jax.random.uniform(next(keys), (1, 4 * hidden_dim),
                              jnp.float32, -bound, bound)
    p["lstm_b"] = b_ih + b_hh

    # Head: fc1, fc2, action_pred
    p["fc1_w"], p["fc1_b"] = _linear_params(next(keys), hidden_dim,
                                            2 * hidden_dim)
    p["fc2_w"], p["fc2_b"] = _linear_params(next(keys), 2 * hidden_dim,
                                            hidden_dim)
    p["ap_w"], p["ap_b"] = _linear_params(next(keys), hidden_dim, output_dim)
    return p


# ----------------------------------------------------------------------------
# Full forward pass: padding / weight staging + one fused pallas_call.
# ----------------------------------------------------------------------------
def _round_up(x, m):
    return ((x + m - 1) // m) * m


def tomnet_car_pred_forward(params, padded_state, pairs, lens):
    """padded_state: (B, T_max, state_dim), zero-padded beyond each sample's
    length (batch order == PyTorch list order); pairs: (B, 2);
    lens: python list of ints (static).  Returns (sum(lens), 4) log-probs."""
    f32 = jnp.float32
    batch, t_max, state_dim = padded_state.shape
    hidden = params["w_hh_t"].shape[0]
    out_dim = params["ap_w"].shape[1]
    enc_out = params["se_w"][-1].shape[1]           # hidden // 2

    b_pad = _round_up(batch, 8)                     # sublane-aligned batch
    s_pad = _round_up(state_dim, 8)                 # 145 -> 152
    p_in_pad = 8                                    # pair input 2 -> 8
    ap_cols = 128                                   # lane-dense head output
    rows = t_max * b_pad

    # --- stage inputs: time-major, zero-padded, sublane/lane aligned ---
    x = jnp.zeros((t_max, b_pad, s_pad), f32)
    x = x.at[:, :batch, :state_dim].set(
        jnp.transpose(padded_state.astype(f32), (1, 0, 2)))
    x = x.reshape(rows, s_pad)                      # row = t * b_pad + b

    pr = jnp.zeros((b_pad, p_in_pad), f32).at[:batch, :2].set(
        pairs.astype(f32))

    # --- stage weights: pad ragged dims, split W_ih into state/pair halves ---
    se_w = list(params["se_w"])
    se_w[0] = jnp.zeros((s_pad, se_w[0].shape[1]), f32).at[:state_dim].set(
        se_w[0])
    se_b = params["se_b"]

    pe_w = list(params["pe_w"])
    pe_w[0] = jnp.zeros((p_in_pad, pe_w[0].shape[1]), f32).at[:2].set(pe_w[0])
    pe_b = params["pe_b"]

    wih_s = params["w_ih_t"][:enc_out]              # multiplies enc_state
    wih_p = params["w_ih_t"][enc_out:]              # multiplies enc_pair
    whh = params["w_hh_t"]
    lstm_b = params["lstm_b"]

    ap_w = jnp.zeros((hidden, ap_cols), f32).at[:, :out_dim].set(
        params["ap_w"])
    ap_b = jnp.full((1, ap_cols), -1e30, f32).at[:, :out_dim].set(
        params["ap_b"])

    args = [x, pr]
    for w, b in zip(se_w, se_b):
        args += [w, b]
    for w, b in zip(pe_w, pe_b):
        args += [w, b]
    args += [wih_s, wih_p, whh, lstm_b,
             params["fc1_w"], params["fc1_b"],
             params["fc2_w"], params["fc2_b"], ap_w, ap_b]

    in_specs = [pl.BlockSpec(a.shape, lambda i: (0, 0)) for a in args]

    kernel = functools.partial(_fused_forward_kernel, t_max, b_pad, hidden)

    out_full = pl.pallas_call(
        kernel,
        out_shape=jax.ShapeDtypeStruct((rows, ap_cols), f32),
        grid=(1,),
        in_specs=in_specs,
        out_specs=pl.BlockSpec((rows, ap_cols), lambda i: (0, 0)),
        scratch_shapes=[
            pltpu.VMEM((rows, 4 * hidden), f32),    # hoisted input projection
            pltpu.VMEM((rows, hidden), f32),        # LSTM hidden sequence
        ],
        compiler_params=pltpu.CompilerParams(
            dimension_semantics=("arbitrary",)),
    )(*args)

    # Gather valid rows (t < lens[b]) in batch order (matches PyTorch concat).
    # `lens` is static -> a single static gather, no per-sample dynamic slices.
    row_ids = np.asarray([t * b_pad + b
                          for b in range(batch)
                          for t in range(int(lens[b]))], dtype=np.int32)
    return out_full[jnp.asarray(row_ids), :out_dim]


if __name__ == "__main__":
    STATE_DIM = 145
    HIDDEN_DIM = 128
    OUTPUT_DIM = 4
    BATCH = 3
    LENS = [8, 6, 4]          # descending (enforce_sorted=True semantics)
    T_MAX = max(LENS)

    root = jax.random.PRNGKey(0)
    k_params, k_state, k_pair = jax.random.split(root, 3)

    params = init_params(k_params, STATE_DIM, HIDDEN_DIM, OUTPUT_DIM)

    # Padded state_action (zero beyond each sample's length).
    padded_state = jax.random.normal(k_state, (BATCH, T_MAX, STATE_DIM),
                                     jnp.float32)
    mask = (jnp.arange(T_MAX)[None, :] < jnp.asarray(LENS)[:, None])
    padded_state = padded_state * mask[:, :, None].astype(jnp.float32)

    pairs = jax.random.normal(k_pair, (BATCH, 2), jnp.float32)

    pred = tomnet_car_pred_forward(params, padded_state, pairs, LENS)
    pred = jax.block_until_ready(pred)

    assert pred.shape == (sum(LENS), OUTPUT_DIM)
    # log_softmax rows should exponentiate-sum to ~1.
    assert bool(jnp.all(jnp.abs(jnp.sum(jnp.exp(pred), axis=-1) - 1.0) < 1e-4))
    print("KERNEL_OK")
</pallas_src>

<mosaic_0001>
module attributes {stable_mosaic.version = 11 : i64} {
  func.func @_fused_forward_kernel(%arg0: i32, %arg1: memref<64x152xf32, #tpu.memory_space<vmem>>, %arg2: memref<8x8xf32, #tpu.memory_space<vmem>>, %arg3: memref<152x128xf32, #tpu.memory_space<vmem>>, %arg4: memref<1x128xf32, #tpu.memory_space<vmem>>, %arg5: memref<128x256xf32, #tpu.memory_space<vmem>>, %arg6: memref<1x256xf32, #tpu.memory_space<vmem>>, %arg7: memref<256x256xf32, #tpu.memory_space<vmem>>, %arg8: memref<1x256xf32, #tpu.memory_space<vmem>>, %arg9: memref<256x128xf32, #tpu.memory_space<vmem>>, %arg10: memref<1x128xf32, #tpu.memory_space<vmem>>, %arg11: memref<128x64xf32, #tpu.memory_space<vmem>>, %arg12: memref<1x64xf32, #tpu.memory_space<vmem>>, %arg13: memref<8x32xf32, #tpu.memory_space<vmem>>, %arg14: memref<1x32xf32, #tpu.memory_space<vmem>>, %arg15: memref<32x32xf32, #tpu.memory_space<vmem>>, %arg16: memref<1x32xf32, #tpu.memory_space<vmem>>, %arg17: memref<32x64xf32, #tpu.memory_space<vmem>>, %arg18: memref<1x64xf32, #tpu.memory_space<vmem>>, %arg19: memref<64x512xf32, #tpu.memory_space<vmem>>, %arg20: memref<64x512xf32, #tpu.memory_space<vmem>>, %arg21: memref<128x512xf32, #tpu.memory_space<vmem>>, %arg22: memref<1x512xf32, #tpu.memory_space<vmem>>, %arg23: memref<128x256xf32, #tpu.memory_space<vmem>>, %arg24: memref<1x256xf32, #tpu.memory_space<vmem>>, %arg25: memref<256x128xf32, #tpu.memory_space<vmem>>, %arg26: memref<1x128xf32, #tpu.memory_space<vmem>>, %arg27: memref<128x128xf32, #tpu.memory_space<vmem>>, %arg28: memref<1x128xf32, #tpu.memory_space<vmem>>, %arg29: memref<64x128xf32, #tpu.memory_space<vmem>>, %arg30: memref<64x512xf32, #tpu.memory_space<vmem>>, %arg31: memref<64x128xf32, #tpu.memory_space<vmem>>) attributes {dimension_semantics = [#tpu.dimension_semantics<arbitrary>], iteration_bounds = array<i64: 1>, scalar_prefetch = 0 : i64, scratch_operands = 2 : i64, tpu.core_type = #tpu.core_type<tc>, window_params = [{pipeline_mode = #tpu.pipeline_mode<synchronous>, transform_indices = @transform_0, window_bounds = array<i64: 64, 152>}, {pipeline_mode = #tpu.pipeline_mode<synchronous>, transform_indices = @transform_1, window_bounds = array<i64: 8, 8>}, {pipeline_mode = #tpu.pipeline_mode<synchronous>, transform_indices = @transform_2, window_bounds = array<i64: 152, 128>}, {pipeline_mode = #tpu.pipeline_mode<synchronous>, transform_indices = @transform_3, window_bounds = array<i64: 1, 128>}, {pipeline_mode = #tpu.pipeline_mode<synchronous>, transform_indices = @transform_4, window_bounds = array<i64: 128, 256>}, {pipeline_mode = #tpu.pipeline_mode<synchronous>, transform_indices = @transform_5, window_bounds = array<i64: 1, 256>}, {pipeline_mode = #tpu.pipeline_mode<synchronous>, transform_indices = @transform_6, window_bounds = array<i64: 256, 256>}, {pipeline_mode = #tpu.pipeline_mode<synchronous>, transform_indices = @transform_7, window_bounds = array<i64: 1, 256>}, {pipeline_mode = #tpu.pipeline_mode<synchronous>, transform_indices = @transform_8, window_bounds = array<i64: 256, 128>}, {pipeline_mode = #tpu.pipeline_mode<synchronous>, transform_indices = @transform_9, window_bounds = array<i64: 1, 128>}, {pipeline_mode = #tpu.pipeline_mode<synchronous>, transform_indices = @transform_10, window_bounds = array<i64: 128, 64>}, {pipeline_mode = #tpu.pipeline_mode<synchronous>, transform_indices = @transform_11, window_bounds = array<i64: 1, 64>}, {pipeline_mode = #tpu.pipeline_mode<synchronous>, transform_indices = @transform_12, window_bounds = array<i64: 8, 32>}, {pipeline_mode = #tpu.pipeline_mode<synchronous>, transform_indices = @transform_13, window_bounds = array<i64: 1, 32>}, {pipeline_mode = #tpu.pipeline_mode<synchronous>, transform_indices = @transform_14, window_bounds = array<i64: 32, 32>}, {pipeline_mode = #tpu.pipeline_mode<synchronous>, transform_indices = @transform_15, window_bounds = array<i64: 1, 32>}, {pipeline_mode = #tpu.pipeline_mode<synchronous>, transform_indices = @transform_16, window_bounds = array<i64: 32, 64>}, {pipeline_mode = #tpu.pipeline_mode<synchronous>, transform_indices = @transform_17, window_bounds = array<i64: 1, 64>}, {pipeline_mode = #tpu.pipeline_mode<synchronous>, transform_indices = @transform_18, window_bounds = array<i64: 64, 512>}, {pipeline_mode = #tpu.pipeline_mode<synchronous>, transform_indices = @transform_19, window_bounds = array<i64: 64, 512>}, {pipeline_mode = #tpu.pipeline_mode<synchronous>, transform_indices = @transform_20, window_bounds = array<i64: 128, 512>}, {pipeline_mode = #tpu.pipeline_mode<synchronous>, transform_indices = @transform_21, window_bounds = array<i64: 1, 512>}, {pipeline_mode = #tpu.pipeline_mode<synchronous>, transform_indices = @transform_22, window_bounds = array<i64: 128, 256>}, {pipeline_mode = #tpu.pipeline_mode<synchronous>, transform_indices = @transform_23, window_bounds = array<i64: 1, 256>}, {pipeline_mode = #tpu.pipeline_mode<synchronous>, transform_indices = @transform_24, window_bounds = array<i64: 256, 128>}, {pipeline_mode = #tpu.pipeline_mode<synchronous>, transform_indices = @transform_25, window_bounds = array<i64: 1, 128>}, {pipeline_mode = #tpu.pipeline_mode<synchronous>, transform_indices = @transform_26, window_bounds = array<i64: 128, 128>}, {pipeline_mode = #tpu.pipeline_mode<synchronous>, transform_indices = @transform_27, window_bounds = array<i64: 1, 128>}, {pipeline_mode = #tpu.pipeline_mode<synchronous>, transform_indices = @transform_28, window_bounds = array<i64: 64, 128>}]} {
    %c0 = arith.constant 0 : index
    %c0_0 = arith.constant 0 : index
    %0 = vector.load %arg1[%c0, %c0_0] : memref<64x152xf32, #tpu.memory_space<vmem>>, vector<64x152xf32>
    %c0_1 = arith.constant 0 : index
    %c0_2 = arith.constant 0 : index
    %1 = vector.load %arg3[%c0_1, %c0_2] : memref<152x128xf32, #tpu.memory_space<vmem>>, vector<152x128xf32>
    %cst = arith.constant dense<0.000000e+00> : vector<64x128xf32>
    %2 = tpu.matmul %0, %1, %cst {dimension_numbers = #tpu.dot_dimension_numbers<[1], [0], [0], [1], [0, 0, 1, 1], [], []>} : vector<64x152xf32>, vector<152x128xf32>, vector<64x128xf32> -> vector<64x128xf32>
    %c0_3 = arith.constant 0 : index
    %c0_4 = arith.constant 0 : index
    %3 = vector.load %arg4[%c0_3, %c0_4] : memref<1x128xf32, #tpu.memory_space<vmem>>, vector<1x128xf32>
    %4 = vector.broadcast %3 : vector<1x128xf32> to vector<64x128xf32>
    %5 = arith.addf %2, %4 : vector<64x128xf32>
    %cst_5 = arith.constant 0.000000e+00 : f32
    %6 = vector.broadcast %cst_5 : f32 to vector<64x128xf32>
    %7 = arith.maximumf %5, %6 : vector<64x128xf32>
    %c0_6 = arith.constant 0 : index
    %c0_7 = arith.constant 0 : index
    %8 = vector.load %arg5[%c0_6, %c0_7] : memref<128x256xf32, #tpu.memory_space<vmem>>, vector<128x256xf32>
    %cst_8 = arith.constant dense<0.000000e+00> : vector<64x256xf32>
    %9 = tpu.matmul %7, %8, %cst_8 {dimension_numbers = #tpu.dot_dimension_numbers<[1], [0], [0], [1], [0, 0, 1, 1], [], []>} : vector<64x128xf32>, vector<128x256xf32>, vector<64x256xf32> -> vector<64x256xf32>
    %c0_9 = arith.constant 0 : index
    %c0_10 = arith.constant 0 : index
    %10 = vector.load %arg6[%c0_9, %c0_10] : memref<1x256xf32, #tpu.memory_space<vmem>>, vector<1x256xf32>
    %11 = vector.broadcast %10 : vector<1x256xf32> to vector<64x256xf32>
    %12 = arith.addf %9, %11 : vector<64x256xf32>
    %cst_11 = arith.constant 0.000000e+00 : f32
    %13 = vector.broadcast %cst_11 : f32 to vector<64x256xf32>
    %14 = arith.maximumf %12, %13 : vector<64x256xf32>
    %c0_12 = arith.constant 0 : index
    %c0_13 = arith.constant 0 : index
    %15 = vector.load %arg7[%c0_12, %c0_13] : memref<256x256xf32, #tpu.memory_space<vmem>>, vector<256x256xf32>
    %cst_14 = arith.constant dense<0.000000e+00> : vector<64x256xf32>
    %16 = tpu.matmul %14, %15, %cst_14 {dimension_numbers = #tpu.dot_dimension_numbers<[1], [0], [0], [1], [0, 0, 1, 1], [], []>} : vector<64x256xf32>, vector<256x256xf32>, vector<64x256xf32> -> vector<64x256xf32>
    %c0_15 = arith.constant 0 : index
    %c0_16 = arith.constant 0 : index
    %17 = vector.load %arg8[%c0_15, %c0_16] : memref<1x256xf32, #tpu.memory_space<vmem>>, vector<1x256xf32>
    %18 = vector.broadcast %17 : vector<1x256xf32> to vector<64x256xf32>
    %19 = arith.addf %16, %18 : vector<64x256xf32>
    %cst_17 = arith.constant 0.000000e+00 : f32
    %20 = vector.broadcast %cst_17 : f32 to vector<64x256xf32>
    %21 = arith.maximumf %19, %20 : vector<64x256xf32>
    %c0_18 = arith.constant 0 : index
    %c0_19 = arith.constant 0 : index
    %22 = vector.load %arg9[%c0_18, %c0_19] : memref<256x128xf32, #tpu.memory_space<vmem>>, vector<256x128xf32>
    %cst_20 = arith.constant dense<0.000000e+00> : vector<64x128xf32>
    %23 = tpu.matmul %21, %22, %cst_20 {dimension_numbers = #tpu.dot_dimension_numbers<[1], [0], [0], [1], [0, 0, 1, 1], [], []>} : vector<64x256xf32>, vector<256x128xf32>, vector<64x128xf32> -> vector<64x128xf32>
    %c0_21 = arith.constant 0 : index
    %c0_22 = arith.constant 0 : index
    %24 = vector.load %arg10[%c0_21, %c0_22] : memref<1x128xf32, #tpu.memory_space<vmem>>, vector<1x128xf32>
    %25 = vector.broadcast %24 : vector<1x128xf32> to vector<64x128xf32>
    %26 = arith.addf %23, %25 : vector<64x128xf32>
    %cst_23 = arith.constant 0.000000e+00 : f32
    %27 = vector.broadcast %cst_23 : f32 to vector<64x128xf32>
    %28 = arith.maximumf %26, %27 : vector<64x128xf32>
    %c0_24 = arith.constant 0 : index
    %c0_25 = arith.constant 0 : index
    %29 = vector.load %arg11[%c0_24, %c0_25] : memref<128x64xf32, #tpu.memory_space<vmem>>, vector<128x64xf32>
    %cst_26 = arith.constant dense<0.000000e+00> : vector<64x64xf32>
    %30 = tpu.matmul %28, %29, %cst_26 {dimension_numbers = #tpu.dot_dimension_numbers<[1], [0], [0], [1], [0, 0, 1, 1], [], []>} : vector<64x128xf32>, vector<128x64xf32>, vector<64x64xf32> -> vector<64x64xf32>
    %c0_27 = arith.constant 0 : index
    %c0_28 = arith.constant 0 : index
    %31 = vector.load %arg12[%c0_27, %c0_28] : memref<1x64xf32, #tpu.memory_space<vmem>>, vector<1x64xf32>
    %32 = vector.broadcast %31 : vector<1x64xf32> to vector<64x64xf32>
    %33 = arith.addf %30, %32 : vector<64x64xf32>
    %cst_29 = arith.constant 0.000000e+00 : f32
    %34 = vector.broadcast %cst_29 : f32 to vector<64x64xf32>
    %35 = arith.maximumf %33, %34 : vector<64x64xf32>
    %c0_30 = arith.constant 0 : index
    %c0_31 = arith.constant 0 : index
    %36 = vector.load %arg2[%c0_30, %c0_31] : memref<8x8xf32, #tpu.memory_space<vmem>>, vector<8x8xf32>
    %c0_32 = arith.constant 0 : index
    %c0_33 = arith.constant 0 : index
    %37 = vector.load %arg13[%c0_32, %c0_33] : memref<8x32xf32, #tpu.memory_space<vmem>>, vector<8x32xf32>
    %cst_34 = arith.constant dense<0.000000e+00> : vector<8x32xf32>
    %38 = tpu.matmul %36, %37, %cst_34 {dimension_numbers = #tpu.dot_dimension_numbers<[1], [0], [0], [1], [0, 0, 1, 1], [], []>} : vector<8x8xf32>, vector<8x32xf32>, vector<8x32xf32> -> vector<8x32xf32>
    %c0_35 = arith.constant 0 : index
    %c0_36 = arith.constant 0 : index
    %39 = vector.load %arg14[%c0_35, %c0_36] : memref<1x32xf32, #tpu.memory_space<vmem>>, vector<1x32xf32>
    %40 = vector.broadcast %39 : vector<1x32xf32> to vector<8x32xf32>
    %41 = arith.addf %38, %40 : vector<8x32xf32>
    %cst_37 = arith.constant 0.000000e+00 : f32
    %42 = vector.broadcast %cst_37 : f32 to vector<8x32xf32>
    %43 = arith.maximumf %41, %42 : vector<8x32xf32>
    %c0_38 = arith.constant 0 : index
    %c0_39 = arith.constant 0 : index
    %44 = vector.load %arg15[%c0_38, %c0_39] : memref<32x32xf32, #tpu.memory_space<vmem>>, vector<32x32xf32>
    %cst_40 = arith.constant dense<0.000000e+00> : vector<8x32xf32>
    %45 = tpu.matmul %43, %44, %cst_40 {dimension_numbers = #tpu.dot_dimension_numbers<[1], [0], [0], [1], [0, 0, 1, 1], [], []>} : vector<8x32xf32>, vector<32x32xf32>, vector<8x32xf32> -> vector<8x32xf32>
    %c0_41 = arith.constant 0 : index
    %c0_42 = arith.constant 0 : index
    %46 = vector.load %arg16[%c0_41, %c0_42] : memref<1x32xf32, #tpu.memory_space<vmem>>, vector<1x32xf32>
    %47 = vector.broadcast %46 : vector<1x32xf32> to vector<8x32xf32>
    %48 = arith.addf %45, %47 : vector<8x32xf32>
    %cst_43 = arith.constant 0.000000e+00 : f32
    %49 = vector.broadcast %cst_43 : f32 to vector<8x32xf32>
    %50 = arith.maximumf %48, %49 : vector<8x32xf32>
    %c0_44 = arith.constant 0 : index
    %c0_45 = arith.constant 0 : index
    %51 = vector.load %arg17[%c0_44, %c0_45] : memref<32x64xf32, #tpu.memory_space<vmem>>, vector<32x64xf32>
    %cst_46 = arith.constant dense<0.000000e+00> : vector<8x64xf32>
    %52 = tpu.matmul %50, %51, %cst_46 {dimension_numbers = #tpu.dot_dimension_numbers<[1], [0], [0], [1], [0, 0, 1, 1], [], []>} : vector<8x32xf32>, vector<32x64xf32>, vector<8x64xf32> -> vector<8x64xf32>
    %c0_47 = arith.constant 0 : index
    %c0_48 = arith.constant 0 : index
    %53 = vector.load %arg18[%c0_47, %c0_48] : memref<1x64xf32, #tpu.memory_space<vmem>>, vector<1x64xf32>
    %54 = vector.broadcast %53 : vector<1x64xf32> to vector<8x64xf32>
    %55 = arith.addf %52, %54 : vector<8x64xf32>
    %cst_49 = arith.constant 0.000000e+00 : f32
    %56 = vector.broadcast %cst_49 : f32 to vector<8x64xf32>
    %57 = arith.maximumf %55, %56 : vector<8x64xf32>
    %c0_50 = arith.constant 0 : index
    %c0_51 = arith.constant 0 : index
    %58 = vector.load %arg20[%c0_50, %c0_51] : memref<64x512xf32, #tpu.memory_space<vmem>>, vector<64x512xf32>
    %cst_52 = arith.constant dense<0.000000e+00> : vector<8x512xf32>
    %59 = tpu.matmul %57, %58, %cst_52 {dimension_numbers = #tpu.dot_dimension_numbers<[1], [0], [0], [1], [0, 0, 1, 1], [], []>} : vector<8x64xf32>, vector<64x512xf32>, vector<8x512xf32> -> vector<8x512xf32>
    %c0_53 = arith.constant 0 : index
    %c0_54 = arith.constant 0 : index
    %60 = vector.load %arg22[%c0_53, %c0_54] : memref<1x512xf32, #tpu.memory_space<vmem>>, vector<1x512xf32>
    %61 = vector.broadcast %60 : vector<1x512xf32> to vector<8x512xf32>
    %62 = arith.addf %59, %61 : vector<8x512xf32>
    %c0_55 = arith.constant 0 : index
    %c0_56 = arith.constant 0 : index
    %63 = vector.load %arg19[%c0_55, %c0_56] : memref<64x512xf32, #tpu.memory_space<vmem>>, vector<64x512xf32>
    %cst_57 = arith.constant dense<0.000000e+00> : vector<64x512xf32>
    %64 = tpu.matmul %35, %63, %cst_57 {dimension_numbers = #tpu.dot_dimension_numbers<[1], [0], [0], [1], [0, 0, 1, 1], [], []>} : vector<64x64xf32>, vector<64x512xf32>, vector<64x512xf32> -> vector<64x512xf32>
    %c0_58 = arith.constant 0 : index
    %c0_59 = arith.constant 0 : index
    %65 = vector.load %arg30[%c0_58, %c0_59] : memref<64x512xf32, #tpu.memory_space<vmem>>, vector<64x512xf32>
    tpu.vector_store %arg30[%c0_58, %c0_59], %64 {strides = array<i32>} : memref<64x512xf32, #tpu.memory_space<vmem>>, vector<64x512xf32>,
    %c0_60 = arith.constant 0 : index
    %c0_61 = arith.constant 0 : index
    %66 = vector.load %arg21[%c0_60, %c0_61] : memref<128x512xf32, #tpu.memory_space<vmem>>, vector<128x512xf32>
    %cst_62 = arith.constant 0.000000e+00 : f32
    %67 = vector.broadcast %cst_62 : f32 to vector<8x128xf32>
    %cst_63 = arith.constant 0.000000e+00 : f32
    %68 = vector.broadcast %cst_63 : f32 to vector<8x128xf32>
    %c0_i32 = arith.constant 0 : i32
    %c8_i32 = arith.constant 8 : i32
    %69 = arith.muli %c0_i32, %c8_i32 : i32
    %70 = tpu.assume_multiple %69, 8 : i32
    %71 = arith.index_cast %70 : i32 to index
    %c0_64 = arith.constant 0 : index
    %72 = vector.load %arg30[%71, %c0_64] : memref<64x512xf32, #tpu.memory_space<vmem>>, vector<8x512xf32>
    %73 = arith.addf %72, %62 : vector<8x512xf32>
    %cst_65 = arith.constant dense<0.000000e+00> : vector<8x512xf32>
    %74 = tpu.matmul %67, %66, %cst_65 {dimension_numbers = #tpu.dot_dimension_numbers<[1], [0], [0], [1], [0, 0, 1, 1], [], []>} : vector<8x128xf32>, vector<128x512xf32>, vector<8x512xf32> -> vector<8x512xf32>
    %75 = arith.addf %73, %74 : vector<8x512xf32>
    %76 = vector.extract_strided_slice %75 {offsets = [0, 0], sizes = [8, 128], strides = [1, 1]} : vector<8x512xf32> to vector<8x128xf32>
    %77 = arith.negf %76 : vector<8x128xf32>
    %78 = math.exp %77 : vector<8x128xf32>
    %cst_66 = arith.constant 1.000000e+00 : f32
    %79 = vector.broadcast %cst_66 : f32 to vector<8x128xf32>
    %80 = arith.addf %79, %78 : vector<8x128xf32>
    %81 = arith.divf %79, %80 : vector<8x128xf32>
    %82 = vector.extract_strided_slice %75 {offsets = [0, 128], sizes = [8, 128], strides = [1, 1]} : vector<8x512xf32> to vector<8x128xf32>
    %83 = arith.negf %82 : vector<8x128xf32>
    %84 = math.exp %83 : vector<8x128xf32>
    %cst_67 = arith.constant 1.000000e+00 : f32
    %85 = vector.broadcast %cst_67 : f32 to vector<8x128xf32>
    %86 = arith.addf %85, %84 : vector<8x128xf32>
    %87 = arith.divf %85, %86 : vector<8x128xf32>
    %88 = vector.extract_strided_slice %75 {offsets = [0, 256], sizes = [8, 128], strides = [1, 1]} : vector<8x512xf32> to vector<8x128xf32>
    %89 = math.tanh %88 : vector<8x128xf32>
    %90 = vector.extract_strided_slice %75 {offsets = [0, 384], sizes = [8, 128], strides = [1, 1]} : vector<8x512xf32> to vector<8x128xf32>
    %91 = arith.negf %90 : vector<8x128xf32>
    %92 = math.exp %91 : vector<8x128xf32>
    %cst_68 = arith.constant 1.000000e+00 : f32
    %93 = vector.broadcast %cst_68 : f32 to vector<8x128xf32>
    %94 = arith.addf %93, %92 : vector<8x128xf32>
    %95 = arith.divf %93, %94 : vector<8x128xf32>
    %96 = arith.mulf %87, %68 : vector<8x128xf32>
    %97 = arith.mulf %81, %89 : vector<8x128xf32>
    %98 = arith.addf %96, %97 : vector<8x128xf32>
    %99 = math.tanh %98 : vector<8x128xf32>
    %100 = arith.mulf %95, %99 : vector<8x128xf32>
    %101 = arith.index_cast %70 : i32 to index
    %c0_69 = arith.constant 0 : index
    %102 = vector.load %arg31[%101, %c0_69] : memref<64x128xf32, #tpu.memory_space<vmem>>, vector<8x128xf32>
    tpu.vector_store %arg31[%101, %c0_69], %100 {strides = array<i32>} : memref<64x128xf32, #tpu.memory_space<vmem>>, vector<8x128xf32>,
    %c1_i32 = arith.constant 1 : i32
    %c8_i32_70 = arith.constant 8 : i32
    %103 = arith.muli %c1_i32, %c8_i32_70 : i32
    %104 = tpu.assume_multiple %103, 8 : i32
    %105 = arith.index_cast %104 : i32 to index
    %c0_71 = arith.constant 0 : index
    %106 = vector.load %arg30[%105, %c0_71] : memref<64x512xf32, #tpu.memory_space<vmem>>, vector<8x512xf32>
    %107 = arith.addf %106, %62 : vector<8x512xf32>
    %cst_72 = arith.constant dense<0.000000e+00> : vector<8x512xf32>
    %108 = tpu.matmul %100, %66, %cst_72 {dimension_numbers = #tpu.dot_dimension_numbers<[1], [0], [0], [1], [0, 0, 1, 1], [], []>} : vector<8x128xf32>, vector<128x512xf32>, vector<8x512xf32> -> vector<8x512xf32>
    %109 = arith.addf %107, %108 : vector<8x512xf32>
    %110 = vector.extract_strided_slice %109 {offsets = [0, 0], sizes = [8, 128], strides = [1, 1]} : vector<8x512xf32> to vector<8x128xf32>
    %111 = arith.negf %110 : vector<8x128xf32>
    %112 = math.exp %111 : vector<8x128xf32>
    %cst_73 = arith.constant 1.000000e+00 : f32
    %113 = vector.broadcast %cst_73 : f32 to vector<8x128xf32>
    %114 = arith.addf %113, %112 : vector<8x128xf32>
    %115 = arith.divf %113, %114 : vector<8x128xf32>
    %116 = vector.extract_strided_slice %109 {offsets = [0, 128], sizes = [8, 128], strides = [1, 1]} : vector<8x512xf32> to vector<8x128xf32>
    %117 = arith.negf %116 : vector<8x128xf32>
    %118 = math.exp %117 : vector<8x128xf32>
    %cst_74 = arith.constant 1.000000e+00 : f32
    %119 = vector.broadcast %cst_74 : f32 to vector<8x128xf32>
    %120 = arith.addf %119, %118 : vector<8x128xf32>
    %121 = arith.divf %119, %120 : vector<8x128xf32>
    %122 = vector.extract_strided_slice %109 {offsets = [0, 256], sizes = [8, 128], strides = [1, 1]} : vector<8x512xf32> to vector<8x128xf32>
    %123 = math.tanh %122 : vector<8x128xf32>
    %124 = vector.extract_strided_slice %109 {offsets = [0, 384], sizes = [8, 128], strides = [1, 1]} : vector<8x512xf32> to vector<8x128xf32>
    %125 = arith.negf %124 : vector<8x128xf32>
    %126 = math.exp %125 : vector<8x128xf32>
    %cst_75 = arith.constant 1.000000e+00 : f32
    %127 = vector.broadcast %cst_75 : f32 to vector<8x128xf32>
    %128 = arith.addf %127, %126 : vector<8x128xf32>
    %129 = arith.divf %127, %128 : vector<8x128xf32>
    %130 = arith.mulf %121, %98 : vector<8x128xf32>
    %131 = arith.mulf %115, %123 : vector<8x128xf32>
    %132 = arith.addf %130, %131 : vector<8x128xf32>
    %133 = math.tanh %132 : vector<8x128xf32>
    %134 = arith.mulf %129, %133 : vector<8x128xf32>
    %135 = arith.index_cast %104 : i32 to index
    %c0_76 = arith.constant 0 : index
    %136 = vector.load %arg31[%135, %c0_76] : memref<64x128xf32, #tpu.memory_space<vmem>>, vector<8x128xf32>
    tpu.vector_store %arg31[%135, %c0_76], %134 {strides = array<i32>} : memref<64x128xf32, #tpu.memory_space<vmem>>, vector<8x128xf32>,
    %c2_i32 = arith.constant 2 : i32
    %c8_i32_77 = arith.constant 8 : i32
    %137 = arith.muli %c2_i32, %c8_i32_77 : i32
    %138 = tpu.assume_multiple %137, 8 : i32
    %139 = arith.index_cast %138 : i32 to index
    %c0_78 = arith.constant 0 : index
    %140 = vector.load %arg30[%139, %c0_78] : memref<64x512xf32, #tpu.memory_space<vmem>>, vector<8x512xf32>
    %141 = arith.addf %140, %62 : vector<8x512xf32>
    %cst_79 = arith.constant dense<0.000000e+00> : vector<8x512xf32>
    %142 = tpu.matmul %134, %66, %cst_79 {dimension_numbers = #tpu.dot_dimension_numbers<[1], [0], [0], [1], [0, 0, 1, 1], [], []>} : vector<8x128xf32>, vector<128x512xf32>, vector<8x512xf32> -> vector<8x512xf32>
    %143 = arith.addf %141, %142 : vector<8x512xf32>
    %144 = vector.extract_strided_slice %143 {offsets = [0, 0], sizes = [8, 128], strides = [1, 1]} : vector<8x512xf32> to vector<8x128xf32>
    %145 = arith.negf %144 : vector<8x128xf32>
    %146 = math.exp %145 : vector<8x128xf32>
    %cst_80 = arith.constant 1.000000e+00 : f32
    %147 = vector.broadcast %cst_80 : f32 to vector<8x128xf32>
    %148 = arith.addf %147, %146 : vector<8x128xf32>
    %149 = arith.divf %147, %148 : vector<8x128xf32>
    %150 = vector.extract_strided_slice %143 {offsets = [0, 128], sizes = [8, 128], strides = [1, 1]} : vector<8x512xf32> to vector<8x128xf32>
    %151 = arith.negf %150 : vector<8x128xf32>
    %152 = math.exp %151 : vector<8x128xf32>
    %cst_81 = arith.constant 1.000000e+00 : f32
    %153 = vector.broadcast %cst_81 : f32 to vector<8x128xf32>
    %154 = arith.addf %153, %152 : vector<8x128xf32>
    %155 = arith.divf %153, %154 : vector<8x128xf32>
    %156 = vector.extract_strided_slice %143 {offsets = [0, 256], sizes = [8, 128], strides = [1, 1]} : vector<8x512xf32> to vector<8x128xf32>
    %157 = math.tanh %156 : vector<8x128xf32>
    %158 = vector.extract_strided_slice %143 {offsets = [0, 384], sizes = [8, 128], strides = [1, 1]} : vector<8x512xf32> to vector<8x128xf32>
    %159 = arith.negf %158 : vector<8x128xf32>
    %160 = math.exp %159 : vector<8x128xf32>
    %cst_82 = arith.constant 1.000000e+00 : f32
    %161 = vector.broadcast %cst_82 : f32 to vector<8x128xf32>
    %162 = arith.addf %161, %160 : vector<8x128xf32>
    %163 = arith.divf %161, %162 : vector<8x128xf32>
    %164 = arith.mulf %155, %132 : vector<8x128xf32>
    %165 = arith.mulf %149, %157 : vector<8x128xf32>
    %166 = arith.addf %164, %165 : vector<8x128xf32>
    %167 = math.tanh %166 : vector<8x128xf32>
    %168 = arith.mulf %163, %167 : vector<8x128xf32>
    %169 = arith.index_cast %138 : i32 to index
    %c0_83 = arith.constant 0 : index
    %170 = vector.load %arg31[%169, %c0_83] : memref<64x128xf32, #tpu.memory_space<vmem>>, vector<8x128xf32>
    tpu.vector_store %arg31[%169, %c0_83], %168 {strides = array<i32>} : memref<64x128xf32, #tpu.memory_space<vmem>>, vector<8x128xf32>,
    %c3_i32 = arith.constant 3 : i32
    %c8_i32_84 = arith.constant 8 : i32
    %171 = arith.muli %c3_i32, %c8_i32_84 : i32
    %172 = tpu.assume_multiple %171, 8 : i32
    %173 = arith.index_cast %172 : i32 to index
    %c0_85 = arith.constant 0 : index
    %174 = vector.load %arg30[%173, %c0_85] : memref<64x512xf32, #tpu.memory_space<vmem>>, vector<8x512xf32>
    %175 = arith.addf %174, %62 : vector<8x512xf32>
    %cst_86 = arith.constant dense<0.000000e+00> : vector<8x512xf32>
    %176 = tpu.matmul %168, %66, %cst_86 {dimension_numbers = #tpu.dot_dimension_numbers<[1], [0], [0], [1], [0, 0, 1, 1], [], []>} : vector<8x128xf32>, vector<128x512xf32>, vector<8x512xf32> -> vector<8x512xf32>
    %177 = arith.addf %175, %176 : vector<8x512xf32>
    %178 = vector.extract_strided_slice %177 {offsets = [0, 0], sizes = [8, 128], strides = [1, 1]} : vector<8x512xf32> to vector<8x128xf32>
    %179 = arith.negf %178 : vector<8x128xf32>
    %180 = math.exp %179 : vector<8x128xf32>
    %cst_87 = arith.constant 1.000000e+00 : f32
    %181 = vector.broadcast %cst_87 : f32 to vector<8x128xf32>
    %182 = arith.addf %181, %180 : vector<8x128xf32>
    %183 = arith.divf %181, %182 : vector<8x128xf32>
    %184 = vector.extract_strided_slice %177 {offsets = [0, 128], sizes = [8, 128], strides = [1, 1]} : vector<8x512xf32> to vector<8x128xf32>
    %185 = arith.negf %184 : vector<8x128xf32>
    %186 = math.exp %185 : vector<8x128xf32>
    %cst_88 = arith.constant 1.000000e+00 : f32
    %187 = vector.broadcast %cst_88 : f32 to vector<8x128xf32>
    %188 = arith.addf %187, %186 : vector<8x128xf32>
    %189 = arith.divf %187, %188 : vector<8x128xf32>
    %190 = vector.extract_strided_slice %177 {offsets = [0, 256], sizes = [8, 128], strides = [1, 1]} : vector<8x512xf32> to vector<8x128xf32>
    %191 = math.tanh %190 : vector<8x128xf32>
    %192 = vector.extract_strided_slice %177 {offsets = [0, 384], sizes = [8, 128], strides = [1, 1]} : vector<8x512xf32> to vector<8x128xf32>
    %193 = arith.negf %192 : vector<8x128xf32>
    %194 = math.exp %193 : vector<8x128xf32>
    %cst_89 = arith.constant 1.000000e+00 : f32
    %195 = vector.broadcast %cst_89 : f32 to vector<8x128xf32>
    %196 = arith.addf %195, %194 : vector<8x128xf32>
    %197 = arith.divf %195, %196 : vector<8x128xf32>
    %198 = arith.mulf %189, %166 : vector<8x128xf32>
    %199 = arith.mulf %183, %191 : vector<8x128xf32>
    %200 = arith.addf %198, %199 : vector<8x128xf32>
    %201 = math.tanh %200 : vector<8x128xf32>
    %202 = arith.mulf %197, %201 : vector<8x128xf32>
    %203 = arith.index_cast %172 : i32 to index
    %c0_90 = arith.constant 0 : index
    %204 = vector.load %arg31[%203, %c0_90] : memref<64x128xf32, #tpu.memory_space<vmem>>, vector<8x128xf32>
    tpu.vector_store %arg31[%203, %c0_90], %202 {strides = array<i32>} : memref<64x128xf32, #tpu.memory_space<vmem>>, vector<8x128xf32>,
    %c4_i32 = arith.constant 4 : i32
    %c8_i32_91 = arith.constant 8 : i32
    %205 = arith.muli %c4_i32, %c8_i32_91 : i32
    %206 = tpu.assume_multiple %205, 8 : i32
    %207 = arith.index_cast %206 : i32 to index
    %c0_92 = arith.constant 0 : index
    %208 = vector.load %arg30[%207, %c0_92] : memref<64x512xf32, #tpu.memory_space<vmem>>, vector<8x512xf32>
    %209 = arith.addf %208, %62 : vector<8x512xf32>
    %cst_93 = arith.constant dense<0.000000e+00> : vector<8x512xf32>
    %210 = tpu.matmul %202, %66, %cst_93 {dimension_numbers = #tpu.dot_dimension_numbers<[1], [0], [0], [1], [0, 0, 1, 1], [], []>} : vector<8x128xf32>, vector<128x512xf32>, vector<8x512xf32> -> vector<8x512xf32>
    %211 = arith.addf %209, %210 : vector<8x512xf32>
    %212 = vector.extract_strided_slice %211 {offsets = [0, 0], sizes = [8, 128], strides = [1, 1]} : vector<8x512xf32> to vector<8x128xf32>
    %213 = arith.negf %212 : vector<8x128xf32>
    %214 = math.exp %213 : vector<8x128xf32>
    %cst_94 = arith.constant 1.000000e+00 : f32
    %215 = vector.broadcast %cst_94 : f32 to vector<8x128xf32>
    %216 = arith.addf %215, %214 : vector<8x128xf32>
    %217 = arith.divf %215, %216 : vector<8x128xf32>
    %218 = vector.extract_strided_slice %211 {offsets = [0, 128], sizes = [8, 128], strides = [1, 1]} : vector<8x512xf32> to vector<8x128xf32>
    %219 = arith.negf %218 : vector<8x128xf32>
    %220 = math.exp %219 : vector<8x128xf32>
    %cst_95 = arith.constant 1.000000e+00 : f32
    %221 = vector.broadcast %cst_95 : f32 to vector<8x128xf32>
    %222 = arith.addf %221, %220 : vector<8x128xf32>
    %223 = arith.divf %221, %222 : vector<8x128xf32>
    %224 = vector.extract_strided_slice %211 {offsets = [0, 256], sizes = [8, 128], strides = [1, 1]} : vector<8x512xf32> to vector<8x128xf32>
    %225 = math.tanh %224 : vector<8x128xf32>
    %226 = vector.extract_strided_slice %211 {offsets = [0, 384], sizes = [8, 128], strides = [1, 1]} : vector<8x512xf32> to vector<8x128xf32>
    %227 = arith.negf %226 : vector<8x128xf32>
    %228 = math.exp %227 : vector<8x128xf32>
    %cst_96 = arith.constant 1.000000e+00 : f32
    %229 = vector.broadcast %cst_96 : f32 to vector<8x128xf32>
    %230 = arith.addf %229, %228 : vector<8x128xf32>
    %231 = arith.divf %229, %230 : vector<8x128xf32>
    %232 = arith.mulf %223, %200 : vector<8x128xf32>
    %233 = arith.mulf %217, %225 : vector<8x128xf32>
    %234 = arith.addf %232, %233 : vector<8x128xf32>
    %235 = math.tanh %234 : vector<8x128xf32>
    %236 = arith.mulf %231, %235 : vector<8x128xf32>
    %237 = arith.index_cast %206 : i32 to index
    %c0_97 = arith.constant 0 : index
    %238 = vector.load %arg31[%237, %c0_97] : memref<64x128xf32, #tpu.memory_space<vmem>>, vector<8x128xf32>
    tpu.vector_store %arg31[%237, %c0_97], %236 {strides = array<i32>} : memref<64x128xf32, #tpu.memory_space<vmem>>, vector<8x128xf32>,
    %c5_i32 = arith.constant 5 : i32
    %c8_i32_98 = arith.constant 8 : i32
    %239 = arith.muli %c5_i32, %c8_i32_98 : i32
    %240 = tpu.assume_multiple %239, 8 : i32
    %241 = arith.index_cast %240 : i32 to index
    %c0_99 = arith.constant 0 : index
    %242 = vector.load %arg30[%241, %c0_99] : memref<64x512xf32, #tpu.memory_space<vmem>>, vector<8x512xf32>
    %243 = arith.addf %242, %62 : vector<8x512xf32>
    %cst_100 = arith.constant dense<0.000000e+00> : vector<8x512xf32>
    %244 = tpu.matmul %236, %66, %cst_100 {dimension_numbers = #tpu.dot_dimension_numbers<[1], [0], [0], [1], [0, 0, 1, 1], [], []>} : vector<8x128xf32>, vector<128x512xf32>, vector<8x512xf32> -> vector<8x512xf32>
    %245 = arith.addf %243, %244 : vector<8x512xf32>
    %246 = vector.extract_strided_slice %245 {offsets = [0, 0], sizes = [8, 128], strides = [1, 1]} : vector<8x512xf32> to vector<8x128xf32>
    %247 = arith.negf %246 : vector<8x128xf32>
    %248 = math.exp %247 : vector<8x128xf32>
    %cst_101 = arith.constant 1.000000e+00 : f32
    %249 = vector.broadcast %cst_101 : f32 to vector<8x128xf32>
    %250 = arith.addf %249, %248 : vector<8x128xf32>
    %251 = arith.divf %249, %250 : vector<8x128xf32>
    %252 = vector.extract_strided_slice %245 {offsets = [0, 128], sizes = [8, 128], strides = [1, 1]} : vector<8x512xf32> to vector<8x128xf32>
    %253 = arith.negf %252 : vector<8x128xf32>
    %254 = math.exp %253 : vector<8x128xf32>
    %cst_102 = arith.constant 1.000000e+00 : f32
    %255 = vector.broadcast %cst_102 : f32 to vector<8x128xf32>
    %256 = arith.addf %255, %254 : vector<8x128xf32>
    %257 = arith.divf %255, %256 : vector<8x128xf32>
    %258 = vector.extract_strided_slice %245 {offsets = [0, 256], sizes = [8, 128], strides = [1, 1]} : vector<8x512xf32> to vector<8x128xf32>
    %259 = math.tanh %258 : vector<8x128xf32>
    %260 = vector.extract_strided_slice %245 {offsets = [0, 384], sizes = [8, 128], strides = [1, 1]} : vector<8x512xf32> to vector<8x128xf32>
    %261 = arith.negf %260 : vector<8x128xf32>
    %262 = math.exp %261 : vector<8x128xf32>
    %cst_103 = arith.constant 1.000000e+00 : f32
    %263 = vector.broadcast %cst_103 : f32 to vector<8x128xf32>
    %264 = arith.addf %263, %262 : vector<8x128xf32>
    %265 = arith.divf %263, %264 : vector<8x128xf32>
    %266 = arith.mulf %257, %234 : vector<8x128xf32>
    %267 = arith.mulf %251, %259 : vector<8x128xf32>
    %268 = arith.addf %266, %267 : vector<8x128xf32>
    %269 = math.tanh %268 : vector<8x128xf32>
    %270 = arith.mulf %265, %269 : vector<8x128xf32>
    %271 = arith.index_cast %240 : i32 to index
    %c0_104 = arith.constant 0 : index
    %272 = vector.load %arg31[%271, %c0_104] : memref<64x128xf32, #tpu.memory_space<vmem>>, vector<8x128xf32>
    tpu.vector_store %arg31[%271, %c0_104], %270 {strides = array<i32>} : memref<64x128xf32, #tpu.memory_space<vmem>>, vector<8x128xf32>,
    %c6_i32 = arith.constant 6 : i32
    %c8_i32_105 = arith.constant 8 : i32
    %273 = arith.muli %c6_i32, %c8_i32_105 : i32
    %274 = tpu.assume_multiple %273, 8 : i32
    %275 = arith.index_cast %274 : i32 to index
    %c0_106 = arith.constant 0 : index
    %276 = vector.load %arg30[%275, %c0_106] : memref<64x512xf32, #tpu.memory_space<vmem>>, vector<8x512xf32>
    %277 = arith.addf %276, %62 : vector<8x512xf32>
    %cst_107 = arith.constant dense<0.000000e+00> : vector<8x512xf32>
    %278 = tpu.matmul %270, %66, %cst_107 {dimension_numbers = #tpu.dot_dimension_numbers<[1], [0], [0], [1], [0, 0, 1, 1], [], []>} : vector<8x128xf32>, vector<128x512xf32>, vector<8x512xf32> -> vector<8x512xf32>
    %279 = arith.addf %277, %278 : vector<8x512xf32>
    %280 = vector.extract_strided_slice %279 {offsets = [0, 0], sizes = [8, 128], strides = [1, 1]} : vector<8x512xf32> to vector<8x128xf32>
    %281 = arith.negf %280 : vector<8x128xf32>
    %282 = math.exp %281 : vector<8x128xf32>
    %cst_108 = arith.constant 1.000000e+00 : f32
    %283 = vector.broadcast %cst_108 : f32 to vector<8x128xf32>
    %284 = arith.addf %283, %282 : vector<8x128xf32>
    %285 = arith.divf %283, %284 : vector<8x128xf32>
    %286 = vector.extract_strided_slice %279 {offsets = [0, 128], sizes = [8, 128], strides = [1, 1]} : vector<8x512xf32> to vector<8x128xf32>
    %287 = arith.negf %286 : vector<8x128xf32>
    %288 = math.exp %287 : vector<8x128xf32>
    %cst_109 = arith.constant 1.000000e+00 : f32
    %289 = vector.broadcast %cst_109 : f32 to vector<8x128xf32>
    %290 = arith.addf %289, %288 : vector<8x128xf32>
    %291 = arith.divf %289, %290 : vector<8x128xf32>
    %292 = vector.extract_strided_slice %279 {offsets = [0, 256], sizes = [8, 128], strides = [1, 1]} : vector<8x512xf32> to vector<8x128xf32>
    %293 = math.tanh %292 : vector<8x128xf32>
    %294 = vector.extract_strided_slice %279 {offsets = [0, 384], sizes = [8, 128], strides = [1, 1]} : vector<8x512xf32> to vector<8x128xf32>
    %295 = arith.negf %294 : vector<8x128xf32>
    %296 = math.exp %295 : vector<8x128xf32>
    %cst_110 = arith.constant 1.000000e+00 : f32
    %297 = vector.broadcast %cst_110 : f32 to vector<8x128xf32>
    %298 = arith.addf %297, %296 : vector<8x128xf32>
    %299 = arith.divf %297, %298 : vector<8x128xf32>
    %300 = arith.mulf %291, %268 : vector<8x128xf32>
    %301 = arith.mulf %285, %293 : vector<8x128xf32>
    %302 = arith.addf %300, %301 : vector<8x128xf32>
    %303 = math.tanh %302 : vector<8x128xf32>
    %304 = arith.mulf %299, %303 : vector<8x128xf32>
    %305 = arith.index_cast %274 : i32 to index
    %c0_111 = arith.constant 0 : index
    %306 = vector.load %arg31[%305, %c0_111] : memref<64x128xf32, #tpu.memory_space<vmem>>, vector<8x128xf32>
    tpu.vector_store %arg31[%305, %c0_111], %304 {strides = array<i32>} : memref<64x128xf32, #tpu.memory_space<vmem>>, vector<8x128xf32>,
    %c7_i32 = arith.constant 7 : i32
    %c8_i32_112 = arith.constant 8 : i32
    %307 = arith.muli %c7_i32, %c8_i32_112 : i32
    %308 = tpu.assume_multiple %307, 8 : i32
    %309 = arith.index_cast %308 : i32 to index
    %c0_113 = arith.constant 0 : index
    %310 = vector.load %arg30[%309, %c0_113] : memref<64x512xf32, #tpu.memory_space<vmem>>, vector<8x512xf32>
    %311 = arith.addf %310, %62 : vector<8x512xf32>
    %cst_114 = arith.constant dense<0.000000e+00> : vector<8x512xf32>
    %312 = tpu.matmul %304, %66, %cst_114 {dimension_numbers = #tpu.dot_dimension_numbers<[1], [0], [0], [1], [0, 0, 1, 1], [], []>} : vector<8x128xf32>, vector<128x512xf32>, vector<8x512xf32> -> vector<8x512xf32>
    %313 = arith.addf %311, %312 : vector<8x512xf32>
    %314 = vector.extract_strided_slice %313 {offsets = [0, 0], sizes = [8, 128], strides = [1, 1]} : vector<8x512xf32> to vector<8x128xf32>
    %315 = arith.negf %314 : vector<8x128xf32>
    %316 = math.exp %315 : vector<8x128xf32>
    %cst_115 = arith.constant 1.000000e+00 : f32
    %317 = vector.broadcast %cst_115 : f32 to vector<8x128xf32>
    %318 = arith.addf %317, %316 : vector<8x128xf32>
    %319 = arith.divf %317, %318 : vector<8x128xf32>
    %320 = vector.extract_strided_slice %313 {offsets = [0, 128], sizes = [8, 128], strides = [1, 1]} : vector<8x512xf32> to vector<8x128xf32>
    %321 = arith.negf %320 : vector<8x128xf32>
    %322 = math.exp %321 : vector<8x128xf32>
    %cst_116 = arith.constant 1.000000e+00 : f32
    %323 = vector.broadcast %cst_116 : f32 to vector<8x128xf32>
    %324 = arith.addf %323, %322 : vector<8x128xf32>
    %325 = arith.divf %323, %324 : vector<8x128xf32>
    %326 = vector.extract_strided_slice %313 {offsets = [0, 256], sizes = [8, 128], strides = [1, 1]} : vector<8x512xf32> to vector<8x128xf32>
    %327 = math.tanh %326 : vector<8x128xf32>
    %328 = vector.extract_strided_slice %313 {offsets = [0, 384], sizes = [8, 128], strides = [1, 1]} : vector<8x512xf32> to vector<8x128xf32>
    %329 = arith.negf %328 : vector<8x128xf32>
    %330 = math.exp %329 : vector<8x128xf32>
    %cst_117 = arith.constant 1.000000e+00 : f32
    %331 = vector.broadcast %cst_117 : f32 to vector<8x128xf32>
    %332 = arith.addf %331, %330 : vector<8x128xf32>
    %333 = arith.divf %331, %332 : vector<8x128xf32>
    %334 = arith.mulf %325, %302 : vector<8x128xf32>
    %335 = arith.mulf %319, %327 : vector<8x128xf32>
    %336 = arith.addf %334, %335 : vector<8x128xf32>
    %337 = math.tanh %336 : vector<8x128xf32>
    %338 = arith.mulf %333, %337 : vector<8x128xf32>
    %339 = arith.index_cast %308 : i32 to index
    %c0_118 = arith.constant 0 : index
    %340 = vector.load %arg31[%339, %c0_118] : memref<64x128xf32, #tpu.memory_space<vmem>>, vector<8x128xf32>
    tpu.vector_store %arg31[%339, %c0_118], %338 {strides = array<i32>} : memref<64x128xf32, #tpu.memory_space<vmem>>, vector<8x128xf32>,
    %c8_i32_119 = arith.constant 8 : i32
    %c0_120 = arith.constant 0 : index
    %c0_121 = arith.constant 0 : index
    %341 = vector.load %arg31[%c0_120, %c0_121] : memref<64x128xf32, #tpu.memory_space<vmem>>, vector<64x128xf32>
    %c0_122 = arith.constant 0 : index
    %c0_123 = arith.constant 0 : index
    %342 = vector.load %arg23[%c0_122, %c0_123] : memref<128x256xf32, #tpu.memory_space<vmem>>, vector<128x256xf32>
    %cst_124 = arith.constant dense<0.000000e+00> : vector<64x256xf32>
    %343 = tpu.matmul %341, %342, %cst_124 {dimension_numbers = #tpu.dot_dimension_numbers<[1], [0], [0], [1], [0, 0, 1, 1], [], []>} : vector<64x128xf32>, vector<128x256xf32>, vector<64x256xf32> -> vector<64x256xf32>
    %c0_125 = arith.constant 0 : index
    %c0_126 = arith.constant 0 : index
    %344 = vector.load %arg24[%c0_125, %c0_126] : memref<1x256xf32, #tpu.memory_space<vmem>>, vector<1x256xf32>
    %345 = vector.broadcast %344 : vector<1x256xf32> to vector<64x256xf32>
    %346 = arith.addf %343, %345 : vector<64x256xf32>
    %cst_127 = arith.constant 0.000000e+00 : f32
    %347 = vector.broadcast %cst_127 : f32 to vector<64x256xf32>
    %348 = arith.maximumf %346, %347 : vector<64x256xf32>
    %c0_128 = arith.constant 0 : index
    %c0_129 = arith.constant 0 : index
    %349 = vector.load %arg25[%c0_128, %c0_129] : memref<256x128xf32, #tpu.memory_space<vmem>>, vector<256x128xf32>
    %cst_130 = arith.constant dense<0.000000e+00> : vector<64x128xf32>
    %350 = tpu.matmul %348, %349, %cst_130 {dimension_numbers = #tpu.dot_dimension_numbers<[1], [0], [0], [1], [0, 0, 1, 1], [], []>} : vector<64x256xf32>, vector<256x128xf32>, vector<64x128xf32> -> vector<64x128xf32>
    %c0_131 = arith.constant 0 : index
    %c0_132 = arith.constant 0 : index
    %351 = vector.load %arg26[%c0_131, %c0_132] : memref<1x128xf32, #tpu.memory_space<vmem>>, vector<1x128xf32>
    %352 = vector.broadcast %351 : vector<1x128xf32> to vector<64x128xf32>
    %353 = arith.addf %350, %352 : vector<64x128xf32>
    %cst_133 = arith.constant 0.000000e+00 : f32
    %354 = vector.broadcast %cst_133 : f32 to vector<64x128xf32>
    %355 = arith.maximumf %353, %354 : vector<64x128xf32>
    %c0_134 = arith.constant 0 : index
    %c0_135 = arith.constant 0 : index
    %356 = vector.load %arg27[%c0_134, %c0_135] : memref<128x128xf32, #tpu.memory_space<vmem>>, vector<128x128xf32>
    %cst_136 = arith.constant dense<0.000000e+00> : vector<64x128xf32>
    %357 = tpu.matmul %355, %356, %cst_136 {dimension_numbers = #tpu.dot_dimension_numbers<[1], [0], [0], [1], [0, 0, 1, 1], [], []>} : vector<64x128xf32>, vector<128x128xf32>, vector<64x128xf32> -> vector<64x128xf32>
    %c0_137 = arith.constant 0 : index
    %c0_138 = arith.constant 0 : index
    %358 = vector.load %arg28[%c0_137, %c0_138] : memref<1x128xf32, #tpu.memory_space<vmem>>, vector<1x128xf32>
    %359 = vector.broadcast %358 : vector<1x128xf32> to vector<64x128xf32>
    %360 = arith.addf %357, %359 : vector<64x128xf32>
    %cst_139 = arith.constant dense<0xFF800000> : vector<64xf32>
    %361 = vector.multi_reduction <maximumf>, %360, %cst_139 [1] : vector<64x128xf32> to vector<64xf32>
    %362 = vector.shape_cast %361 : vector<64xf32> to vector<64x1xf32>
    %363 = vector.broadcast %362 : vector<64x1xf32> to vector<64x128xf32>
    %364 = arith.subf %360, %363 : vector<64x128xf32>
    %365 = math.exp %364 : vector<64x128xf32>
    %cst_140 = arith.constant dense<0.000000e+00> : vector<64xf32>
    %366 = vector.multi_reduction <add>, %365, %cst_140 [1] : vector<64x128xf32> to vector<64xf32>
    %367 = vector.shape_cast %366 : vector<64xf32> to vector<64x1xf32>
    %368 = math.log %367 : vector<64x1xf32>
    %369 = vector.broadcast %368 : vector<64x1xf32> to vector<64x128xf32>
    %370 = arith.subf %364, %369 : vector<64x128xf32>
    %c0_141 = arith.constant 0 : index
    %c0_142 = arith.constant 0 : index
    %371 = vector.load %arg29[%c0_141, %c0_142] : memref<64x128xf32, #tpu.memory_space<vmem>>, vector<64x128xf32>
    tpu.vector_store %arg29[%c0_141, %c0_142], %370 {strides = array<i32>} : memref<64x128xf32, #tpu.memory_space<vmem>>, vector<64x128xf32>,
    return
  }
  func.func @transform_0(%arg0: i32) -> (i32, i32) {
    %c0_i32 = arith.constant 0 : i32
    %c0_i32_0 = arith.constant 0 : i32
    %c0_i32_1 = arith.constant 0 : i32
    return %c0_i32, %c0_i32_0 : i32, i32
  }
  func.func @transform_1(%arg0: i32) -> (i32, i32) {
    %c0_i32 = arith.constant 0 : i32
    %c0_i32_0 = arith.constant 0 : i32
    %c0_i32_1 = arith.constant 0 : i32
    return %c0_i32, %c0_i32_0 : i32, i32
  }
  func.func @transform_2(%arg0: i32) -> (i32, i32) {
    %c0_i32 = arith.constant 0 : i32
    %c0_i32_0 = arith.constant 0 : i32
    %c0_i32_1 = arith.constant 0 : i32
    return %c0_i32, %c0_i32_0 : i32, i32
  }
  func.func @transform_3(%arg0: i32) -> (i32, i32) {
    %c0_i32 = arith.constant 0 : i32
    %c0_i32_0 = arith.constant 0 : i32
    %c0_i32_1 = arith.constant 0 : i32
    return %c0_i32, %c0_i32_0 : i32, i32
  }
  func.func @transform_4(%arg0: i32) -> (i32, i32) {
    %c0_i32 = arith.constant 0 : i32
    %c0_i32_0 = arith.constant 0 : i32
    %c0_i32_1 = arith.constant 0 : i32
    return %c0_i32, %c0_i32_0 : i32, i32
  }
  func.func @transform_5(%arg0: i32) -> (i32, i32) {
    %c0_i32 = arith.constant 0 : i32
    %c0_i32_0 = arith.constant 0 : i32
    %c0_i32_1 = arith.constant 0 : i32
    return %c0_i32, %c0_i32_0 : i32, i32
  }
  func.func @transform_6(%arg0: i32) -> (i32, i32) {
    %c0_i32 = arith.constant 0 : i32
    %c0_i32_0 = arith.constant 0 : i32
    %c0_i32_1 = arith.constant 0 : i32
    return %c0_i32, %c0_i32_0 : i32, i32
  }
  func.func @transform_7(%arg0: i32) -> (i32, i32) {
    %c0_i32 = arith.constant 0 : i32
    %c0_i32_0 = arith.constant 0 : i32
    %c0_i32_1 = arith.constant 0 : i32
    return %c0_i32, %c0_i32_0 : i32, i32
  }
  func.func @transform_8(%arg0: i32) -> (i32, i32) {
    %c0_i32 = arith.constant 0 : i32
    %c0_i32_0 = arith.constant 0 : i32
    %c0_i32_1 = arith.constant 0 : i32
    return %c0_i32, %c0_i32_0 : i32, i32
  }
  func.func @transform_9(%arg0: i32) -> (i32, i32) {
    %c0_i32 = arith.constant 0 : i32
    %c0_i32_0 = arith.constant 0 : i32
    %c0_i32_1 = arith.constant 0 : i32
    return %c0_i32, %c0_i32_0 : i32, i32
  }
  func.func @transform_10(%arg0: i32) -> (i32, i32) {
    %c0_i32 = arith.constant 0 : i32
    %c0_i32_0 = arith.constant 0 : i32
    %c0_i32_1 = arith.constant 0 : i32
    return %c0_i32, %c0_i32_0 : i32, i32
  }
  func.func @transform_11(%arg0: i32) -> (i32, i32) {
    %c0_i32 = arith.constant 0 : i32
    %c0_i32_0 = arith.constant 0 : i32
    %c0_i32_1 = arith.constant 0 : i32
    return %c0_i32, %c0_i32_0 : i32, i32
  }
  func.func @transform_12(%arg0: i32) -> (i32, i32) {
    %c0_i32 = arith.constant 0 : i32
    %c0_i32_0 = arith.constant 0 : i32
    %c0_i32_1 = arith.constant 0 : i32
    return %c0_i32, %c0_i32_0 : i32, i32
  }
  func.func @transform_13(%arg0: i32) -> (i32, i32) {
    %c0_i32 = arith.constant 0 : i32
    %c0_i32_0 = arith.constant 0 : i32
    %c0_i32_1 = arith.constant 0 : i32
    return %c0_i32, %c0_i32_0 : i32, i32
  }
  func.func @transform_14(%arg0: i32) -> (i32, i32) {
    %c0_i32 = arith.constant 0 : i32
    %c0_i32_0 = arith.constant 0 : i32
    %c0_i32_1 = arith.constant 0 : i32
    return %c0_i32, %c0_i32_0 : i32, i32
  }
  func.func @transform_15(%arg0: i32) -> (i32, i32) {
    %c0_i32 = arith.constant 0 : i32
    %c0_i32_0 = arith.constant 0 : i32
    %c0_i32_1 = arith.constant 0 : i32
    return %c0_i32, %c0_i32_0 : i32, i32
  }
  func.func @transform_16(%arg0: i32) -> (i32, i32) {
    %c0_i32 = arith.constant 0 : i32
    %c0_i32_0 = arith.constant 0 : i32
    %c0_i32_1 = arith.constant 0 : i32
    return %c0_i32, %c0_i32_0 : i32, i32
  }
  func.func @transform_17(%arg0: i32) -> (i32, i32) {
    %c0_i32 = arith.constant 0 : i32
    %c0_i32_0 = arith.constant 0 : i32
    %c0_i32_1 = arith.constant 0 : i32
    return %c0_i32, %c0_i32_0 : i32, i32
  }
  func.func @transform_18(%arg0: i32) -> (i32, i32) {
    %c0_i32 = arith.constant 0 : i32
    %c0_i32_0 = arith.constant 0 : i32
    %c0_i32_1 = arith.constant 0 : i32
    return %c0_i32, %c0_i32_0 : i32, i32
  }
  func.func @transform_19(%arg0: i32) -> (i32, i32) {
    %c0_i32 = arith.constant 0 : i32
    %c0_i32_0 = arith.constant 0 : i32
    %c0_i32_1 = arith.constant 0 : i32
    return %c0_i32, %c0_i32_0 : i32, i32
  }
  func.func @transform_20(%arg0: i32) -> (i32, i32) {
    %c0_i32 = arith.constant 0 : i32
    %c0_i32_0 = arith.constant 0 : i32
    %c0_i32_1 = arith.constant 0 : i32
    return %c0_i32, %c0_i32_0 : i32, i32
  }
  func.func @transform_21(%arg0: i32) -> (i32, i32) {
    %c0_i32 = arith.constant 0 : i32
    %c0_i32_0 = arith.constant 0 : i32
    %c0_i32_1 = arith.constant 0 : i32
    return %c0_i32, %c0_i32_0 : i32, i32
  }
  func.func @transform_22(%arg0: i32) -> (i32, i32) {
    %c0_i32 = arith.constant 0 : i32
    %c0_i32_0 = arith.constant 0 : i32
    %c0_i32_1 = arith.constant 0 : i32
    return %c0_i32, %c0_i32_0 : i32, i32
  }
  func.func @transform_23(%arg0: i32) -> (i32, i32) {
    %c0_i32 = arith.constant 0 : i32
    %c0_i32_0 = arith.constant 0 : i32
    %c0_i32_1 = arith.constant 0 : i32
    return %c0_i32, %c0_i32_0 : i32, i32
  }
  func.func @transform_24(%arg0: i32) -> (i32, i32) {
    %c0_i32 = arith.constant 0 : i32
    %c0_i32_0 = arith.constant 0 : i32
    %c0_i32_1 = arith.constant 0 : i32
    return %c0_i32, %c0_i32_0 : i32, i32
  }
  func.func @transform_25(%arg0: i32) -> (i32, i32) {
    %c0_i32 = arith.constant 0 : i32
    %c0_i32_0 = arith.constant 0 : i32
    %c0_i32_1 = arith.constant 0 : i32
    return %c0_i32, %c0_i32_0 : i32, i32
  }
  func.func @transform_26(%arg0: i32) -> (i32, i32) {
    %c0_i32 = arith.constant 0 : i32
    %c0_i32_0 = arith.constant 0 : i32
    %c0_i32_1 = arith.constant 0 : i32
    return %c0_i32, %c0_i32_0 : i32, i32
  }
  func.func @transform_27(%arg0: i32) -> (i32, i32) {
    %c0_i32 = arith.constant 0 : i32
    %c0_i32_0 = arith.constant 0 : i32
    %c0_i32_1 = arith.constant 0 : i32
    return %c0_i32, %c0_i32_0 : i32, i32
  }
  func.func @transform_28(%arg0: i32) -> (i32, i32) {
    %c0_i32 = arith.constant 0 : i32
    %c0_i32_0 = arith.constant 0 : i32
    %c0_i32_1 = arith.constant 0 : i32
    return %c0_i32, %c0_i32_0 : i32, i32
  }
}

</mosaic_0001>

<bundles_post_ra>
// kernel: tpu_custom_call.1
= control target key start
LH: loop header
LB: loop body
LE: loop exit
PB: predicated region body
PF: predicated region fallthrough
CT: control target
= control target key end

     0   :  { %s5809_s0 = inlined_call_operand.hbm [shape: f32[64,152], index: 0, kind: input, shape index: {}]   ;;  %s5810_s1 = inlined_call_operand.vmem [shape: f32[8,8], index: 1, kind: input, shape index: {}]   ;;  %s5811_s2 = inlined_call_operand.vmem [shape: f32[152,128], index: 2, kind: input, shape index: {}]   ;;  %s5812_s3 = inlined_call_operand.hbm [shape: f32[1,128], index: 3, kind: input, shape index: {}]   ;;  %s5813_s4 = inlined_call_operand.hbm [shape: f32[128,256], index: 4, kind: input, shape index: {}]   ;;  %s5814_s5 = inlined_call_operand.hbm [shape: f32[1,256], index: 5, kind: input, shape index: {}]   ;;  %s5815_s6 = inlined_call_operand.hbm [shape: f32[256,256], index: 6, kind: input, shape index: {}]   ;;  %s5816_s7 = inlined_call_operand.hbm [shape: f32[1,256], index: 7, kind: input, shape index: {}]   ;;  %s5817_s8 = inlined_call_operand.hbm [shape: f32[256,128], index: 8, kind: input, shape index: {}]   ;;  %s5818_s9 = inlined_call_operand.hbm [shape: f32[1,128], index: 9, kind: input, shape index: {}]   ;;  %s5819_s10 = inlined_call_operand.vmem [shape: f32[128,64], index: 10, kind: input, shape index: {}]   ;;  %s5820_s11 = inlined_call_operand.hbm [shape: f32[1,64], index: 11, kind: input, shape index: {}]   ;;  %s5821_s12 = inlined_call_operand.vmem [shape: f32[8,32], index: 12, kind: input, shape index: {}]   ;;  %s5822_s13 = inlined_call_operand.hbm [shape: f32[1,32], index: 13, kind: input, shape index: {}]   ;;  %s5823_s14 = inlined_call_operand.vmem [shape: f32[32,32], index: 14, kind: input, shape index: {}]   ;;  %s5824_s15 = inlined_call_operand.hbm [shape: f32[1,32], index: 15, kind: input, shape index: {}]   ;;  %s5825_s16 = inlined_call_operand.hbm [shape: f32[32,64], index: 16, kind: input, shape index: {}]   ;;  %s5826_s17 = inlined_call_operand.hbm [shape: f32[1,64], index: 17, kind: input, shape index: {}]   ;;  %s5827_s18 = inlined_call_operand.hbm [shape: f32[64,512], index: 18, kind: input, shape index: {}]   ;;  %s5828_s19 = inlined_call_operand.hbm [shape: f32[64,512], index: 19, kind: input, shape index: {}]   ;;  %s5829_s20 = inlined_call_operand.hbm [shape: f32[128,512], index: 20, kind: input, shape index: {}]   ;;  %s5830_s21 = inlined_call_operand.vmem [shape: f32[1,512], index: 21, kind: input, shape index: {}]   ;;  %s5831_s22 = inlined_call_operand.hbm [shape: f32[128,256], index: 22, kind: input, shape index: {}]   ;;  %s5832_s23 = inlined_call_operand.vmem [shape: f32[1,256], index: 23, kind: input, shape index: {}]   ;;  %s5833_s24 = inlined_call_operand.hbm [shape: f32[256,128], index: 24, kind: input, shape index: {}]   ;;  %s5834_s25 = inlined_call_operand.vmem [shape: f32[1,128], index: 25, kind: input, shape index: {}]   ;;  %s5835_s26 = inlined_call_operand.hbm [shape: f32[128,128], index: 26, kind: input, shape index: {}]   ;;  %s5836_s27 = inlined_call_operand.vmem [shape: f32[1,128], index: 27, kind: input, shape index: {}]   ;;  %s5837_s28 = inlined_call_operand.hbm [shape: f32[64,128], index: 28, kind: output, shape index: {}]  }
   0x1   :  { %5934 = sst [smem:[#allocation97_spill]] %s5809_s0 }
   0x2   :  { %5935 = sst [smem:[#allocation98_spill]] %s5810_s1 }
   0x3   :  { %5936 = sst [smem:[#allocation99_spill]] %s5811_s2 }
   0x4   :  { %5937 = sst [smem:[#allocation100_spill]] %s5812_s3 }
   0x5   :  { %5938 = sst [smem:[#allocation101_spill]] %s5813_s4 }
   0x6   :  { %5939 = sst [smem:[#allocation102_spill]] %s5814_s5 }
   0x7   :  { %5940 = sst [smem:[#allocation103_spill]] %s5815_s6 }
   0x8   :  { %5941 = sst [smem:[#allocation104_spill]] %s5816_s7 }
   0x9   :  { %5942 = sst [smem:[#allocation105_spill]] %s5817_s8 }
   0xa   :  { %5943 = sst [smem:[#allocation106_spill]] %s5818_s9 }
   0xb   :  { %5944 = sst [smem:[#allocation107_spill]] %s5819_s10 }
   0xc   :  { %5945 = sst [smem:[#allocation108_spill]] %s5820_s11 }
   0xd   :  { %5946 = sst [smem:[#allocation109_spill]] %s5821_s12 }
   0xe   :  { %5947 = sst [smem:[#allocation110_spill]] %s5834_s25 }
   0xf   :  { %5948 = sst [smem:[#allocation111_spill]] %s5836_s27 }
  0x10   :  { %5949 = sst [smem:[#allocation112_spill]] %s5837_s28 }
  0x11   :  { %33 = vsyncpa [#allocation5], 0 }
  0x12   :  { %34 = vsyncpa [#allocation8], 0 }
  0x13   :  { %35 = vsyncpa [#allocation11], 0 }
  0x14   :  { %36 = vsyncpa [#allocation14], 0 }
  0x15   :  { %37 = vsyncpa [#allocation17], 0 }
  0x16   :  { %38 = vsyncpa [#allocation20], 0 }
  0x17   :  { %39 = vsyncpa [#allocation23], 0 }
  0x18   :  { %40 = vsyncpa [#allocation26], 0 }
  0x19   :  { %41 = vsyncpa [#allocation29], 0 }
  0x1a   :  { %42 = vsyncpa [#allocation32], 0  ;;  %s5950_s9 = sld [smem:[#allocation100_spill]] }
  0x20   :  { %s66_s30 = sshll.u32 %s5950_s9, 4  ;;  %s67_s30 = int_to_ptr.hbm [resolvable:$true] %s66_s30 }
  0x21   :  { %43 = vsyncpa [#allocation6], 0  ;;  %s4246_s3 = smov [#allocation7]   ;;  %s5951_s11 = sld [smem:[#allocation102_spill]] }
  0x22   :  { %s68_s6 = sshll.u32 %s4246_s3, 4  ;;  %s4247_s2 = smov [#allocation10]   ;;  %s69_s6 = int_to_ptr.vmem [resolvable:$true] %s68_s6 }
  0x23   :  { %71 = dma.hbm_to_vmem [thread:$0]  %s67_s30, 16, %s69_s6, [#allocation8]  }
  0x24   :  { %s92_s7 = sshll.u32 %s4247_s2, 4  ;;  %s5952_s4 = sld [smem:[#allocation104_spill]]  ;;  %s93_s7 = int_to_ptr.vmem [resolvable:$true] %s92_s7 }
  0x25   :  { %s5953_s9 = sld [smem:[#allocation106_spill]]  ;;  %s4248_s27 = smov [#allocation13]  }
  0x26   :  { %s116_s25 = sshll.u32 %s4248_s27, 4  ;;  %s4249_s30 = smov [#allocation16]   ;;  %s117_s25 = int_to_ptr.vmem [resolvable:$true] %s116_s25 }
  0x27   :  { %s90_s29 = sshll.u32 %s5951_s11, 4  ;;  %s140_s6 = sshll.u32 %s4249_s30, 4  ;;  %s91_s29 = int_to_ptr.hbm [resolvable:$true] %s90_s29  ;;  %s141_s6 = int_to_ptr.vmem [resolvable:$true] %s140_s6 }
  0x28   :  { %95 = dma.hbm_to_vmem [thread:$0]  %s91_s29, 32, %s93_s7, [#allocation11]  }
  0x29   :  { %s164_s11 = sshll.u32 %s5822_s13, 4  ;;  %s4250_s2 = smov [#allocation19]   ;;  %s165_s11 = int_to_ptr.hbm [resolvable:$true] %s164_s11 }
  0x2a   :  { %s114_s28 = sshll.u32 %s5952_s4, 4  ;;  %s166_s29 = sshll.u32 %s4250_s2, 4  ;;  %s115_s28 = int_to_ptr.hbm [resolvable:$true] %s114_s28  ;;  %s167_s29 = int_to_ptr.vmem [resolvable:$true] %s166_s29 }
  0x2b   :  { %s138_s3 = sshll.u32 %s5953_s9, 4  ;;  %s187_s1 = sshll.u32 %s5825_s16, 4  ;;  %s139_s3 = int_to_ptr.hbm [resolvable:$true] %s138_s3  ;;  %s188_s1 = int_to_ptr.hbm [resolvable:$true] %s187_s1 }
  0x2c   :  { %119 = dma.hbm_to_vmem [thread:$0]  %s115_s28, 32, %s117_s25, [#allocation14]  }
  0x2d   :  { %143 = dma.hbm_to_vmem [thread:$0]  %s139_s3, 16, %s141_s6, [#allocation17]  }
  0x2e   :  { %169 = dma.hbm_to_vmem [thread:$0]  %s165_s11, 16, %s167_s29, [#allocation20]  }
  0x2f   :  { %s4251_s27 = smov [#allocation22]   ;;  %s211_s8 = sshll.u32 %s5827_s18, 4  ;;  %s212_s8 = int_to_ptr.hbm [resolvable:$true] %s211_s8 }
  0x30   :  { %s189_s25 = sshll.u32 %s4251_s27, 4  ;;  %s4252_s13 = smov 128   ;;  %s190_s25 = int_to_ptr.vmem [resolvable:$true] %s189_s25 }
  0x31   :  { %s4253_s5 = smov 8   ;;  %s4254_s9 = smov [#allocation25]  }
  0x32   :  { %195 = dma.hbm_to_vmem [thread:$0]  %s188_s1, 512, %s190_s25, [#allocation23], %s4252_s13, %s4252_s13, %s4253_s5  }
  0x33   :  { %s213_s3 = sshll.u32 %s4254_s9, 4  ;;  %s237_s6 = sshll.u32 %s5829_s20, 4  ;;  %s214_s3 = int_to_ptr.vmem [resolvable:$true] %s213_s3  ;;  %s238_s6 = int_to_ptr.hbm [resolvable:$true] %s237_s6 }
  0x34   :  { %s4255_s10 = smov 512   ;;  %s4256_s0 = smov 32  }
  0x35   :  { %219 = dma.hbm_to_vmem [thread:$0]  %s212_s8, 4096, %s214_s3, [#allocation26], %s4255_s10, %s4255_s10, %s4256_s0  }
  0x36   :  { %s4257_s18 = smov [#allocation28]   ;;  %s267_s7 = sshll.u32 %s5833_s24, 4  ;;  %s268_s7 = int_to_ptr.hbm [resolvable:$true] %s267_s7 }
  0x37   :  { %s239_s11 = sshll.u32 %s4257_s18, 4  ;;  %s5954_s1 = sld [smem:[#allocation97_spill]]  ;;  %s240_s11 = int_to_ptr.vmem [resolvable:$true] %s239_s11 }
  0x38   :  { %245 = dma.hbm_to_vmem [thread:$0]  %s238_s6, 8192, %s240_s11, [#allocation29], %s4255_s10, %s4255_s10, %s4256_s0  }
  0x39   :  { %s4258_s25 = smov [#allocation31]   ;;  %s4259_s4 = smov [#allocation4]  }
  0x3a   :  { %s269_s28 = sshll.u32 %s4258_s25, 4  ;;  %s50_s24 = sshll.u32 %s4259_s4, 4  ;;  %s270_s28 = int_to_ptr.vmem [resolvable:$true] %s269_s28  ;;  %s51_s24 = int_to_ptr.vmem [resolvable:$true] %s50_s24 }
  0x3b   :  { %275 = dma.hbm_to_vmem [thread:$0]  %s268_s7, 4096, %s270_s28, [#allocation32], %s4252_s13, %s4252_s13, %s4253_s5  }
  0x3c   :  { %s4260_s8 = smov 256   ;;  %s4261_s9 = smov 16  }
  0x3d   :  { %s48_s27 = sshll.u32 %s5954_s1, 4  ;;  %s5955_s30 = sld [smem:[#allocation101_spill]]  ;;  %s49_s27 = int_to_ptr.hbm [resolvable:$true] %s48_s27 }
  0x3e   :  { %56 = dma.hbm_to_vmem [thread:$0]  %s49_s27, 2048, %s51_s24, [#allocation5], %s4260_s8, %s4260_s8, %s4261_s9  }
  0x3f   :  { %s4262_s18 = smov [#allocation9]   ;;  %s5956_s7 = sld [smem:[#allocation103_spill]] }
  0x40   :  { %s78_s11 = sshll.u32 %s4262_s18, 4  ;;  %s4263_s12 = smov [#allocation12]   ;;  %s79_s11 = int_to_ptr.vmem [resolvable:$true] %s78_s11 }
  0x41   :  { %s102_s1 = sshll.u32 %s4263_s12, 4  ;;  %s5957_s28 = sld [smem:[#allocation105_spill]]  ;;  %s103_s1 = int_to_ptr.vmem [resolvable:$true] %s102_s1 }
  0x42   :  { %s5958_s16 = sld [smem:[#allocation108_spill]]  ;;  %s4264_s18 = smov [#allocation15]  }
  0x43   :  { %s76_s6 = sshll.u32 %s5955_s30, 4  ;;  %s126_s2 = sshll.u32 %s4264_s18, 4  ;;  %s77_s6 = int_to_ptr.hbm [resolvable:$true] %s76_s6  ;;  %s127_s2 = int_to_ptr.vmem [resolvable:$true] %s126_s2 }
  0x44   :  { %84 = dma.hbm_to_vmem [thread:$0]  %s77_s6, 4096, %s79_s11, [#allocation8], %s4260_s8, %s4260_s8, %s4261_s9  }
  0x45   :  { %s100_s20 = sshll.u32 %s5956_s7, 4  ;;  %s4265_s6 = smov [#allocation18]   ;;  %s101_s20 = int_to_ptr.hbm [resolvable:$true] %s100_s20 }
  0x46   :  { %108 = dma.hbm_to_vmem [thread:$0]  %s101_s20, 8192, %s103_s1, [#allocation11], %s4260_s8, %s4260_s8, %s4261_s9  }
  0x47   :  { %s124_s4 = sshll.u32 %s5957_s28, 4  ;;  %s153_s11 = sshll.u32 %s4265_s6, 4  ;;  %s125_s4 = int_to_ptr.hbm [resolvable:$true] %s124_s4  ;;  %s154_s11 = int_to_ptr.vmem [resolvable:$true] %s153_s11 }
  0x48   :  { %s151_s30 = sshll.u32 %s5958_s16, 4  ;;  %s177_s12 = sshll.u32 %s5824_s15, 4  ;;  %s152_s30 = int_to_ptr.hbm [resolvable:$true] %s151_s30  ;;  %s178_s12 = int_to_ptr.hbm [resolvable:$true] %s177_s12 }
  0x49   :  { %132 = dma.hbm_to_vmem [thread:$0]  %s125_s4, 4096, %s127_s2, [#allocation14], %s4252_s13, %s4252_s13, %s4253_s5  }
  0x4a   :  { %156 = dma.hbm_to_vmem [thread:$0]  %s152_s30, 16, %s154_s11, [#allocation17]  }
  0x4b   :  { %s201_s27 = sshll.u32 %s5826_s17, 4  ;;  %s4266_s25 = smov [#allocation21]   ;;  %s202_s27 = int_to_ptr.hbm [resolvable:$true] %s201_s27 }
  0x4c   :  { %s179_s28 = sshll.u32 %s4266_s25, 4  ;;  %s4267_s24 = smov [#allocation24]   ;;  %s180_s28 = int_to_ptr.vmem [resolvable:$true] %s179_s28 }
  0x4d   :  { %182 = dma.hbm_to_vmem [thread:$0]  %s178_s12, 16, %s180_s28, [#allocation20]  }
  0x4e   :  { %s203_s4 = sshll.u32 %s4267_s24, 4  ;;  %s224_s18 = sshll.u32 %s5828_s19, 4  ;;  %s204_s4 = int_to_ptr.vmem [resolvable:$true] %s203_s4  ;;  %s225_s18 = int_to_ptr.hbm [resolvable:$true] %s224_s18 }
  0x4f   :  { %206 = dma.hbm_to_vmem [thread:$0]  %s202_s27, 16, %s204_s4, [#allocation23]  }
  0x50   :  { %s252_s2 = sshll.u32 %s5831_s22, 4  ;;  %s4268_s6 = smov [#allocation27]   ;;  %s253_s2 = int_to_ptr.hbm [resolvable:$true] %s252_s2 }
  0x51   :  { %s226_s17 = sshll.u32 %s4268_s6, 4  ;;  %s4269_s11 = smov [#allocation30]   ;;  %s227_s17 = int_to_ptr.vmem [resolvable:$true] %s226_s17 }
  0x52   :  { %232 = dma.hbm_to_vmem [thread:$0]  %s225_s18, 4096, %s227_s17, [#allocation26], %s4255_s10, %s4255_s10, %s4256_s0  }
  0x53   :  { %s254_s29 = sshll.u32 %s4269_s11, 4  ;;  %s282_s19 = sshll.u32 %s5835_s26, 4  ;;  %s255_s29 = int_to_ptr.vmem [resolvable:$true] %s254_s29  ;;  %s283_s19 = int_to_ptr.hbm [resolvable:$true] %s282_s19 }
  0x54   :  { %260 = dma.hbm_to_vmem [thread:$0]  %s253_s2, 4096, %s255_s29, [#allocation29], %s4260_s8, %s4260_s8, %s4261_s9  }
  0x55   :  { %s4270_s22 = smov [#allocation33]  }
  0x56   :  { %s284_s20 = sshll.u32 %s4270_s22, 4  ;;  %s285_s20 = int_to_ptr.vmem [resolvable:$true] %s284_s20 }
  0x57   :  { %290 = dma.hbm_to_vmem [thread:$0]  %s283_s19, 2048, %s285_s20, [#allocation32], %s4252_s13, %s4252_s13, %s4253_s5  }
  0x58   :  { %4224 = dma.done.wait [#allocation5], 2048  }
  0x59   :  { %4225 = vsyncadd [#allocation5], 4294965248 }
  0x5a   :  { %4226 = dma.done.wait [#allocation8], 4112  }
  0x5b   :  { %4227 = vsyncadd [#allocation8], 4294963184 }
  0x5c   :  { %4228 = dma.done.wait [#allocation11], 8224  }
  0x5d   :  { %4229 = vsyncadd [#allocation11], 4294959072 }
  0x5e   :  { %4230 = dma.done.wait [#allocation14], 4128  }
  0x5f   :  { %4231 = vsyncadd [#allocation14], 4294963168 }
  0x60   :  { %4232 = dma.done.wait [#allocation17], 32  }
  0x61   :  { %4233 = vsyncadd [#allocation17], 4294967264 }
  0x62   :  { %4234 = dma.done.wait [#allocation20], 32  }
  0x63   :  { %4235 = vsyncadd [#allocation20], 4294967264 }
  0x64   :  { %4236 = dma.done.wait [#allocation23], 528  }
  0x65   :  { %4237 = vsyncadd [#allocation23], 4294966768 }
  0x66   :  { %4238 = dma.done.wait [#allocation26], 8192  }
  0x67   :  { %4239 = vsyncadd [#allocation26], 4294959104 }
  0x68   :  { %4240 = dma.done.wait [#allocation29], 12288  }
  0x69   :  { %4241 = vsyncadd [#allocation29], 4294955008 }
  0x6a   :  { %4242 = dma.done.wait [#allocation32], 6144  }
  0x6b   :  { %4243 = vsyncadd [#allocation32], 4294961152  ;;  %s5959_s0 = sld [smem:[#allocation99_spill]]  ;;  %v370_v9 = vld [vmem:[#allocation4 + $0x8] sm:$0xff]  ;;  %vm408_vm0 = vcmask 195584   ;;  %v372_v14 = vld [vmem:[#allocation4 + $0x18] sm:$0xff] }
  0x6c   :  { %v374_v19 = vld [vmem:[#allocation4 + $0x28] sm:$0xff]  ;;  %v369_v22 = vld [vmem:[#allocation4] sm:$0xff]  ;;  %v376_v24 = vld [vmem:[#allocation4 + $0x38] sm:$0xff]  ;;  %s5960_s30 = sld [smem:[#allocation109_spill]]  ;;  %vm1110_vm1 = vcmask 64512   ;;  %vm1143_vm2 = vcmask 261120  }
  0x6d   :  { %v377_v23 = vld [vmem:[#allocation4 + $0x40] sm:$0xff]  ;;  %v553_v25 = vld [vmem:[#allocation9 + $0xf0] sm:$0xff]  ;;  %v552_v28 = vld [vmem:[#allocation9 + $0xe8] sm:$0xff]  ;;  %s5961_s17 = sld [smem:[#allocation107_spill]]  ;;  %vm1242_vm3 = vcmask 523264  }
  0x6e   :  { %v554_v26 = vld [vmem:[#allocation9 + $0xf8] sm:$0xff]  ;;  %v551_v27 = vld [vmem:[#allocation9 + $0xe0] sm:$0xff]  ;;  %v371_v29 = vld [vmem:[#allocation4 + $0x10] sm:$0xff]  ;;  %s6145_s16 = sld [smem:[#allocation110_spill]] }
  0x6f   :  { %602 = vmatpush.msra.mxu3 %v554_v26  ;;  %v549_v30 = vld [vmem:[#allocation9 + $0xd0] sm:$0xff]  ;;  %v550_v32 = vld [vmem:[#allocation9 + $0xd8] sm:$0xff]  ;;  %v547_v33 = vld [vmem:[#allocation9 + $0xc0] sm:$0xff]  ;;  %s6146_s15 = sld [smem:[#allocation111_spill]] }
  0x70   :  { %v379_v31 = vld [vmem:[#allocation4 + $0x50] sm:$0xff]  ;;  %v378_v34 = vld [vmem:[#allocation4 + $0x48] sm:$0xff]  ;;  %v546_v37 = vld [vmem:[#allocation9 + $0xb8] sm:$0xff]  ;;  %s6147_s29 = sld [smem:[#allocation112_spill]] }
  0x71   :  { %v400_v0 = vld [vmem:[%s5959_s0 + $0x78] sm:$0xff]  ;;  %v399_v1 = vld [vmem:[%s5959_s0 + $0x70] sm:$0xff]  ;;  %v398_v2 = vld [vmem:[%s5959_s0 + $0x68] sm:$0xff]  ;;  %603 = vmatpush.msra.mxu3 %v552_v28 }
  0x72   :  { %433 = vmatpush.msra.mxu0 %v400_v0  ;;  %3446 = vmatpush.msra.mxu2 %v400_v0  ;;  %v397_v3 = vld [vmem:[%s5959_s0 + $0x60] sm:$0xff]  ;;  %v403_v4 = vld [vmem:[%s5959_s0 + $0x90] sm:$0xff]  ;;  %v402_v5 = vld [vmem:[%s5959_s0 + $0x88] sm:$0xff] }
  0x73   :  { %v396_v6 = vld [vmem:[%s5959_s0 + $0x58] sm:$0xff]  ;;  %487 = vmatpush.msra.mxu1 %v403_v4  ;;  %v401_v7 = vld [vmem:[%s5959_s0 + $0x80] sm:$0xff]  ;;  %v395_v8 = vld [vmem:[%s5959_s0 + $0x50] sm:$0xff]  ;;  %604 = vmatpush.msra.mxu3 %v550_v32 }
  0x74   :  { %434 = vmatpush.msra.mxu0 %v399_v1  ;;  %3447 = vmatpush.msra.mxu2 %v399_v1  ;;  %v394_v10 = vld [vmem:[%s5959_s0 + $0x48] sm:$0xff]  ;;  %v393_v11 = vld [vmem:[%s5959_s0 + $0x40] sm:$0xff]  ;;  %v392_v12 = vld [vmem:[%s5959_s0 + $0x38] sm:$0xff] }
  0x75   :  { %488 = vmatpush.msra.mxu1 %v402_v5  ;;  %v391_v13 = vld [vmem:[%s5959_s0 + $0x30] sm:$0xff]  ;;  %v390_v15 = vld [vmem:[%s5959_s0 + $0x28] sm:$0xff]  ;;  %v389_v16 = vld [vmem:[%s5959_s0 + $0x20] sm:$0xff] }
  0x76   :  { %435 = vmatpush.msra.mxu0 %v398_v2  ;;  %3448 = vmatpush.msra.mxu2 %v398_v2  ;;  %v388_v17 = vld [vmem:[%s5959_s0 + $0x18] sm:$0xff]  ;;  %v387_v18 = vld [vmem:[%s5959_s0 + $0x10] sm:$0xff]  ;;  %v386_v20 = vld [vmem:[%s5959_s0 + $0x8] sm:$0xff]  ;;  %s3346_s7 = sshll.u32 %s6147_s29, 4  ;;  %s3347_s7 = int_to_ptr.hbm [resolvable:$true] %s3346_s7 }
  0x77   :  { %489 = vmatpush.msra.mxu1 %v401_v7  ;;  %v385_v21 = vld [vmem:[%s5959_s0] sm:$0xff]  ;;  %v548_v35 = vld [vmem:[#allocation9 + $0xc8] sm:$0xff]  ;;  %v545_v36 = vld [vmem:[#allocation9 + $0xb0] sm:$0xff]  ;;  %s5962_s0 = sld [smem:[#allocation98_spill]] }
  0x78   :  { %436 = vmatpush.msra.mxu0 %v397_v3  ;;  %3449 = vmatpush.msra.mxu2 %v397_v3  ;;  %v543_v38 = vld [vmem:[#allocation9 + $0xa0] sm:$0xff]  ;;  %v544_v39 = vld [vmem:[#allocation9 + $0xa8] sm:$0xff]  ;;  %v541_v41 = vld [vmem:[#allocation9 + $0x90] sm:$0xff] }
  0x79   :  { %3375 = vmatmul.msk.f32.vlgmr.msra.gmra.mxu1 %vm408_vm0, %v370_v9  ;;  %605 = vmatpush.msra.mxu3 %v548_v35  ;;  %v373_v40 = vld [vmem:[#allocation4 + $0x20] sm:$0xff]  ;;  %v380_v45 = vld [vmem:[#allocation4 + $0x58] sm:$0xff]  ;;  %v540_v46 = vld [vmem:[#allocation9 + $0x88] sm:$0xff] }
  0x7a   :  { %437 = vmatpush.msra.mxu0 %v396_v6  ;;  %3450 = vmatpush.msra.mxu2 %v396_v6  ;;  %v381_v42 = vld [vmem:[#allocation4 + $0x60] sm:$0xff]  ;;  %v537_v47 = vld [vmem:[#allocation9 + $0x70] sm:$0xff]  ;;  %v536_v50 = vld [vmem:[#allocation9 + $0x68] sm:$0xff] }
  0x7b   :  { %606 = vmatpush.msra.mxu3 %v546_v37  ;;  %v542_v43 = vld [vmem:[#allocation9 + $0x98] sm:$0xff]  ;;  %v539_v44 = vld [vmem:[#allocation9 + $0x80] sm:$0xff]  ;;  %v375_v51 = vld [vmem:[#allocation4 + $0x30] sm:$0xff] }
  0x7c   :  { %438 = vmatpush.msra.mxu0 %v395_v8  ;;  %3451 = vmatpush.msra.mxu2 %v395_v8  ;;  %v538_v48 = vld [vmem:[#allocation9 + $0x78] sm:$0xff]  ;;  %v535_v49 = vld [vmem:[#allocation9 + $0x60] sm:$0xff]  ;;  %v533_v52 = vld [vmem:[#allocation9 + $0x50] sm:$0xff] }
  0x7d   :  { %607 = vmatpush.msra.mxu3 %v544_v39  ;;  %v383_v53 = vld [vmem:[#allocation4 + $0x70] sm:$0xff]  ;;  %v534_v54 = vld [vmem:[#allocation9 + $0x58] sm:$0xff]  ;;  %v531_v55 = vld [vmem:[#allocation9 + $0x40] sm:$0xff] }
  0x7e   :  { %439 = vmatpush.msra.mxu0 %v394_v10  ;;  %3452 = vmatpush.msra.mxu2 %v394_v10  ;;  %v382_v56 = vld [vmem:[#allocation4 + $0x68] sm:$0xff]  ;;  %v529_v58 = vld [vmem:[#allocation9 + $0x30] sm:$0xff]  ;;  %v530_v60 = vld [vmem:[#allocation9 + $0x38] sm:$0xff] }
  0x7f   :  { %608 = vmatpush.msra.mxu3 %v542_v43  ;;  %v532_v57 = vld [vmem:[#allocation9 + $0x48] sm:$0xff]  ;;  %v384_v59 = vld [vmem:[#allocation4 + $0x78] sm:$0xff]  ;;  %v527_v61 = vld [vmem:[#allocation9 + $0x20] sm:$0xff] }
  0x80   :  { %440 = vmatpush.msra.mxu0 %v393_v11  ;;  %3453 = vmatpush.msra.mxu2 %v393_v11  ;;  %v528_v62 = vld [vmem:[#allocation9 + $0x28] sm:$0xff]  ;;  %v525_v63 = vld [vmem:[#allocation9 + $0x10] sm:$0xff]  ;;  %v526_v0 = vld [vmem:[#allocation9 + $0x18] sm:$0xff] }
  0x81   :  { %3376 = vmatmul.msk.f32.gmra.mxu1 %vm408_vm0, %v372_v14  ;;  %609 = vmatpush.msra.mxu3 %v540_v46  ;;  %v523_v1 = vld [vmem:[#allocation9] sm:$0xff]  ;;  %v524_v2 = vld [vmem:[#allocation9 + $0x8] sm:$0xff]  ;;  %v4573_v5 = vld [vmem:[#allocation7] ss:$0 sm:$0xff] }
  0x82   :  { %441 = vmatpush.msra.mxu0 %v392_v12  ;;  %3454 = vmatpush.msra.mxu2 %v392_v12  ;;  %v718_v35 = vld [vmem:[#allocation12 + $0x1d8] sm:$0xff]  ;;  %v716_v39 = vld [vmem:[#allocation12 + $0x1c8] sm:$0xff] }
  0x83   :  { %610 = vmatpush.msra.mxu3 %v538_v48  ;;  %v712_v48 = vld [vmem:[#allocation12 + $0x1a8] sm:$0xff] }
  0x84   :  { %442 = vmatpush.msra.mxu0 %v391_v13  ;;  %3455 = vmatpush.msra.mxu2 %v391_v13 }
  0x85   :  { %611 = vmatpush.msra.mxu3 %v536_v50  ;;  %v685_v50 = vld [vmem:[#allocation12 + $0xd0] sm:$0xff] }
  0x86   :  { %443 = vmatpush.msra.mxu0 %v390_v15  ;;  %3456 = vmatpush.msra.mxu2 %v390_v15 }
  0x87   :  { %612 = vmatpush.msra.mxu3 %v534_v54  ;;  %v717_v54 = vld [vmem:[#allocation12 + $0x1d0] sm:$0xff] }
  0x88   :  { %444 = vmatpush.msra.mxu0 %v389_v16  ;;  %3457 = vmatpush.msra.mxu2 %v389_v16 }
  0x89   :  { %3377 = vmatmul.msk.f32.gmra.mxu1 %vm408_vm0, %v374_v19  ;;  %613 = vmatpush.msra.mxu3 %v532_v57 }
  0x8a   :  { %445 = vmatpush.msra.mxu0 %v388_v17  ;;  %3458 = vmatpush.msra.mxu2 %v388_v17 }
  0x8b   :  { %614 = vmatpush.msra.mxu3 %v530_v60  ;;  %v674_v60 = vld [vmem:[#allocation12 + $0x78] sm:$0xff] }
  0x8c   :  { %446 = vmatpush.msra.mxu0 %v387_v18  ;;  %3459 = vmatpush.msra.mxu2 %v387_v18 }
  0x8d   :  { %615 = vmatpush.msra.mxu3 %v528_v62  ;;  %v715_v62 = vld [vmem:[#allocation12 + $0x1c0] sm:$0xff] }
  0x8e   :  { %447 = vmatpush.msra.mxu0 %v386_v20  ;;  %3460 = vmatpush.msra.mxu2 %v386_v20 }
  0x8f   :  { %616 = vmatpush.msra.mxu3 %v526_v0 }
  0x90   :  { %448 = vmatpush.msra.mxu0 %v385_v21  ;;  %3461 = vmatpush.msra.mxu2 %v385_v21 }
  0x91   :  { %449 = vmatmul.f32.vlgmr.msra.gmra.mxu0 %v369_v22  ;;  %461 = vmatmul.f32.vlgmr.msra.gmra.mxu2 %v377_v23 }
  0x92   :  { %3378 = vmatmul.msk.f32.gmra.mxu1 %vm408_vm0, %v376_v24  ;;  %561 = vmatpush.msrb.mxu2 %v553_v25 }
  0x93   :  { %617 = vmatpush.msra.mxu3 %v524_v2  ;;  %v704_v2 = vld [vmem:[#allocation12 + $0x168] sm:$0xff] }
  0x94   :  { %562 = vmatpush.msrb.mxu2 %v551_v27 }
  0x96   :  { %563 = vmatpush.msrb.mxu2 %v549_v30  ;;  %v722_v30 = vld [vmem:[#allocation12 + $0x1f8] sm:$0xff] }
  0x97   :  { %852 = vmatpush.msrb.mxu3 %v722_v30  ;;  %v669_v30 = vld [vmem:[#allocation12 + $0x50] sm:$0xff] }
  0x98   :  { %564 = vmatpush.msrb.mxu2 %v547_v33  ;;  %v720_v33 = vld [vmem:[#allocation12 + $0x1e8] sm:$0xff] }
  0x99   :  { %452 = vmatmul.f32.gmra.mxu0 %v371_v29  ;;  %464 = vmatmul.f32.gmra.mxu2 %v379_v31  ;;  %v690_v29 = vld [vmem:[#allocation12 + $0xf8] sm:$0xff]  ;;  %v688_v31 = vld [vmem:[#allocation12 + $0xe8] sm:$0xff] }
  0x9a   :  { %3379 = vmatmul.msk.f32.gmra.mxu1 %vm408_vm0, %v378_v34  ;;  %565 = vmatpush.msrb.mxu2 %v545_v36  ;;  %v686_v34 = vld [vmem:[#allocation12 + $0xd8] sm:$0xff] }
  0x9b   :  { %853 = vmatpush.msrb.mxu3 %v720_v33  ;;  %v699_v33 = vld [vmem:[#allocation12 + $0x140] sm:$0xff] }
  0x9c   :  { %566 = vmatpush.msrb.mxu2 %v543_v38  ;;  %v684_v38 = vld [vmem:[#allocation12 + $0xc8] sm:$0xff] }
  0x9d   :  { %854 = vmatpush.msrb.mxu3 %v718_v35  ;;  %v697_v35 = vld [vmem:[#allocation12 + $0x130] sm:$0xff] }
  0x9e   :  { %567 = vmatpush.msrb.mxu2 %v541_v41  ;;  %v682_v41 = vld [vmem:[#allocation12 + $0xb8] sm:$0xff] }
  0x9f   :  { %855 = vmatpush.msrb.mxu3 %v716_v39  ;;  %v693_v39 = vld [vmem:[#allocation12 + $0x110] sm:$0xff] }
  0xa0   :  { %568 = vmatpush.msrb.mxu2 %v539_v44  ;;  %v721_v44 = vld [vmem:[#allocation12 + $0x1f0] sm:$0xff] }
  0xa1   :  { %455 = vmatmul.f32.gmra.mxu0 %v373_v40  ;;  %467 = vmatmul.f32.gmra.mxu2 %v381_v42  ;;  %v689_v40 = vld [vmem:[#allocation12 + $0xf0] sm:$0xff]  ;;  %v714_v42 = vld [vmem:[#allocation12 + $0x1b8] sm:$0xff] }
  0xa2   :  { %3380 = vmatmul.msk.f32.gmra.mxu1 %vm408_vm0, %v380_v45  ;;  %569 = vmatpush.msrb.mxu2 %v537_v47  ;;  %v687_v45 = vld [vmem:[#allocation12 + $0xe0] sm:$0xff]  ;;  %v680_v47 = vld [vmem:[#allocation12 + $0xa8] sm:$0xff] }
  0xa3   :  { %729 = vmatpush.msrb.mxu1 %v689_v40  ;;  %856 = vmatpush.msrb.mxu3 %v714_v42  ;;  %v660_v40 = vld [vmem:[#allocation12 + $0x8] sm:$0xff]  ;;  %v659_v42 = vld [vmem:[#allocation12] sm:$0xff] }
  0xa4   :  { %570 = vmatpush.msrb.mxu2 %v535_v49  ;;  %v719_v49 = vld [vmem:[#allocation12 + $0x1e0] sm:$0xff]  ;;  %770 = vmatpush.msrb.mxu0 %v721_v44  ;;  %v555_v44 = vld [vmem:[#allocation10] sm:$0x3] }
  0xa5   :  { %730 = vmatpush.msrb.mxu1 %v687_v45  ;;  %857 = vmatpush.msrb.mxu3 %v712_v48  ;;  %v4583_v45 = vperm.slane %v555_v44, 0 }
  0xa6   :  { %571 = vmatpush.msrb.mxu2 %v533_v52  ;;  %v710_v52 = vld [vmem:[#allocation12 + $0x198] sm:$0xff]  ;;  %771 = vmatpush.msrb.mxu0 %v719_v49 }
  0xa7   :  { %731 = vmatpush.msrb.mxu1 %v685_v50  ;;  %858 = vmatpush.msrb.mxu3 %v710_v52 }
  0xa8   :  { %572 = vmatpush.msrb.mxu2 %v531_v55  ;;  %v683_v55 = vld [vmem:[#allocation12 + $0xc0] sm:$0xff]  ;;  %772 = vmatpush.msrb.mxu0 %v717_v54 }
  0xa9   :  { %458 = vmatmul.f32.gmra.mxu0 %v375_v51  ;;  %470 = vmatmul.f32.gmra.mxu2 %v383_v53  ;;  %v678_v51 = vld [vmem:[#allocation12 + $0x98] sm:$0xff] }
  0xaa   :  { %3381 = vmatmul.msk.f32.gmra.mxu1 %vm408_vm0, %v382_v56  ;;  %573 = vmatpush.msrb.mxu2 %v529_v58  ;;  %v676_v58 = vld [vmem:[#allocation12 + $0x88] sm:$0xff] }
  0xab   :  { %732 = vmatpush.msrb.mxu1 %v683_v55  ;;  %773 = vmatpush.msrb.mxu0 %v715_v62 }
  0xac   :  { %574 = vmatpush.msrb.mxu2 %v527_v61  ;;  %v706_v61 = vld [vmem:[#allocation12 + $0x178] sm:$0xff] }
  0xae   :  { %575 = vmatpush.msrb.mxu2 %v525_v63  ;;  %v681_v63 = vld [vmem:[#allocation12 + $0xb0] sm:$0xff] }
  0xaf   :  { %733 = vmatpush.msrb.mxu1 %v681_v63 }
  0xb0   :  { %576 = vmatpush.msrb.mxu2 %v523_v1  ;;  %v672_v1 = vld [vmem:[#allocation12 + $0x68] sm:$0xff] }
  0xb2   :  { %3382 = vmatmul.msk.f32.gmra.mxu1 %vm408_vm0, %v384_v59  ;;  %811 = vmatpush.msra.mxu2 %v690_v29  ;;  %v708_v59 = vld [vmem:[#allocation12 + $0x188] sm:$0xff]  ;;  %v703_v29 = vld [vmem:[#allocation12 + $0x160] sm:$0xff] }
  0xb3   :  { %859 = vmatpush.msrb.mxu3 %v708_v59 }
  0xb4   :  { %812 = vmatpush.msra.mxu2 %v688_v31  ;;  %v701_v31 = vld [vmem:[#allocation12 + $0x150] sm:$0xff] }
  0xb5   :  { %860 = vmatpush.msrb.mxu3 %v706_v61 }
  0xb6   :  { %813 = vmatpush.msra.mxu2 %v686_v34  ;;  %v665_v34 = vld [vmem:[#allocation12 + $0x30] sm:$0xff] }
  0xb7   :  { %861 = vmatpush.msrb.mxu3 %v704_v2 }
  0xb8   :  { %814 = vmatpush.msra.mxu2 %v684_v38  ;;  %v661_v38 = vld [vmem:[#allocation12 + $0x10] sm:$0xff] }
  0xba   :  { %815 = vmatpush.msra.mxu2 %v682_v41  ;;  %v692_v41 = vld [vmem:[#allocation12 + $0x108] sm:$0xff] }
  0xbc   :  { %816 = vmatpush.msra.mxu2 %v680_v47 }
  0xbe   :  { %817 = vmatpush.msra.mxu2 %v678_v51 }
  0xc0   :  { %818 = vmatpush.msra.mxu2 %v676_v58 }
  0xc2   :  { %819 = vmatpush.msra.mxu2 %v674_v60 }
  0xc4   :  { %820 = vmatpush.msra.mxu2 %v672_v1 }
  0xf6   :  { %v491_v3 = vpop.f32.mrf.mxu1 }
  0xfe   :  { %v494_v4 = vpop.f32.mrf.mxu1 }
 0x106   :  { %v497_v8 = vpop.f32.mrf.mxu1 }
 0x10e   :  { %v450_v6 = vpop.f32.mrf.mxu0 }
 0x10f   :  { %v451_v7 = vadd.f32 %v4573_v5, %v450_v6  ;;  %v500_v14 = vpop.f32.mrf.mxu1  ;;  %v679_v6 = vld [vmem:[#allocation12 + $0xa0] sm:$0xff] }
 0x110   :  { %734 = vmatpush.msrb.mxu1 %v679_v6 }
 0x111   :  { %v492_v9 = vadd.f32 %v491_v3, %v451_v7  ;;  %v670_v7 = vld [vmem:[#allocation12 + $0x58] sm:$0xff] }
 0x112   :  { %821 = vmatpush.msra.mxu2 %v670_v7 }
 0x113   :  { %v515_v10 = vmax.f32 %v492_v9, 0.0  ;;  %v711_v9 = vld [vmem:[#allocation12 + $0x1a0] sm:$0xff] }
 0x114   :  { %v462_v18 = vpop.f32.mrf.mxu2 }
 0x115   :  { %577 = vmatmul.f32.vlgmr.msrb.gmra.mxu2 %v515_v10  ;;  %618 = vmatmul.f32.vlgmr.msra.gmra.mxu3 %v515_v10  ;;  %v463_v25 = vadd.f32 %v4573_v5, %v462_v18  ;;  %v677_v10 = vld [vmem:[#allocation12 + $0x90] sm:$0xff]  ;;  %v666_v18 = vld [vmem:[#allocation12 + $0x38] sm:$0xff] }
 0x116   :  { %v453_v11 = vpop.f32.mrf.mxu0  ;;  %735 = vmatpush.msrb.mxu1 %v677_v10  ;;  %v940_v10 = vld [vmem:[#allocation15 + $0xf8] sm:$0xff] }
 0x117   :  { %v454_v12 = vadd.f32 %v4573_v5, %v453_v11  ;;  %v503_v21 = vpop.f32.mrf.mxu1 }
 0x118   :  { %v504_v28 = vadd.f32 %v503_v21, %v463_v25  ;;  %v707_v21 = vld [vmem:[#allocation12 + $0x180] sm:$0xff] }
 0x119   :  { %v495_v13 = vadd.f32 %v494_v4, %v454_v12  ;;  %v713_v4 = vld [vmem:[#allocation12 + $0x1b0] sm:$0xff]  ;;  %v671_v25 = vld [vmem:[#allocation12 + $0x60] sm:$0xff] }
 0x11a   :  { %v519_v36 = vmax.f32 %v504_v28, 0.0  ;;  %774 = vmatpush.msrb.mxu0 %v713_v4 }
 0x11b   :  { %v516_v15 = vmax.f32 %v495_v13, 0.0  ;;  %v668_v13 = vld [vmem:[#allocation12 + $0x48] sm:$0xff] }
 0x11c   :  { %v465_v26 = vpop.f32.mrf.mxu2  ;;  %775 = vmatpush.msrb.mxu0 %v711_v9  ;;  %822 = vmatpush.msra.mxu2 %v668_v13  ;;  %v923_v9 = vld [vmem:[#allocation15 + $0x70] sm:$0xff]  ;;  %v922_v13 = vld [vmem:[#allocation15 + $0x68] sm:$0xff] }
 0x11d   :  { %580 = vmatmul.f32.gmra.mxu2 %v516_v15  ;;  %621 = vmatmul.f32.gmra.mxu3 %v516_v15  ;;  %v466_v37 = vadd.f32 %v4573_v5, %v465_v26  ;;  %v662_v26 = vld [vmem:[#allocation12 + $0x18] sm:$0xff] }
 0x11e   :  { %v456_v16 = vpop.f32.mrf.mxu0  ;;  %823 = vmatpush.msra.mxu2 %v666_v18 }
 0x11f   :  { %v457_v17 = vadd.f32 %v4573_v5, %v456_v16  ;;  %v506_v32 = vpop.f32.mrf.mxu1  ;;  %v709_v16 = vld [vmem:[#allocation12 + $0x190] sm:$0xff] }
 0x120   :  { %v507_v46 = vadd.f32 %v506_v32, %v466_v37  ;;  %776 = vmatpush.msrb.mxu0 %v709_v16  ;;  %v667_v32 = vld [vmem:[#allocation12 + $0x40] sm:$0xff] }
 0x121   :  { %v498_v19 = vadd.f32 %v497_v8, %v457_v17  ;;  %v702_v8 = vld [vmem:[#allocation12 + $0x158] sm:$0xff]  ;;  %v675_v17 = vld [vmem:[#allocation12 + $0x80] sm:$0xff] }
 0x122   :  { %v520_v56 = vmax.f32 %v507_v46, 0.0  ;;  %862 = vmatpush.msrb.mxu3 %v702_v8  ;;  %736 = vmatpush.msrb.mxu1 %v675_v17  ;;  %v695_v37 = vld [vmem:[#allocation12 + $0x120] sm:$0xff]  ;;  %v4585_v46 = vperm.slane %v555_v44, 1  ;;  %v938_v17 = vld [vmem:[#allocation15 + $0xe8] sm:$0xff] }
 0x123   :  { %v517_v20 = vmax.f32 %v498_v19, 0.0  ;;  %v698_v19 = vld [vmem:[#allocation12 + $0x138] sm:$0xff]  ;;  %777 = vmatpush.msrb.mxu0 %v707_v21  ;;  %v937_v21 = vld [vmem:[#allocation15 + $0xe0] sm:$0xff]  ;;  %v914_v44 = vld [vmem:[#allocation15 + $0x28] sm:$0xff] }
 0x124   :  { %v468_v43 = vpop.f32.mrf.mxu2  ;;  %v924_v8 = vld [vmem:[#allocation15 + $0x78] sm:$0xff] }
 0x125   :  { %583 = vmatmul.f32.gmra.mxu2 %v517_v20  ;;  %624 = vmatmul.f32.gmra.mxu3 %v517_v20  ;;  %v469_v57 = vadd.f32 %v4573_v5, %v468_v43  ;;  %v691_v43 = vld [vmem:[#allocation12 + $0x100] sm:$0xff] }
 0x126   :  { %v459_v22 = vpop.f32.mrf.mxu0 }
 0x127   :  { %v460_v23 = vadd.f32 %v4573_v5, %v459_v22  ;;  %v509_v53 = vpop.f32.mrf.mxu1  ;;  %v664_v22 = vld [vmem:[#allocation12 + $0x28] sm:$0xff] }
 0x128   :  { %v510_v0 = vadd.f32 %v509_v53, %v469_v57  ;;  %824 = vmatpush.msra.mxu2 %v664_v22  ;;  %v936_v22 = vld [vmem:[#allocation15 + $0xd8] sm:$0xff] }
 0x129   :  { %v501_v24 = vadd.f32 %v500_v14, %v460_v23  ;;  %v700_v14 = vld [vmem:[#allocation12 + $0x148] sm:$0xff] }
 0x12a   :  { %v521_v11 = vmax.f32 %v510_v0, 0.0  ;;  %863 = vmatpush.msrb.mxu3 %v700_v14  ;;  %v696_v23 = vld [vmem:[#allocation12 + $0x128] sm:$0xff]  ;;  %825 = vmatpush.msra.mxu2 %v662_v26  ;;  %v939_v14 = vld [vmem:[#allocation15 + $0xf0] sm:$0xff] }
 0x12b   :  { %v518_v27 = vmax.f32 %v501_v24, 0.0  ;;  %v705_v24 = vld [vmem:[#allocation12 + $0x170] sm:$0xff] }
 0x12c   :  { %v471_v3 = vpop.f32.mrf.mxu2  ;;  %864 = vmatpush.msrb.mxu3 %v698_v19  ;;  %778 = vmatpush.msrb.mxu0 %v705_v24  ;;  %v935_v26 = vld [vmem:[#allocation15 + $0xd0] sm:$0xff] }
 0x12d   :  { %586 = vmatmul.f32.gmra.mxu2 %v518_v27  ;;  %627 = vmatmul.f32.gmra.mxu3 %v518_v27  ;;  %v472_v12 = vadd.f32 %v4573_v5, %v471_v3  ;;  %v673_v5 = vld [vmem:[#allocation12 + $0x70] sm:$0xff]  ;;  %v694_v27 = vld [vmem:[#allocation12 + $0x118] sm:$0xff] }
 0x12e   :  { %737 = vmatpush.msrb.mxu1 %v673_v5  ;;  %865 = vmatpush.msrb.mxu3 %v696_v23  ;;  %v920_v5 = vld [vmem:[#allocation15 + $0x58] sm:$0xff] }
 0x12f   :  { %v512_v15 = vpop.f32.mrf.mxu1  ;;  %779 = vmatpush.msrb.mxu0 %v703_v29  ;;  %826 = vmatpush.msra.mxu2 %v660_v40 }
 0x130   :  { %v513_v20 = vadd.f32 %v512_v15, %v472_v12  ;;  %738 = vmatpush.msrb.mxu1 %v671_v25  ;;  %866 = vmatpush.msrb.mxu3 %v694_v27  ;;  %v919_v25 = vld [vmem:[#allocation15 + $0x50] sm:$0xff] }
 0x131   :  { %780 = vmatpush.msrb.mxu0 %v701_v31  ;;  %v918_v31 = vld [vmem:[#allocation15 + $0x48] sm:$0xff] }
 0x132   :  { %v522_v28 = vmax.f32 %v513_v20, 0.0  ;;  %739 = vmatpush.msrb.mxu1 %v669_v30  ;;  %867 = vmatpush.msrb.mxu3 %v692_v41  ;;  %v921_v20 = vld [vmem:[#allocation15 + $0x60] sm:$0xff] }
 0x133   :  { %781 = vmatpush.msrb.mxu0 %v699_v33  ;;  %v917_v33 = vld [vmem:[#allocation15 + $0x40] sm:$0xff] }
 0x134   :  { %740 = vmatpush.msrb.mxu1 %v667_v32  ;;  %3462 = vmatpush.msra.mxu3 %v940_v10  ;;  %v934_v32 = vld [vmem:[#allocation15 + $0xc8] sm:$0xff] }
 0x135   :  { %589 = vmatmul.f32.gmra.mxu2 %v519_v36  ;;  %630 = vmatmul.f32.gmra.mxu3 %v519_v36  ;;  %v663_v36 = vld [vmem:[#allocation12 + $0x20] sm:$0xff] }
 0x136   :  { %741 = vmatpush.msrb.mxu1 %v665_v34  ;;  %782 = vmatpush.msrb.mxu0 %v697_v35  ;;  %v933_v34 = vld [vmem:[#allocation15 + $0xc0] sm:$0xff] }
 0x137   :  { %3463 = vmatpush.msra.mxu3 %v939_v14 }
 0x138   :  { %742 = vmatpush.msrb.mxu1 %v663_v36  ;;  %783 = vmatpush.msrb.mxu0 %v695_v37  ;;  %v916_v37 = vld [vmem:[#allocation15 + $0x38] sm:$0xff] }
 0x139   :  { %3464 = vmatpush.msra.mxu3 %v938_v17 }
 0x13a   :  { %743 = vmatpush.msrb.mxu1 %v661_v38  ;;  %784 = vmatpush.msrb.mxu0 %v693_v39  ;;  %v932_v38 = vld [vmem:[#allocation15 + $0xb8] sm:$0xff] }
 0x13b   :  { %3465 = vmatpush.msra.mxu3 %v937_v21 }
 0x13c   :  { %744 = vmatpush.msrb.mxu1 %v659_v42  ;;  %785 = vmatpush.msrb.mxu0 %v691_v43  ;;  %v915_v43 = vld [vmem:[#allocation15 + $0x30] sm:$0xff] }
 0x13d   :  { %592 = vmatmul.f32.gmra.mxu2 %v520_v56  ;;  %633 = vmatmul.f32.gmra.mxu3 %v520_v56 }
 0x13e   :  { %945 = vmatpush.msra.mxu1 %v924_v8  ;;  %986 = vmatpush.msra.mxu0 %v940_v10 }
 0x13f   :  { %3466 = vmatpush.msra.mxu3 %v936_v22 }
 0x140   :  { %946 = vmatpush.msra.mxu1 %v923_v9  ;;  %987 = vmatpush.msra.mxu0 %v939_v14 }
 0x141   :  { %3467 = vmatpush.msra.mxu3 %v935_v26 }
 0x142   :  { %947 = vmatpush.msra.mxu1 %v922_v13  ;;  %988 = vmatpush.msra.mxu0 %v938_v17 }
 0x143   :  { %3468 = vmatpush.msra.mxu3 %v934_v32 }
 0x144   :  { %948 = vmatpush.msra.mxu1 %v921_v20  ;;  %989 = vmatpush.msra.mxu0 %v937_v21 }
 0x145   :  { %595 = vmatmul.f32.gmra.mxu2 %v521_v11  ;;  %636 = vmatmul.f32.gmra.mxu3 %v521_v11 }
 0x146   :  { %949 = vmatpush.msra.mxu1 %v920_v5  ;;  %990 = vmatpush.msra.mxu0 %v936_v22 }
 0x147   :  { %3469 = vmatpush.msra.mxu3 %v933_v34 }
 0x148   :  { %950 = vmatpush.msra.mxu1 %v919_v25  ;;  %991 = vmatpush.msra.mxu0 %v935_v26 }
 0x149   :  { %3470 = vmatpush.msra.mxu3 %v932_v38 }
 0x14a   :  { %951 = vmatpush.msra.mxu1 %v918_v31  ;;  %992 = vmatpush.msra.mxu0 %v934_v32 }
 0x14c   :  { %952 = vmatpush.msra.mxu1 %v917_v33  ;;  %993 = vmatpush.msra.mxu0 %v933_v34 }
 0x14d   :  { %598 = vmatmul.f32.gmra.mxu2 %v522_v28  ;;  %639 = vmatmul.f32.gmra.mxu3 %v522_v28 }
 0x14e   :  { %953 = vmatpush.msra.mxu1 %v916_v37  ;;  %994 = vmatpush.msra.mxu0 %v932_v38 }
 0x150   :  { %954 = vmatpush.msra.mxu1 %v915_v43 }
 0x152   :  { %955 = vmatpush.msra.mxu1 %v914_v44 }
 0x198   :  { %v578_v47 = vpop.f32.mrf.mxu2  ;;  %v619_v48 = vpop.f32.mrf.mxu3 }
 0x199   :  { %v579_v49 = vadd.f32 %v578_v47, %v4583_v45  ;;  %v620_v50 = vadd.f32 %v619_v48, %v4585_v46 }
 0x19b   :  { %v643_v51 = vmax.f32 %v579_v49, 0.0  ;;  %v644_v52 = vmax.f32 %v620_v50, 0.0  ;;  %v913_v49 = vld [vmem:[#allocation15 + $0x20] sm:$0xff] }
 0x19c   :  { %956 = vmatpush.msra.mxu1 %v913_v49  ;;  %v1105_v49 = vld [vmem:[%s5960_s30] sm:$0xff]  ;;  %s4272_s30 = smov [#allocation34]  }
 0x19d   :  { %745 = vmatmul.f32.vlgmr.msrb.gmra.mxu1 %v643_v51  ;;  %786 = vmatmul.f32.vlgmr.msrb.gmra.mxu0 %v644_v52  ;;  %s3344_s2 = sshll.u32 %s4272_s30, 4  ;;  %s3345_s2 = int_to_ptr.vmem [resolvable:$true] %s3344_s2 }
 0x19e   :  { %827 = vmatmul.f32.vlgmr.msra.gmra.mxu2 %v643_v51  ;;  %868 = vmatmul.f32.vlgmr.msrb.gmra.mxu3 %v644_v52 }
 0x1a0   :  { %v581_v53 = vpop.f32.mrf.mxu2  ;;  %v622_v54 = vpop.f32.mrf.mxu3 }
 0x1a1   :  { %v582_v55 = vadd.f32 %v581_v53, %v4583_v45  ;;  %v623_v56 = vadd.f32 %v622_v54, %v4585_v46  ;;  %v912_v54 = vld [vmem:[#allocation15 + $0x18] sm:$0xff] }
 0x1a2   :  { %957 = vmatpush.msra.mxu1 %v912_v54 }
 0x1a3   :  { %v645_v57 = vmax.f32 %v582_v55, 0.0  ;;  %v646_v58 = vmax.f32 %v623_v56, 0.0  ;;  %v931_v55 = vld [vmem:[#allocation15 + $0xb0] sm:$0xff] }
 0x1a4   :  { %995 = vmatpush.msra.mxu0 %v931_v55  ;;  %v911_v56 = vld [vmem:[#allocation15 + $0x10] sm:$0xff]  ;;  %3471 = vmatpush.msra.mxu3 %v931_v55 }
 0x1a5   :  { %748 = vmatmul.f32.gmra.mxu1 %v645_v57  ;;  %789 = vmatmul.f32.gmra.mxu0 %v646_v58 }
 0x1a6   :  { %830 = vmatmul.f32.gmra.mxu2 %v645_v57  ;;  %871 = vmatmul.f32.gmra.mxu3 %v646_v58  ;;  %v930_v57 = vld [vmem:[#allocation15 + $0xa8] sm:$0xff]  ;;  %v929_v58 = vld [vmem:[#allocation15 + $0xa0] sm:$0xff] }
 0x1a7   :  { %958 = vmatpush.msra.mxu1 %v911_v56  ;;  %996 = vmatpush.msra.mxu0 %v930_v57 }
 0x1a8   :  { %v584_v59 = vpop.f32.mrf.mxu2  ;;  %v625_v60 = vpop.f32.mrf.mxu3  ;;  %3472 = vmatpush.msra.mxu3 %v930_v57 }
 0x1a9   :  { %v585_v61 = vadd.f32 %v584_v59, %v4583_v45  ;;  %v626_v62 = vadd.f32 %v625_v60, %v4585_v46  ;;  %997 = vmatpush.msra.mxu0 %v929_v58  ;;  %v928_v59 = vld [vmem:[#allocation15 + $0x98] sm:$0xff]  ;;  %v927_v60 = vld [vmem:[#allocation15 + $0x90] sm:$0xff] }
 0x1aa   :  { %3473 = vmatpush.msra.mxu3 %v929_v58 }
 0x1ab   :  { %v647_v63 = vmax.f32 %v585_v61, 0.0  ;;  %v648_v0 = vmax.f32 %v626_v62, 0.0  ;;  %998 = vmatpush.msra.mxu0 %v928_v59  ;;  %v926_v61 = vld [vmem:[#allocation15 + $0x88] sm:$0xff]  ;;  %v925_v62 = vld [vmem:[#allocation15 + $0x80] sm:$0xff] }
 0x1ac   :  { %3474 = vmatpush.msra.mxu3 %v928_v59  ;;  %v1049_v59 = vld [vmem:[%s5961_s17 + $0x70] sm:$0xff] }
 0x1ad   :  { %751 = vmatmul.f32.gmra.mxu1 %v647_v63  ;;  %792 = vmatmul.f32.gmra.mxu0 %v648_v0 }
 0x1ae   :  { %833 = vmatmul.f32.gmra.mxu2 %v647_v63  ;;  %874 = vmatmul.f32.gmra.mxu3 %v648_v0  ;;  %v723_v63 = vld [vmem:[#allocation13] sm:$0x3] }
 0x1af   :  { %999 = vmatpush.msra.mxu0 %v927_v60  ;;  %3475 = vmatpush.msra.mxu3 %v927_v60  ;;  %v4603_v0 = vperm.slane %v723_v63, 0 }
 0x1b0   :  { %v587_v1 = vpop.f32.mrf.mxu2  ;;  %v628_v2 = vpop.f32.mrf.mxu3 }
 0x1b1   :  { %v588_v3 = vadd.f32 %v587_v1, %v4583_v45  ;;  %v629_v4 = vadd.f32 %v628_v2, %v4585_v46  ;;  %1000 = vmatpush.msra.mxu0 %v926_v61  ;;  %3476 = vmatpush.msra.mxu3 %v926_v61 }
 0x1b3   :  { %v649_v6 = vmax.f32 %v588_v3, 0.0  ;;  %v650_v7 = vmax.f32 %v629_v4, 0.0  ;;  %1001 = vmatpush.msra.mxu0 %v925_v62  ;;  %3477 = vmatpush.msra.mxu3 %v925_v62 }
 0x1b5   :  { %754 = vmatmul.f32.gmra.mxu1 %v649_v6  ;;  %795 = vmatmul.f32.gmra.mxu0 %v650_v7 }
 0x1b6   :  { %836 = vmatmul.f32.gmra.mxu2 %v649_v6  ;;  %877 = vmatmul.f32.gmra.mxu3 %v650_v7  ;;  %v4606_v6 = vperm.slane %v723_v63, 1 }
 0x1b7   :  { %1129 = vmatpush.msrb.mxu3 %v1105_v49 }
 0x1b8   :  { %v590_v11 = vpop.f32.mrf.mxu2  ;;  %v631_v12 = vpop.f32.mrf.mxu3 }
 0x1b9   :  { %v591_v15 = vadd.f32 %v590_v11, %v4583_v45  ;;  %v632_v16 = vadd.f32 %v631_v12, %v4585_v46 }
 0x1bb   :  { %v651_v18 = vmax.f32 %v591_v15, 0.0  ;;  %v652_v19 = vmax.f32 %v632_v16, 0.0 }
 0x1bd   :  { %757 = vmatmul.f32.gmra.mxu1 %v651_v18  ;;  %798 = vmatmul.f32.gmra.mxu0 %v652_v19 }
 0x1be   :  { %839 = vmatmul.f32.gmra.mxu2 %v651_v18  ;;  %880 = vmatmul.f32.gmra.mxu3 %v652_v19 }
 0x1c0   :  { %v593_v23 = vpop.f32.mrf.mxu2  ;;  %v634_v24 = vpop.f32.mrf.mxu3 }
 0x1c1   :  { %v594_v27 = vadd.f32 %v593_v23, %v4583_v45  ;;  %v635_v28 = vadd.f32 %v634_v24, %v4585_v46 }
 0x1c3   :  { %v653_v29 = vmax.f32 %v594_v27, 0.0  ;;  %v654_v30 = vmax.f32 %v635_v28, 0.0 }
 0x1c5   :  { %760 = vmatmul.f32.gmra.mxu1 %v653_v29  ;;  %801 = vmatmul.f32.gmra.mxu0 %v654_v30 }
 0x1c6   :  { %842 = vmatmul.f32.gmra.mxu2 %v653_v29  ;;  %883 = vmatmul.f32.gmra.mxu3 %v654_v30 }
 0x1c8   :  { %v596_v35 = vpop.f32.mrf.mxu2  ;;  %v637_v36 = vpop.f32.mrf.mxu3 }
 0x1c9   :  { %v597_v39 = vadd.f32 %v596_v35, %v4583_v45  ;;  %v638_v40 = vadd.f32 %v637_v36, %v4585_v46 }
 0x1cb   :  { %v655_v41 = vmax.f32 %v597_v39, 0.0  ;;  %v656_v42 = vmax.f32 %v638_v40, 0.0 }
 0x1cd   :  { %763 = vmatmul.f32.gmra.mxu1 %v655_v41  ;;  %804 = vmatmul.f32.gmra.mxu0 %v656_v42 }
 0x1ce   :  { %845 = vmatmul.f32.gmra.mxu2 %v655_v41  ;;  %886 = vmatmul.f32.gmra.mxu3 %v656_v42 }
 0x1d0   :  { %v599_v47 = vpop.f32.mrf.mxu2  ;;  %v640_v48 = vpop.f32.mrf.mxu3 }
 0x1d1   :  { %v600_v50 = vadd.f32 %v599_v47, %v4583_v45  ;;  %v641_v51 = vadd.f32 %v640_v48, %v4585_v46  ;;  %v910_v45 = vld [vmem:[#allocation15 + $0x8] sm:$0xff]  ;;  %v909_v46 = vld [vmem:[#allocation15] sm:$0xff] }
 0x1d2   :  { %959 = vmatpush.msra.mxu1 %v910_v45 }
 0x1d3   :  { %v657_v52 = vmax.f32 %v600_v50, 0.0  ;;  %v658_v53 = vmax.f32 %v641_v51, 0.0 }
 0x1d4   :  { %960 = vmatpush.msra.mxu1 %v909_v46  ;;  %v1050_v46 = vld [vmem:[%s5961_s17 + $0x78] sm:$0xff] }
 0x1d5   :  { %766 = vmatmul.f32.gmra.mxu1 %v657_v52  ;;  %807 = vmatmul.f32.gmra.mxu0 %v658_v53 }
 0x1d6   :  { %848 = vmatmul.f32.gmra.mxu2 %v657_v52  ;;  %889 = vmatmul.f32.gmra.mxu3 %v658_v53 }
 0x1d7   :  { %1055 = vmatpush.msrb.mxu2 %v1050_v46 }
 0x1d9   :  { %1056 = vmatpush.msrb.mxu2 %v1049_v59 }
 0x21a   :  { %v746_v1 = vpop.f32.mrf.mxu1  ;;  %v787_v2 = vpop.f32.mrf.mxu0 }
 0x21b   :  { %v747_v3 = vadd.f32 %v746_v1, %v4603_v0 }
 0x21d   :  { %v788_v4 = vadd.f32 %v787_v2, %v747_v3  ;;  %v1048_v2 = vld [vmem:[%s5961_s17 + $0x68] sm:$0xff] }
 0x21e   :  { %1057 = vmatpush.msrb.mxu2 %v1048_v2 }
 0x21f   :  { %v893_v7 = vmax.f32 %v788_v4, 0.0 }
 0x221   :  { %v828_v8 = vpop.f32.mrf.mxu2  ;;  %v869_v9 = vpop.f32.mrf.mxu3  ;;  %961 = vmatmul.f32.vlgmr.msra.gmra.mxu1 %v893_v7  ;;  %v1047_v7 = vld [vmem:[%s5961_s17 + $0x60] sm:$0xff] }
 0x222   :  { %v829_v10 = vadd.f32 %v828_v8, %v4606_v6  ;;  %v749_v11 = vpop.f32.mrf.mxu1  ;;  %v790_v12 = vpop.f32.mrf.mxu0  ;;  %1058 = vmatpush.msrb.mxu2 %v1047_v7 }
 0x223   :  { %v750_v13 = vadd.f32 %v749_v11, %v4603_v0 }
 0x224   :  { %v870_v14 = vadd.f32 %v869_v9, %v829_v10  ;;  %v1046_v10 = vld [vmem:[%s5961_s17 + $0x58] sm:$0xff] }
 0x225   :  { %v791_v15 = vadd.f32 %v790_v12, %v750_v13  ;;  %v1045_v12 = vld [vmem:[%s5961_s17 + $0x50] sm:$0xff]  ;;  %1059 = vmatpush.msrb.mxu2 %v1046_v10 }
 0x226   :  { %v894_v16 = vmax.f32 %v870_v14, 0.0  ;;  %v1354_v10 = vld [vmem:[#allocation25 + $0xe0] sm:$0xff] }
 0x227   :  { %v895_v17 = vmax.f32 %v791_v15, 0.0  ;;  %1060 = vmatpush.msrb.mxu2 %v1045_v12  ;;  %v1350_v12 = vld [vmem:[#allocation25 + $0xc0] sm:$0xff]  ;;  %1390 = vmatpush.msrb.mxu0 %v1354_v10  ;;  %v1225_v10 = vld [vmem:[#allocation27 + $0xc8] sm:$0xff] }
 0x228   :  { %1002 = vmatmul.f32.vlgmr.msra.gmra.mxu0 %v894_v16 }
 0x229   :  { %v831_v18 = vpop.f32.mrf.mxu2  ;;  %v872_v19 = vpop.f32.mrf.mxu3  ;;  %964 = vmatmul.f32.gmra.mxu1 %v895_v17  ;;  %v1044_v17 = vld [vmem:[%s5961_s17 + $0x48] sm:$0xff]  ;;  %1391 = vmatpush.msrb.mxu0 %v1350_v12  ;;  %v1217_v12 = vld [vmem:[#allocation27 + $0x88] sm:$0xff] }
 0x22a   :  { %v832_v20 = vadd.f32 %v831_v18, %v4606_v6  ;;  %v752_v21 = vpop.f32.mrf.mxu1  ;;  %v793_v5 = vpop.f32.mrf.mxu0  ;;  %1061 = vmatpush.msrb.mxu2 %v1044_v17 }
 0x22b   :  { %v753_v22 = vadd.f32 %v752_v21, %v4603_v0  ;;  %v1043_v21 = vld [vmem:[%s5961_s17 + $0x40] sm:$0xff] }
 0x22c   :  { %v873_v23 = vadd.f32 %v872_v19, %v832_v20  ;;  %1062 = vmatpush.msrb.mxu2 %v1043_v21 }
 0x22d   :  { %v794_v24 = vadd.f32 %v793_v5, %v753_v22 }
 0x22e   :  { %v896_v25 = vmax.f32 %v873_v23, 0.0  ;;  %v1042_v23 = vld [vmem:[%s5961_s17 + $0x38] sm:$0xff] }
 0x22f   :  { %v897_v26 = vmax.f32 %v794_v24, 0.0  ;;  %1063 = vmatpush.msrb.mxu2 %v1042_v23 }
 0x230   :  { %1005 = vmatmul.f32.gmra.mxu0 %v896_v25 }
 0x231   :  { %v834_v27 = vpop.f32.mrf.mxu2  ;;  %v875_v28 = vpop.f32.mrf.mxu3  ;;  %967 = vmatmul.f32.gmra.mxu1 %v897_v26 }
 0x232   :  { %v835_v29 = vadd.f32 %v834_v27, %v4606_v6  ;;  %v755_v30 = vpop.f32.mrf.mxu1  ;;  %v796_v31 = vpop.f32.mrf.mxu0 }
 0x233   :  { %v756_v32 = vadd.f32 %v755_v30, %v4603_v0  ;;  %v1104_v30 = vld [vmem:[%s5962_s0] sm:$0xff] }
 0x234   :  { %v876_v33 = vadd.f32 %v875_v28, %v835_v29 }
 0x235   :  { %v797_v34 = vadd.f32 %v796_v31, %v756_v32  ;;  %v1040_v31 = vld [vmem:[%s5961_s17 + $0x28] sm:$0xff]  ;;  %v1038_v32 = vld [vmem:[%s5961_s17 + $0x18] sm:$0xff] }
 0x236   :  { %v898_v35 = vmax.f32 %v876_v33, 0.0  ;;  %v1037_v33 = vld [vmem:[%s5961_s17 + $0x10] sm:$0xff] }
 0x237   :  { %v899_v36 = vmax.f32 %v797_v34, 0.0  ;;  %v1036_v34 = vld [vmem:[%s5961_s17 + $0x8] sm:$0xff] }
 0x238   :  { %1008 = vmatmul.f32.gmra.mxu0 %v898_v35  ;;  %v1035_v35 = vld [vmem:[%s5961_s17] sm:$0xff] }
 0x239   :  { %v837_v37 = vpop.f32.mrf.mxu2  ;;  %v878_v38 = vpop.f32.mrf.mxu3  ;;  %970 = vmatmul.f32.gmra.mxu1 %v899_v36 }
 0x23a   :  { %v838_v39 = vadd.f32 %v837_v37, %v4606_v6  ;;  %v758_v40 = vpop.f32.mrf.mxu1  ;;  %v799_v41 = vpop.f32.mrf.mxu0  ;;  %v4677_v37 = vld [vmem:[#allocation16] ss:$0 sm:$0xff] }
 0x23b   :  { %v759_v42 = vadd.f32 %v758_v40, %v4603_v0 }
 0x23c   :  { %v879_v43 = vadd.f32 %v878_v38, %v838_v39 }
 0x23d   :  { %v800_v44 = vadd.f32 %v799_v41, %v759_v42 }
 0x23e   :  { %v900_v47 = vmax.f32 %v879_v43, 0.0 }
 0x23f   :  { %v901_v48 = vmax.f32 %v800_v44, 0.0 }
 0x240   :  { %1011 = vmatmul.f32.gmra.mxu0 %v900_v47 }
 0x241   :  { %v840_v50 = vpop.f32.mrf.mxu2  ;;  %v881_v51 = vpop.f32.mrf.mxu3  ;;  %973 = vmatmul.f32.gmra.mxu1 %v901_v48 }
 0x242   :  { %v841_v52 = vadd.f32 %v840_v50, %v4606_v6  ;;  %v761_v53 = vpop.f32.mrf.mxu1  ;;  %v802_v54 = vpop.f32.mrf.mxu0 }
 0x243   :  { %v762_v55 = vadd.f32 %v761_v53, %v4603_v0 }
 0x244   :  { %v882_v56 = vadd.f32 %v881_v51, %v841_v52 }
 0x245   :  { %v803_v57 = vadd.f32 %v802_v54, %v762_v55 }
 0x246   :  { %v902_v45 = vmax.f32 %v882_v56, 0.0 }
 0x247   :  { %v903_v58 = vmax.f32 %v803_v57, 0.0 }
 0x248   :  { %1014 = vmatmul.f32.gmra.mxu0 %v902_v45 }
 0x249   :  { %v843_v60 = vpop.f32.mrf.mxu2  ;;  %v884_v61 = vpop.f32.mrf.mxu3  ;;  %976 = vmatmul.f32.gmra.mxu1 %v903_v58 }
 0x24a   :  { %v844_v62 = vadd.f32 %v843_v60, %v4606_v6  ;;  %v764_v63 = vpop.f32.mrf.mxu1  ;;  %v805_v1 = vpop.f32.mrf.mxu0 }
 0x24b   :  { %v765_v3 = vadd.f32 %v764_v63, %v4603_v0  ;;  %v1138_v63 = vld [vmem:[%s5823_s14 + $0x18] sm:$0xff] }
 0x24c   :  { %v885_v4 = vadd.f32 %v884_v61, %v844_v62 }
 0x24d   :  { %v806_v8 = vadd.f32 %v805_v1, %v765_v3  ;;  %v1137_v1 = vld [vmem:[%s5823_s14 + $0x10] sm:$0xff]  ;;  %v1136_v3 = vld [vmem:[%s5823_s14 + $0x8] sm:$0xff] }
 0x24e   :  { %v904_v9 = vmax.f32 %v885_v4, 0.0 }
 0x24f   :  { %v905_v11 = vmax.f32 %v806_v8, 0.0  ;;  %v1135_v8 = vld [vmem:[%s5823_s14] sm:$0xff] }
 0x250   :  { %1017 = vmatmul.f32.gmra.mxu0 %v904_v9 }
 0x251   :  { %v846_v13 = vpop.f32.mrf.mxu2  ;;  %v887_v14 = vpop.f32.mrf.mxu3  ;;  %979 = vmatmul.f32.gmra.mxu1 %v905_v11  ;;  %v1355_v11 = vld [vmem:[#allocation25 + $0xe8] sm:$0xff] }
 0x252   :  { %v847_v15 = vadd.f32 %v846_v13, %v4606_v6  ;;  %v767_v16 = vpop.f32.mrf.mxu1  ;;  %v808_v20 = vpop.f32.mrf.mxu0 }
 0x253   :  { %v768_v18 = vadd.f32 %v767_v16, %v4603_v0  ;;  %v1041_v0 = vld [vmem:[%s5961_s17 + $0x30] sm:$0xff]  ;;  %v1347_v16 = vld [vmem:[#allocation25 + $0xa8] sm:$0xff] }
 0x254   :  { %v888_v19 = vadd.f32 %v887_v14, %v847_v15  ;;  %1064 = vmatpush.msrb.mxu2 %v1041_v0  ;;  %v1351_v14 = vld [vmem:[#allocation25 + $0xc8] sm:$0xff]  ;;  %v1346_v15 = vld [vmem:[#allocation25 + $0xa0] sm:$0xff] }
 0x255   :  { %v809_v5 = vadd.f32 %v808_v20, %v768_v18  ;;  %v1342_v18 = vld [vmem:[#allocation25 + $0x80] sm:$0xff]  ;;  %1392 = vmatpush.msrb.mxu0 %v1346_v15  ;;  %v4752_v15 = vld [vmem:[#allocation28 + $0x1c8] sm:$0xff] }
 0x256   :  { %v906_v22 = vmax.f32 %v888_v19, 0.0  ;;  %1065 = vmatpush.msrb.mxu2 %v1040_v31  ;;  %v1343_v19 = vld [vmem:[#allocation25 + $0x88] sm:$0xff] }
 0x257   :  { %v907_v24 = vmax.f32 %v809_v5, 0.0  ;;  %v1338_v5 = vld [vmem:[#allocation25 + $0x60] sm:$0xff]  ;;  %1393 = vmatpush.msrb.mxu0 %v1342_v18 }
 0x258   :  { %1020 = vmatmul.f32.gmra.mxu0 %v906_v22  ;;  %v1339_v22 = vld [vmem:[#allocation25 + $0x68] sm:$0xff]  ;;  %v1224_v18 = vld [vmem:[#allocation27 + $0xc0] sm:$0xff] }
 0x259   :  { %v849_v25 = vpop.f32.mrf.mxu2  ;;  %982 = vmatmul.f32.gmra.mxu1 %v907_v24  ;;  %v890_v27 = vpop.f32.mrf.mxu3  ;;  %1394 = vmatpush.msrb.mxu0 %v1338_v5  ;;  %v1209_v5 = vld [vmem:[#allocation27 + $0x48] sm:$0xff] }
 0x25a   :  { %v850_v26 = vadd.f32 %v849_v25, %v4606_v6  ;;  %v1039_v6 = vld [vmem:[%s5961_s17 + $0x20] sm:$0xff] }
 0x25b   :  { %1066 = vmatpush.msrb.mxu2 %v1039_v6  ;;  %v1334_v6 = vld [vmem:[#allocation25 + $0x40] sm:$0xff] }
 0x25c   :  { %v891_v28 = vadd.f32 %v890_v27, %v850_v26  ;;  %1395 = vmatpush.msrb.mxu0 %v1334_v6  ;;  %v4781_v6 = vld [vmem:[#allocation28 + $0xe8] sm:$0xff] }
 0x25d   :  { %1067 = vmatpush.msrb.mxu2 %v1038_v32  ;;  %v1335_v32 = vld [vmem:[#allocation25 + $0x48] sm:$0xff] }
 0x25e   :  { %v908_v29 = vmax.f32 %v891_v28, 0.0  ;;  %v3507_v28 = vld [vmem:[#allocation19] ss:$0 sm:$0xff] }
 0x25f   :  { %1068 = vmatpush.msrb.mxu2 %v1037_v33  ;;  %v1330_v33 = vld [vmem:[#allocation25 + $0x20] sm:$0xff] }
 0x260   :  { %1023 = vmatmul.f32.vlgmr.msra.gmra.mxu3 %v908_v29  ;;  %1396 = vmatpush.msrb.mxu0 %v1330_v33  ;;  %v1201_v33 = vld [vmem:[#allocation27 + $0x8] sm:$0xff] }
 0x261   :  { %1069 = vmatpush.msrb.mxu2 %v1036_v34  ;;  %1159 = vmatpush.msra.mxu3 %v1138_v63  ;;  %v1331_v34 = vld [vmem:[#allocation25 + $0x28] sm:$0xff] }
 0x263   :  { %1070 = vmatpush.msrb.mxu2 %v1035_v35  ;;  %1160 = vmatpush.msra.mxu3 %v1137_v1  ;;  %v1326_v35 = vld [vmem:[#allocation25] sm:$0xff] }
 0x264   :  { %1397 = vmatpush.msrb.mxu0 %v1326_v35  ;;  %v4787_v35 = vld [vmem:[#allocation28 + $0xc8] sm:$0xff] }
 0x265   :  { %1161 = vmatpush.msra.mxu3 %v1136_v3  ;;  %1431 = vmatpush.msra.mxu2 %v1355_v11  ;;  %v3509_v3 = vld [vmem:[#allocation21] ss:$0 sm:$0xff]  ;;  %v1221_v11 = vld [vmem:[#allocation27 + $0xa8] sm:$0xff] }
 0x267   :  { %1162 = vmatpush.msra.mxu3 %v1135_v8  ;;  %1432 = vmatpush.msra.mxu2 %v1351_v14  ;;  %v1213_v14 = vld [vmem:[#allocation27 + $0x68] sm:$0xff] }
 0x268   :  { %3383 = vmatmul.msk.f32.vlgmr.msrb.gmra.mxu3 %vm1110_vm1, %v1104_v30 }
 0x269   :  { %1433 = vmatpush.msra.mxu2 %v1347_v16  ;;  %v1228_v16 = vld [vmem:[#allocation27 + $0xe0] sm:$0xff] }
 0x26b   :  { %1434 = vmatpush.msra.mxu2 %v1343_v19  ;;  %v4758_v19 = vld [vmem:[#allocation28 + $0x188] sm:$0xff] }
 0x26d   :  { %1435 = vmatpush.msra.mxu2 %v1339_v22  ;;  %v1216_v22 = vld [vmem:[#allocation27 + $0x80] sm:$0xff] }
 0x26f   :  { %1436 = vmatpush.msra.mxu2 %v1335_v32  ;;  %v1200_v32 = vld [vmem:[#allocation27] sm:$0xff] }
 0x271   :  { %1437 = vmatpush.msra.mxu2 %v1331_v34  ;;  %v4785_v34 = vld [vmem:[#allocation28 + $0x180] sm:$0xff] }
 0x29e   :  { %v962_v36 = vpop.f32.mrf.mxu1 }
 0x29f   :  { %v963_v38 = vadd.f32 %v4677_v37, %v962_v36  ;;  %v1327_v36 = vld [vmem:[#allocation25 + $0x8] sm:$0xff] }
 0x2a0   :  { %1438 = vmatpush.msra.mxu2 %v1327_v36  ;;  %v1230_v36 = vld [vmem:[#allocation27 + $0xf0] sm:$0xff] }
 0x2a5   :  { %v1003_v39 = vpop.f32.mrf.mxu0 }
 0x2a6   :  { %v1004_v40 = vadd.f32 %v1003_v39, %v963_v38  ;;  %v965_v41 = vpop.f32.mrf.mxu1 }
 0x2a7   :  { %v966_v43 = vadd.f32 %v4677_v37, %v965_v41 }
 0x2a8   :  { %v1027_v42 = vmax.f32 %v1004_v40, 0.0 }
 0x2aa   :  { %1071 = vmatmul.f32.vlgmr.msrb.gmra.mxu2 %v1027_v42 }
 0x2ad   :  { %v1006_v44 = vpop.f32.mrf.mxu0 }
 0x2ae   :  { %v1007_v47 = vadd.f32 %v1006_v44, %v966_v43  ;;  %v968_v48 = vpop.f32.mrf.mxu1 }
 0x2af   :  { %v969_v50 = vadd.f32 %v4677_v37, %v968_v48 }
 0x2b0   :  { %v1028_v49 = vmax.f32 %v1007_v47, 0.0 }
 0x2b2   :  { %1074 = vmatmul.f32.gmra.mxu2 %v1028_v49 }
 0x2b5   :  { %v1009_v51 = vpop.f32.mrf.mxu0 }
 0x2b6   :  { %v1010_v52 = vadd.f32 %v1009_v51, %v969_v50  ;;  %v971_v53 = vpop.f32.mrf.mxu1 }
 0x2b7   :  { %v972_v55 = vadd.f32 %v4677_v37, %v971_v53 }
 0x2b8   :  { %v1029_v54 = vmax.f32 %v1010_v52, 0.0 }
 0x2ba   :  { %1077 = vmatmul.f32.gmra.mxu2 %v1029_v54  ;;  %v1171_v54 = vld [vmem:[#allocation22 + $0x18] sm:$0xff] }
 0x2bb   :  { %1191 = vmatpush.msrb.mxu3 %v1171_v54  ;;  %v1218_v54 = vld [vmem:[#allocation27 + $0x90] sm:$0xff] }
 0x2bd   :  { %v1012_v56 = vpop.f32.mrf.mxu0 }
 0x2be   :  { %v1013_v57 = vadd.f32 %v1012_v56, %v972_v55  ;;  %v974_v45 = vpop.f32.mrf.mxu1  ;;  %v1170_v56 = vld [vmem:[#allocation22 + $0x10] sm:$0xff] }
 0x2bf   :  { %v975_v46 = vadd.f32 %v4677_v37, %v974_v45  ;;  %1192 = vmatpush.msrb.mxu3 %v1170_v56  ;;  %v1219_v56 = vld [vmem:[#allocation27 + $0x98] sm:$0xff] }
 0x2c0   :  { %v1030_v58 = vmax.f32 %v1013_v57, 0.0  ;;  %v1169_v57 = vld [vmem:[#allocation22 + $0x8] sm:$0xff] }
 0x2c1   :  { %1193 = vmatpush.msrb.mxu3 %v1169_v57  ;;  %v4807_v57 = vld [vmem:[#allocation28 + $0x100] sm:$0xff] }
 0x2c2   :  { %1080 = vmatmul.f32.gmra.mxu2 %v1030_v58 }
 0x2c5   :  { %v1015_v59 = vpop.f32.mrf.mxu0 }
 0x2c6   :  { %v1016_v60 = vadd.f32 %v1015_v59, %v975_v46  ;;  %v977_v61 = vpop.f32.mrf.mxu1  ;;  %v1168_v46 = vld [vmem:[#allocation22] sm:$0xff] }
 0x2c7   :  { %v978_v2 = vadd.f32 %v4677_v37, %v977_v61  ;;  %1194 = vmatpush.msrb.mxu3 %v1168_v46  ;;  %v1215_v46 = vld [vmem:[#allocation27 + $0x78] sm:$0xff] }
 0x2c8   :  { %v1031_v62 = vmax.f32 %v1016_v60, 0.0 }
 0x2ca   :  { %1083 = vmatmul.f32.gmra.mxu2 %v1031_v62 }
 0x2cd   :  { %v1018_v4 = vpop.f32.mrf.mxu0 }
 0x2ce   :  { %v1019_v7 = vadd.f32 %v1018_v4, %v978_v2  ;;  %v980_v13 = vpop.f32.mrf.mxu1 }
 0x2cf   :  { %v981_v17 = vadd.f32 %v4677_v37, %v980_v13  ;;  %v4749_v13 = vld [vmem:[#allocation28 + $0x1e8] sm:$0xff] }
 0x2d0   :  { %v1032_v9 = vmax.f32 %v1019_v7, 0.0  ;;  %1673 = vmatpush.msrb.mxu2 %v4749_v13 }
 0x2d2   :  { %1086 = vmatmul.f32.gmra.mxu2 %v1032_v9  ;;  %v1229_v9 = vld [vmem:[#allocation27 + $0xe8] sm:$0xff] }
 0x2d3   :  { %1274 = vmatpush.msrb.mxu1 %v1229_v9  ;;  %1674 = vmatpush.msrb.mxu2 %v4752_v15  ;;  %v4827_v9 = vld [vmem:[#allocation28 + $0xa0] sm:$0xff] }
 0x2d5   :  { %v1021_v20 = vpop.f32.mrf.mxu0  ;;  %1275 = vmatpush.msrb.mxu1 %v1225_v10  ;;  %v4271_v10 = vmov 0.0  }
 0x2d6   :  { %v1022_v21 = vadd.f32 %v1021_v20, %v981_v17  ;;  %v983_v24 = vpop.f32.mrf.mxu1  ;;  %v4754_v17 = vld [vmem:[#allocation28 + $0x1a8] sm:$0xff]  ;;  %v1220_v20 = vld [vmem:[#allocation27 + $0xa0] sm:$0xff] }
 0x2d7   :  { %v984_v0 = vadd.f32 %v4677_v37, %v983_v24  ;;  %v3508_v37 = vld [vmem:[#allocation18] ss:$0 sm:$0xff]  ;;  %1276 = vmatpush.msrb.mxu1 %v1221_v11  ;;  %1675 = vmatpush.msrb.mxu2 %v4754_v17  ;;  %v1212_v24 = vld [vmem:[#allocation27 + $0x60] sm:$0xff]  ;;  %v1202_v11 = vld [vmem:[#allocation27 + $0x10] sm:$0xff] }
 0x2d8   :  { %v1033_v23 = vmax.f32 %v1022_v21, 0.0  ;;  %v4761_v21 = vld [vmem:[#allocation28 + $0x168] sm:$0xff] }
 0x2d9   :  { %1277 = vmatpush.msrb.mxu1 %v1217_v12  ;;  %1676 = vmatpush.msrb.mxu2 %v4758_v19  ;;  %v1203_v12 = vld [vmem:[#allocation27 + $0x18] sm:$0xff] }
 0x2da   :  { %1089 = vmatmul.f32.gmra.mxu2 %v1033_v23  ;;  %v4763_v23 = vld [vmem:[#allocation28 + $0x148] sm:$0xff] }
 0x2db   :  { %1278 = vmatpush.msrb.mxu1 %v1213_v14  ;;  %1677 = vmatpush.msrb.mxu2 %v4761_v21  ;;  %v4831_v14 = vld [vmem:[#allocation28 + $0x80] sm:$0xff] }
 0x2dd   :  { %1279 = vmatpush.msrb.mxu1 %v1209_v5  ;;  %1678 = vmatpush.msrb.mxu2 %v4763_v23  ;;  %v4847_v5 = vld [vmem:[#allocation28] sm:$0xff] }
 0x2de   :  { %5970 = vst [vmem:[#allocation53_spill] sm:$0xff] %v4847_v5 }
 0x2e3   :  { %v1024_v25 = vpop.f32.mrf.mxu3 }
 0x2e4   :  { %v1025_v26 = vadd.f32 %v1024_v25, %v984_v0  ;;  %v4766_v0 = vld [vmem:[#allocation28 + $0x1e0] sm:$0xff]  ;;  %v4769_v25 = vld [vmem:[#allocation28 + $0x128] sm:$0xff] }
 0x2e5   :  { %1653 = vmatpush.msra.mxu0 %v4766_v0  ;;  %1679 = vmatpush.msrb.mxu2 %v4769_v25 }
 0x2e6   :  { %v1034_v27 = vmax.f32 %v1025_v26, 0.0  ;;  %v1208_v26 = vld [vmem:[#allocation27 + $0x40] sm:$0xff] }
 0x2e8   :  { %1092 = vmatmul.f32.gmra.mxu2 %v1034_v27  ;;  %v4773_v27 = vld [vmem:[#allocation28 + $0x1c0] sm:$0xff] }
 0x2e9   :  { %1654 = vmatpush.msra.mxu0 %v4773_v27 }
 0x2eb   :  { %v1131_v29 = vpop.f32.mrf.mxu3 }
 0x2ec   :  { %v1132_v30 = vadd.f32 %v3507_v28, %v1131_v29  ;;  %v4775_v28 = vld [vmem:[#allocation28 + $0x108] sm:$0xff]  ;;  %v1204_v29 = vld [vmem:[#allocation27 + $0x20] sm:$0xff] }
 0x2ed   :  { %1680 = vmatpush.msrb.mxu2 %v4775_v28 }
 0x2ee   :  { %v1134_v31 = vmax.f32 %v1132_v30, 0.0  ;;  %v1205_v30 = vld [vmem:[#allocation27 + $0x28] sm:$0xff] }
 0x2ef   :  { %1280 = vmatpush.msrb.mxu1 %v1205_v30  ;;  %1681 = vmatpush.msrb.mxu2 %v4781_v6  ;;  %v1356_v30 = vld [vmem:[#allocation25 + $0xf0] sm:$0xff] }
 0x2f0   :  { %3384 = vmatmul.msk.f32.vlgmr.msra.gmra.mxu3 %vm1143_vm2, %v1134_v31  ;;  %v4779_v31 = vld [vmem:[#allocation28 + $0x1a0] sm:$0xff] }
 0x2f1   :  { %1254 = vmatpush.msra.mxu3 %v1228_v16  ;;  %1655 = vmatpush.msra.mxu0 %v4779_v31  ;;  %v4835_v16 = vld [vmem:[#allocation28 + $0x60] sm:$0xff] }
 0x2f2   :  { %1281 = vmatpush.msrb.mxu1 %v1201_v33  ;;  %1682 = vmatpush.msrb.mxu2 %v4787_v35  ;;  %5967 = vst [vmem:[#allocation50_spill] sm:$0xff] %v4835_v16  ;;  %v1352_v33 = vld [vmem:[#allocation25 + $0xd0] sm:$0xff] }
 0x2f3   :  { %1255 = vmatpush.msra.mxu3 %v1224_v18  ;;  %1656 = vmatpush.msra.mxu0 %v4785_v34  ;;  %v4839_v18 = vld [vmem:[#allocation28 + $0x40] sm:$0xff] }
 0x2f4   :  { %5968 = vst [vmem:[#allocation51_spill] sm:$0xff] %v4839_v18 }
 0x2f5   :  { %1256 = vmatpush.msra.mxu3 %v1220_v20  ;;  %v4843_v20 = vld [vmem:[#allocation28 + $0x20] sm:$0xff] }
 0x2f6   :  { %5969 = vst [vmem:[#allocation52_spill] sm:$0xff] %v4843_v20 }
 0x2f7   :  { %1257 = vmatpush.msra.mxu3 %v1216_v22  ;;  %v3510_v22 = vld [vmem:[#allocation24] ss:$0 sm:$0xff] }
 0x2f9   :  { %1258 = vmatpush.msra.mxu3 %v1212_v24 }
 0x2fb   :  { %1259 = vmatpush.msra.mxu3 %v1208_v26 }
 0x2fd   :  { %1260 = vmatpush.msra.mxu3 %v1204_v29 }
 0x2ff   :  { %1261 = vmatpush.msra.mxu3 %v1200_v32  ;;  %v1357_v32 = vld [vmem:[#allocation25 + $0xf8] sm:$0xff] }
 0x32d   :  { %v1072_v38 = vpop.f32.mrf.mxu2 }
 0x32e   :  { %v1073_v39 = vadd.f32 %v3508_v37, %v1072_v38  ;;  %v4791_v38 = vld [vmem:[#allocation28 + $0x160] sm:$0xff] }
 0x32f   :  { %1657 = vmatpush.msra.mxu0 %v4791_v38 }
 0x330   :  { %v4700_v40 = vmax.f32 %v1073_v39, 0.0  ;;  %v4793_v39 = vld [vmem:[#allocation28 + $0xa8] sm:$0xff] }
 0x331   :  { %1683 = vmatpush.msrb.mxu2 %v4793_v39 }
 0x332   :  { %3390 = vmatmul.msk.f32.vlgmr.msrb.gmra.mxu0 %vm1242_vm3, %v4700_v40  ;;  %3398 = vmatmul.msk.f32.vlgmr.msra.gmra.mxu2 %vm1242_vm3, %v4700_v40 }
 0x335   :  { %v1075_v41 = vpop.f32.mrf.mxu2 }
 0x336   :  { %v1076_v42 = vadd.f32 %v3508_v37, %v1075_v41  ;;  %v1226_v41 = vld [vmem:[#allocation27 + $0xd0] sm:$0xff] }
 0x338   :  { %v4706_v43 = vmax.f32 %v1076_v42, 0.0  ;;  %v1227_v42 = vld [vmem:[#allocation27 + $0xd8] sm:$0xff] }
 0x33a   :  { %3391 = vmatmul.msk.f32.gmra.mxu0 %vm1242_vm3, %v4706_v43  ;;  %3399 = vmatmul.msk.f32.gmra.mxu2 %vm1242_vm3, %v4706_v43 }
 0x33d   :  { %v1078_v44 = vpop.f32.mrf.mxu2 }
 0x33e   :  { %v1079_v47 = vadd.f32 %v3508_v37, %v1078_v44  ;;  %v4797_v44 = vld [vmem:[#allocation28 + $0x140] sm:$0xff] }
 0x33f   :  { %1658 = vmatpush.msra.mxu0 %v4797_v44 }
 0x340   :  { %v4712_v48 = vmax.f32 %v1079_v47, 0.0  ;;  %v4799_v47 = vld [vmem:[#allocation28 + $0x88] sm:$0xff] }
 0x341   :  { %1684 = vmatpush.msrb.mxu2 %v4799_v47 }
 0x342   :  { %3392 = vmatmul.msk.f32.gmra.mxu0 %vm1242_vm3, %v4712_v48  ;;  %3400 = vmatmul.msk.f32.gmra.mxu2 %vm1242_vm3, %v4712_v48 }
 0x345   :  { %v1081_v49 = vpop.f32.mrf.mxu2 }
 0x346   :  { %v1082_v50 = vadd.f32 %v3508_v37, %v1081_v49  ;;  %v1222_v49 = vld [vmem:[#allocation27 + $0xb0] sm:$0xff] }
 0x348   :  { %v4718_v51 = vmax.f32 %v1082_v50, 0.0  ;;  %v1223_v50 = vld [vmem:[#allocation27 + $0xb8] sm:$0xff] }
 0x34a   :  { %3393 = vmatmul.msk.f32.gmra.mxu0 %vm1242_vm3, %v4718_v51  ;;  %3401 = vmatmul.msk.f32.gmra.mxu2 %vm1242_vm3, %v4718_v51 }
 0x34d   :  { %v1084_v52 = vpop.f32.mrf.mxu2 }
 0x34e   :  { %v1085_v53 = vadd.f32 %v3508_v37, %v1084_v52  ;;  %v4803_v52 = vld [vmem:[#allocation28 + $0x120] sm:$0xff] }
 0x34f   :  { %1659 = vmatpush.msra.mxu0 %v4803_v52 }
 0x350   :  { %v4724_v55 = vmax.f32 %v1085_v53, 0.0  ;;  %v4805_v53 = vld [vmem:[#allocation28 + $0x68] sm:$0xff] }
 0x351   :  { %5963 = vst [vmem:[#allocation46_spill] sm:$0xff] %v4805_v53  ;;  %1685 = vmatpush.msrb.mxu2 %v4805_v53  ;;  %1660 = vmatpush.msra.mxu0 %v4807_v57 }
 0x352   :  { %3394 = vmatmul.msk.f32.gmra.mxu0 %vm1242_vm3, %v4724_v55  ;;  %3402 = vmatmul.msk.f32.gmra.mxu2 %vm1242_vm3, %v4724_v55 }
 0x355   :  { %v1087_v45 = vpop.f32.mrf.mxu2 }
 0x356   :  { %v1088_v58 = vadd.f32 %v3508_v37, %v1087_v45  ;;  %v4809_v45 = vld [vmem:[#allocation28 + $0x48] sm:$0xff] }
 0x357   :  { %5964 = vst [vmem:[#allocation47_spill] sm:$0xff] %v4809_v45  ;;  %1686 = vmatpush.msrb.mxu2 %v4809_v45 }
 0x358   :  { %v4730_v59 = vmax.f32 %v1088_v58, 0.0  ;;  %v1214_v58 = vld [vmem:[#allocation27 + $0x70] sm:$0xff] }
 0x35a   :  { %3395 = vmatmul.msk.f32.gmra.mxu0 %vm1242_vm3, %v4730_v59  ;;  %3403 = vmatmul.msk.f32.gmra.mxu2 %vm1242_vm3, %v4730_v59 }
 0x35d   :  { %v1090_v60 = vpop.f32.mrf.mxu2 }
 0x35e   :  { %v1091_v61 = vadd.f32 %v3508_v37, %v1090_v60  ;;  %v4815_v60 = vld [vmem:[#allocation28 + $0xe0] sm:$0xff] }
 0x35f   :  { %1661 = vmatpush.msra.mxu0 %v4815_v60 }
 0x360   :  { %v4736_v62 = vmax.f32 %v1091_v61, 0.0  ;;  %v4817_v61 = vld [vmem:[#allocation28 + $0x28] sm:$0xff] }
 0x361   :  { %5965 = vst [vmem:[#allocation48_spill] sm:$0xff] %v4817_v61  ;;  %1687 = vmatpush.msrb.mxu2 %v4817_v61 }
 0x362   :  { %3396 = vmatmul.msk.f32.gmra.mxu0 %vm1242_vm3, %v4736_v62  ;;  %3404 = vmatmul.msk.f32.gmra.mxu2 %vm1242_vm3, %v4736_v62 }
 0x36b   :  { %v1093_v63 = vpop.f32.mrf.mxu2 }
 0x36c   :  { %v1094_v1 = vadd.f32 %v3508_v37, %v1093_v63  ;;  %v1231_v37 = vld [vmem:[#allocation27 + $0xf8] sm:$0xff]  ;;  %v1210_v63 = vld [vmem:[#allocation27 + $0x50] sm:$0xff] }
 0x36d   :  { %1314 = vmatpush.msra.mxu1 %v1231_v37  ;;  %v1348_v37 = vld [vmem:[#allocation25 + $0xb0] sm:$0xff] }
 0x36e   :  { %v4742_v2 = vmax.f32 %v1094_v1, 0.0  ;;  %v1211_v1 = vld [vmem:[#allocation27 + $0x58] sm:$0xff] }
 0x36f   :  { %1315 = vmatpush.msra.mxu1 %v1227_v42  ;;  %v1344_v42 = vld [vmem:[#allocation25 + $0x90] sm:$0xff] }
 0x370   :  { %3397 = vmatmul.msk.f32.gmra.mxu0 %vm1242_vm3, %v4742_v2  ;;  %3405 = vmatmul.msk.f32.gmra.mxu2 %vm1242_vm3, %v4742_v2 }
 0x371   :  { %1316 = vmatpush.msra.mxu1 %v1223_v50  ;;  %v1340_v50 = vld [vmem:[#allocation25 + $0x70] sm:$0xff] }
 0x373   :  { %v1164_v4 = vpop.f32.mrf.mxu3  ;;  %1317 = vmatpush.msra.mxu1 %v1219_v56  ;;  %v1337_v56 = vld [vmem:[#allocation25 + $0x58] sm:$0xff] }
 0x374   :  { %v1165_v7 = vadd.f32 %v3509_v3, %v1164_v4  ;;  %v4821_v3 = vld [vmem:[#allocation28 + $0xc0] sm:$0xff]  ;;  %v4823_v4 = vld [vmem:[#allocation28 + $0x8] sm:$0xff] }
 0x375   :  { %1318 = vmatpush.msra.mxu1 %v1215_v46  ;;  %5966 = vst [vmem:[#allocation49_spill] sm:$0xff] %v4823_v4  ;;  %1662 = vmatpush.msra.mxu0 %v4821_v3  ;;  %v1328_v46 = vld [vmem:[#allocation25 + $0x10] sm:$0xff] }
 0x376   :  { %v1167_v8 = vmax.f32 %v1165_v7, 0.0  ;;  %1688 = vmatpush.msrb.mxu2 %v4823_v4  ;;  %v1206_v7 = vld [vmem:[#allocation27 + $0x30] sm:$0xff] }
 0x377   :  { %1319 = vmatpush.msra.mxu1 %v1211_v1  ;;  %1663 = vmatpush.msra.mxu0 %v4827_v9  ;;  %v4890_v1 = vld [vmem:[#allocation28 + $0x1f0] sm:$0xff] }
 0x378   :  { %3385 = vmatmul.msk.f32.vlgmr.msrb.gmra.mxu3 %vm1143_vm2, %v1167_v8  ;;  %v1207_v8 = vld [vmem:[#allocation27 + $0x38] sm:$0xff]  ;;  %1689 = vmatmul.f32.vlgmr.msrb.gmra.mxu2 %v4271_v10 }
 0x379   :  { %1294 = vmatpush.msrb.mxu3 %v1230_v36  ;;  %1320 = vmatpush.msra.mxu1 %v1207_v8  ;;  %v1353_v36 = vld [vmem:[#allocation25 + $0xd8] sm:$0xff]  ;;  %v4906_v8 = vld [vmem:[#allocation28 + $0x1b0] sm:$0xff] }
 0x37a   :  { %1664 = vmatpush.msra.mxu0 %v4831_v14  ;;  %1832 = vmatpush.msra.mxu2 %v4749_v13 }
 0x37b   :  { %1295 = vmatpush.msrb.mxu3 %v1226_v41  ;;  %1321 = vmatpush.msra.mxu1 %v1203_v12  ;;  %v1349_v41 = vld [vmem:[#allocation25 + $0xb8] sm:$0xff]  ;;  %v4922_v12 = vld [vmem:[#allocation28 + $0x170] sm:$0xff] }
 0x37c   :  { %1665 = vmatpush.msra.mxu0 %v4835_v16  ;;  %1833 = vmatpush.msra.mxu2 %v4752_v15 }
 0x37d   :  { %1296 = vmatpush.msrb.mxu3 %v1222_v49  ;;  %v1345_v49 = vld [vmem:[#allocation25 + $0x98] sm:$0xff] }
 0x37e   :  { %1666 = vmatpush.msra.mxu0 %v4839_v18  ;;  %1834 = vmatpush.msra.mxu2 %v4754_v17 }
 0x37f   :  { %1297 = vmatpush.msrb.mxu3 %v1218_v54  ;;  %v1341_v54 = vld [vmem:[#allocation25 + $0x78] sm:$0xff] }
 0x380   :  { %1667 = vmatpush.msra.mxu0 %v4843_v20  ;;  %1835 = vmatpush.msra.mxu2 %v4758_v19 }
 0x381   :  { %1298 = vmatpush.msrb.mxu3 %v1214_v58  ;;  %v1332_v58 = vld [vmem:[#allocation25 + $0x30] sm:$0xff] }
 0x382   :  { %1668 = vmatpush.msra.mxu0 %v4847_v5  ;;  %1836 = vmatpush.msra.mxu2 %v4761_v21 }
 0x383   :  { %1299 = vmatpush.msrb.mxu3 %v1210_v63  ;;  %1669 = vmatmul.f32.vlgmr.msra.gmra.mxu0 %v4271_v10  ;;  %v4888_v63 = vld [vmem:[#allocation28 + $0x1f8] sm:$0xff] }
 0x384   :  { %1812 = vmatpush.msrb.mxu0 %v4766_v0  ;;  %1837 = vmatpush.msra.mxu2 %v4763_v23 }
 0x385   :  { %1300 = vmatpush.msrb.mxu3 %v1206_v7  ;;  %v4904_v7 = vld [vmem:[#allocation28 + $0x1b8] sm:$0xff] }
 0x386   :  { %1813 = vmatpush.msrb.mxu0 %v4773_v27  ;;  %1838 = vmatpush.msra.mxu2 %v4769_v25 }
 0x387   :  { %1301 = vmatpush.msrb.mxu3 %v1202_v11  ;;  %v4920_v11 = vld [vmem:[#allocation28 + $0x178] sm:$0xff] }
 0x388   :  { %1814 = vmatpush.msrb.mxu0 %v4779_v31  ;;  %1839 = vmatpush.msra.mxu2 %v4775_v28 }
 0x38a   :  { %1815 = vmatpush.msrb.mxu0 %v4785_v34  ;;  %1840 = vmatpush.msra.mxu2 %v4781_v6 }
 0x38c   :  { %1816 = vmatpush.msrb.mxu0 %v4791_v38  ;;  %1841 = vmatpush.msra.mxu2 %v4787_v35 }
 0x38e   :  { %1817 = vmatpush.msrb.mxu0 %v4797_v44  ;;  %1842 = vmatpush.msra.mxu2 %v4793_v39 }
 0x390   :  { %1818 = vmatpush.msrb.mxu0 %v4803_v52  ;;  %1843 = vmatpush.msra.mxu2 %v4799_v47 }
 0x392   :  { %1819 = vmatpush.msrb.mxu0 %v4807_v57  ;;  %1844 = vmatpush.msra.mxu2 %v4805_v53 }
 0x394   :  { %1820 = vmatpush.msrb.mxu0 %v4815_v60  ;;  %1845 = vmatpush.msra.mxu2 %v4809_v45 }
 0x396   :  { %1821 = vmatpush.msrb.mxu0 %v4821_v3  ;;  %1846 = vmatpush.msra.mxu2 %v4817_v61 }
 0x398   :  { %1822 = vmatpush.msrb.mxu0 %v4827_v9  ;;  %1847 = vmatpush.msra.mxu2 %v4823_v4 }
 0x39a   :  { %1823 = vmatpush.msrb.mxu0 %v4831_v14  ;;  %1992 = vmatpush.msrb.mxu2 %v4749_v13  ;;  %v1336_v13 = vld [vmem:[#allocation25 + $0x50] sm:$0xff] }
 0x39c   :  { %1824 = vmatpush.msrb.mxu0 %v4835_v16  ;;  %1993 = vmatpush.msrb.mxu2 %v4752_v15  ;;  %v1333_v15 = vld [vmem:[#allocation25 + $0x38] sm:$0xff] }
 0x39e   :  { %1825 = vmatpush.msrb.mxu0 %v4839_v18  ;;  %1994 = vmatpush.msrb.mxu2 %v4754_v17  ;;  %v1329_v17 = vld [vmem:[#allocation25 + $0x18] sm:$0xff] }
 0x3a0   :  { %1826 = vmatpush.msrb.mxu0 %v4843_v20  ;;  %1995 = vmatpush.msrb.mxu2 %v4758_v19  ;;  %v4898_v19 = vld [vmem:[#allocation28 + $0x1d8] sm:$0xff] }
 0x3a2   :  { %1827 = vmatpush.msrb.mxu0 %v4847_v5  ;;  %1996 = vmatpush.msrb.mxu2 %v4761_v21  ;;  %v4900_v21 = vld [vmem:[#allocation28 + $0x1d0] sm:$0xff] }
 0x3a4   :  { %1972 = vmatpush.msra.mxu0 %v4766_v0  ;;  %1997 = vmatpush.msrb.mxu2 %v4763_v23  ;;  %v4914_v23 = vld [vmem:[#allocation28 + $0x190] sm:$0xff] }
 0x3a6   :  { %1973 = vmatpush.msra.mxu0 %v4773_v27  ;;  %1998 = vmatpush.msrb.mxu2 %v4769_v25  ;;  %v4932_v25 = vld [vmem:[#allocation28 + $0x158] sm:$0xff] }
 0x3a8   :  { %1974 = vmatpush.msra.mxu0 %v4779_v31  ;;  %1999 = vmatpush.msrb.mxu2 %v4775_v28 }
 0x3aa   :  { %1975 = vmatpush.msra.mxu0 %v4785_v34  ;;  %2000 = vmatpush.msrb.mxu2 %v4781_v6 }
 0x3ac   :  { %1976 = vmatpush.msra.mxu0 %v4791_v38  ;;  %2001 = vmatpush.msrb.mxu2 %v4787_v35 }
 0x3ae   :  { %1977 = vmatpush.msra.mxu0 %v4797_v44  ;;  %2002 = vmatpush.msrb.mxu2 %v4793_v39 }
 0x3b0   :  { %1978 = vmatpush.msra.mxu0 %v4803_v52  ;;  %2003 = vmatpush.msrb.mxu2 %v4799_v47 }
 0x3b2   :  { %1979 = vmatpush.msra.mxu0 %v4807_v57  ;;  %2004 = vmatpush.msrb.mxu2 %v4805_v53 }
 0x3b4   :  { %1980 = vmatpush.msra.mxu0 %v4815_v60  ;;  %2005 = vmatpush.msrb.mxu2 %v4809_v45 }
 0x3b6   :  { %1981 = vmatpush.msra.mxu0 %v4821_v3  ;;  %2006 = vmatpush.msrb.mxu2 %v4817_v61 }
 0x3b8   :  { %1982 = vmatpush.msra.mxu0 %v4827_v9  ;;  %2007 = vmatpush.msrb.mxu2 %v4823_v4 }
 0x3ba   :  { %1983 = vmatpush.msra.mxu0 %v4831_v14 }
 0x3bc   :  { %1984 = vmatpush.msra.mxu0 %v4835_v16 }
 0x3be   :  { %1985 = vmatpush.msra.mxu0 %v4839_v18 }
 0x3c0   :  { %1986 = vmatpush.msra.mxu0 %v4843_v20 }
 0x3c2   :  { %1987 = vmatpush.msra.mxu0 %v4847_v5 }
 0x3fb   :  { %v1196_v24 = vpop.f32.mrf.mxu3 }
 0x3fc   :  { %v1197_v26 = vadd.f32 %v3510_v22, %v1196_v24  ;;  %v4934_v22 = vld [vmem:[#allocation28 + $0x150] sm:$0xff]  ;;  %v4938_v24 = vld [vmem:[#allocation28 + $0x138] sm:$0xff] }
 0x3fe   :  { %v1199_v29 = vmax.f32 %v1197_v26, 0.0  ;;  %v4940_v26 = vld [vmem:[#allocation28 + $0x130] sm:$0xff] }
 0x400   :  { %3386 = vmatmul.msk.f32.vlgmr.msra.gmra.mxu3 %vm1242_vm3, %v1199_v29  ;;  %3387 = vmatmul.msk.f32.vlgmr.msrb.gmra.mxu1 %vm1242_vm3, %v1199_v29 }
 0x401   :  { %1472 = vmatpush.msra.mxu3 %v1356_v30  ;;  %1513 = vmatpush.msrb.mxu1 %v1357_v32  ;;  %v4954_v30 = vld [vmem:[#allocation28 + $0xf8] sm:$0xff]  ;;  %v4956_v32 = vld [vmem:[#allocation28 + $0xf0] sm:$0xff] }
 0x403   :  { %1473 = vmatpush.msra.mxu3 %v1352_v33  ;;  %1514 = vmatpush.msrb.mxu1 %v1353_v36  ;;  %v4966_v33 = vld [vmem:[#allocation28 + $0xd8] sm:$0xff]  ;;  %v4968_v36 = vld [vmem:[#allocation28 + $0xd0] sm:$0xff] }
 0x405   :  { %1474 = vmatpush.msra.mxu3 %v1348_v37  ;;  %1515 = vmatpush.msrb.mxu1 %v1349_v41  ;;  %v4972_v37 = vld [vmem:[#allocation28 + $0xb8] sm:$0xff]  ;;  %v4974_v41 = vld [vmem:[#allocation28 + $0xb0] sm:$0xff] }
 0x407   :  { %1475 = vmatpush.msra.mxu3 %v1344_v42  ;;  %1516 = vmatpush.msrb.mxu1 %v1345_v49  ;;  %v4982_v42 = vld [vmem:[#allocation28 + $0x90] sm:$0xff]  ;;  %v4988_v49 = vld [vmem:[#allocation28 + $0x78] sm:$0xff] }
 0x408   :  { %3388 = vmatmul.msk.f32.vlgmr.msrb.gmra.mxu3 %vm1242_vm3, %v1199_v29  ;;  %3389 = vmatmul.msk.f32.vlgmr.msra.gmra.mxu1 %vm1242_vm3, %v1199_v29  ;;  %v4948_v29 = vld [vmem:[#allocation28 + $0x110] sm:$0xff]  ;;  %5972 = vst [vmem:[#allocation55_spill] sm:$0xff] %v4982_v42 }
 0x409   :  { %1476 = vmatpush.msra.mxu3 %v1340_v50  ;;  %1517 = vmatpush.msrb.mxu1 %v1341_v54  ;;  %5973 = vst [vmem:[#allocation56_spill] sm:$0xff] %v4988_v49  ;;  %v4990_v50 = vld [vmem:[#allocation28 + $0x70] sm:$0xff]  ;;  %v5000_v54 = vld [vmem:[#allocation28 + $0x58] sm:$0xff] }
 0x40a   :  { %5974 = vst [vmem:[#allocation57_spill] sm:$0xff] %v4990_v50 }
 0x40b   :  { %1477 = vmatpush.msra.mxu3 %v1336_v13  ;;  %1518 = vmatpush.msrb.mxu1 %v1337_v56  ;;  %5975 = vst [vmem:[#allocation58_spill] sm:$0xff] %v5000_v54  ;;  %v5002_v13 = vld [vmem:[#allocation28 + $0x50] sm:$0xff]  ;;  %v5006_v56 = vld [vmem:[#allocation28 + $0x38] sm:$0xff] }
 0x40c   :  { %5976 = vst [vmem:[#allocation59_spill] sm:$0xff] %v5002_v13 }
 0x40d   :  { %1478 = vmatpush.msra.mxu3 %v1332_v58  ;;  %1519 = vmatpush.msrb.mxu1 %v1333_v15  ;;  %5977 = vst [vmem:[#allocation60_spill] sm:$0xff] %v5006_v56  ;;  %v5008_v58 = vld [vmem:[#allocation28 + $0x30] sm:$0xff] }
 0x40e   :  { %5978 = vst [vmem:[#allocation61_spill] sm:$0xff] %v5008_v58  ;;  %v5016_v15 = vld [vmem:[#allocation28 + $0x10] sm:$0xff] }
 0x40f   :  { %1479 = vmatpush.msra.mxu3 %v1328_v46  ;;  %1520 = vmatpush.msrb.mxu1 %v1329_v17  ;;  %5980 = vst [vmem:[#allocation63_spill] sm:$0xff] %v5016_v15 }
 0x410   :  { %3406 = vmatmul.msk.f32.vlgmr.msra.gmra.mxu3 %vm1242_vm3, %v4700_v40  ;;  %3414 = vmatmul.msk.f32.vlgmr.msrb.gmra.mxu1 %vm1242_vm3, %v4700_v40  ;;  %v4912_v40 = vld [vmem:[#allocation28 + $0x198] sm:$0xff] }
 0x411   :  { %1713 = vmatpush.msra.mxu1 %v4888_v63  ;;  %1693 = vmatpush.msrb.mxu3 %v4890_v1 }
 0x413   :  { %1714 = vmatpush.msra.mxu1 %v4898_v19  ;;  %1694 = vmatpush.msrb.mxu3 %v4900_v21 }
 0x415   :  { %1715 = vmatpush.msra.mxu1 %v4904_v7  ;;  %1695 = vmatpush.msrb.mxu3 %v4906_v8 }
 0x417   :  { %1716 = vmatpush.msra.mxu1 %v4912_v40  ;;  %1696 = vmatpush.msrb.mxu3 %v4914_v23 }
 0x418   :  { %3407 = vmatmul.msk.f32.gmra.mxu3 %vm1242_vm3, %v4706_v43  ;;  %3415 = vmatmul.msk.f32.gmra.mxu1 %vm1242_vm3, %v4706_v43  ;;  %v4946_v43 = vld [vmem:[#allocation28 + $0x118] sm:$0xff] }
 0x419   :  { %1717 = vmatpush.msra.mxu1 %v4920_v11  ;;  %1697 = vmatpush.msrb.mxu3 %v4922_v12 }
 0x41b   :  { %1718 = vmatpush.msra.mxu1 %v4932_v25  ;;  %1698 = vmatpush.msrb.mxu3 %v4934_v22 }
 0x41d   :  { %1719 = vmatpush.msra.mxu1 %v4938_v24  ;;  %1699 = vmatpush.msrb.mxu3 %v4940_v26 }
 0x41f   :  { %1720 = vmatpush.msra.mxu1 %v4946_v43  ;;  %1700 = vmatpush.msrb.mxu3 %v4948_v29 }
 0x420   :  { %3408 = vmatmul.msk.f32.gmra.mxu3 %vm1242_vm3, %v4712_v48  ;;  %3416 = vmatmul.msk.f32.gmra.mxu1 %vm1242_vm3, %v4712_v48  ;;  %v4980_v48 = vld [vmem:[#allocation28 + $0x98] sm:$0xff] }
 0x421   :  { %1721 = vmatpush.msra.mxu1 %v4954_v30  ;;  %1701 = vmatpush.msrb.mxu3 %v4956_v32  ;;  %5971 = vst [vmem:[#allocation54_spill] sm:$0xff] %v4980_v48 }
 0x423   :  { %1722 = vmatpush.msra.mxu1 %v4966_v33  ;;  %1702 = vmatpush.msrb.mxu3 %v4968_v36 }
 0x425   :  { %1723 = vmatpush.msra.mxu1 %v4972_v37  ;;  %1703 = vmatpush.msrb.mxu3 %v4974_v41 }
 0x427   :  { %1724 = vmatpush.msra.mxu1 %v4980_v48  ;;  %1704 = vmatpush.msrb.mxu3 %v4982_v42 }
 0x428   :  { %3409 = vmatmul.msk.f32.gmra.mxu3 %vm1242_vm3, %v4718_v51  ;;  %3417 = vmatmul.msk.f32.gmra.mxu1 %vm1242_vm3, %v4718_v51  ;;  %v5014_v51 = vld [vmem:[#allocation28 + $0x18] sm:$0xff] }
 0x429   :  { %1725 = vmatpush.msra.mxu1 %v4988_v49  ;;  %1705 = vmatpush.msrb.mxu3 %v4990_v50  ;;  %5979 = vst [vmem:[#allocation62_spill] sm:$0xff] %v5014_v51 }
 0x42b   :  { %1726 = vmatpush.msra.mxu1 %v5000_v54  ;;  %1706 = vmatpush.msrb.mxu3 %v5002_v13 }
 0x42d   :  { %1727 = vmatpush.msra.mxu1 %v5006_v56  ;;  %1707 = vmatpush.msrb.mxu3 %v5008_v58 }
 0x42f   :  { %1728 = vmatpush.msra.mxu1 %v5014_v51  ;;  %1708 = vmatpush.msrb.mxu3 %v5016_v15 }
 0x430   :  { %3410 = vmatmul.msk.f32.gmra.mxu3 %vm1242_vm3, %v4724_v55  ;;  %3418 = vmatmul.msk.f32.gmra.mxu1 %vm1242_vm3, %v4724_v55  ;;  %v5047_v55 = vpop.f32.mrf.mxu2 }
 0x431   :  { %1852 = vmatpush.msra.mxu3 %v4890_v1  ;;  %1872 = vmatpush.msrb.mxu1 %v4888_v63 }
 0x433   :  { %1853 = vmatpush.msra.mxu3 %v4900_v21  ;;  %1873 = vmatpush.msrb.mxu1 %v4898_v19 }
 0x435   :  { %1854 = vmatpush.msra.mxu3 %v4906_v8  ;;  %1874 = vmatpush.msrb.mxu1 %v4904_v7 }
 0x437   :  { %1855 = vmatpush.msra.mxu3 %v4914_v23  ;;  %1875 = vmatpush.msrb.mxu1 %v4912_v40 }
 0x438   :  { %3411 = vmatmul.msk.f32.gmra.mxu3 %vm1242_vm3, %v4730_v59  ;;  %3419 = vmatmul.msk.f32.gmra.mxu1 %vm1242_vm3, %v4730_v59  ;;  %v5063_v59 = vpop.f32.mrf.mxu2 }
 0x439   :  { %1856 = vmatpush.msra.mxu3 %v4922_v12  ;;  %1876 = vmatpush.msrb.mxu1 %v4920_v11  ;;  %5981 = vst [vmem:[#allocation64_spill] sm:$0xff] %v5063_v59 }
 0x43b   :  { %1857 = vmatpush.msra.mxu3 %v4934_v22  ;;  %1877 = vmatpush.msrb.mxu1 %v4932_v25 }
 0x43d   :  { %1858 = vmatpush.msra.mxu3 %v4940_v26  ;;  %1878 = vmatpush.msrb.mxu1 %v4938_v24 }
 0x43f   :  { %1859 = vmatpush.msra.mxu3 %v4948_v29  ;;  %1879 = vmatpush.msrb.mxu1 %v4946_v43 }
 0x440   :  { %3412 = vmatmul.msk.f32.gmra.mxu3 %vm1242_vm3, %v4736_v62  ;;  %3420 = vmatmul.msk.f32.gmra.mxu1 %vm1242_vm3, %v4736_v62  ;;  %v5079_v62 = vpop.f32.mrf.mxu2 }
 0x441   :  { %1860 = vmatpush.msra.mxu3 %v4956_v32  ;;  %1880 = vmatpush.msrb.mxu1 %v4954_v30  ;;  %5982 = vst [vmem:[#allocation65_spill] sm:$0xff] %v5079_v62  ;;  %v1232_v62 = vld [vmem:[%s5830_s21] sm:$0xf] }
 0x442   :  { %v1235_v4 = vperm.slane %v1232_v62, 1  ;;  %v1236_v18 = vperm.slane %v1232_v62, 2  ;;  %v1234_v53 = vperm.slane %v1232_v62, 0 }
 0x443   :  { %1861 = vmatpush.msra.mxu3 %v4968_v36  ;;  %1881 = vmatpush.msrb.mxu1 %v4966_v33 }
 0x445   :  { %1862 = vmatpush.msra.mxu3 %v4974_v41  ;;  %1882 = vmatpush.msrb.mxu1 %v4972_v37 }
 0x447   :  { %1863 = vmatpush.msra.mxu3 %v4982_v42  ;;  %1883 = vmatpush.msrb.mxu1 %v4980_v48 }
 0x448   :  { %3413 = vmatmul.msk.f32.gmra.mxu3 %vm1242_vm3, %v4742_v2  ;;  %3421 = vmatmul.msk.f32.gmra.mxu1 %vm1242_vm3, %v4742_v2  ;;  %v5093_v2 = vpop.f32.mrf.mxu2 }
 0x449   :  { %1864 = vmatpush.msra.mxu3 %v4990_v50  ;;  %1884 = vmatpush.msrb.mxu1 %v4988_v49  ;;  %5983 = vst [vmem:[#allocation66_spill] sm:$0xff] %v5093_v2 }
 0x44b   :  { %1865 = vmatpush.msra.mxu3 %v5002_v13  ;;  %1885 = vmatpush.msrb.mxu1 %v5000_v54 }
 0x44d   :  { %1866 = vmatpush.msra.mxu3 %v5008_v58  ;;  %1886 = vmatpush.msrb.mxu1 %v5006_v56 }
 0x44f   :  { %1867 = vmatpush.msra.mxu3 %v5016_v15  ;;  %1887 = vmatpush.msrb.mxu1 %v5014_v51 }
 0x450   :  { %1709 = vmatmul.f32.vlgmr.msrb.gmra.mxu3 %v4271_v10  ;;  %1729 = vmatmul.f32.vlgmr.msra.gmra.mxu1 %v4271_v10  ;;  %v1399_v10 = vpop.f32.mrf.mxu0  ;;  %v5105_v46 = vpop.f32.mrf.mxu2 }
 0x451   :  { %2012 = vmatpush.msrb.mxu3 %v4890_v1  ;;  %2032 = vmatpush.msra.mxu1 %v4888_v63  ;;  %5984 = vst [vmem:[#allocation67_spill] sm:$0xff] %v5105_v46 }
 0x453   :  { %2013 = vmatpush.msrb.mxu3 %v4900_v21  ;;  %2033 = vmatpush.msra.mxu1 %v4898_v19 }
 0x455   :  { %2014 = vmatpush.msrb.mxu3 %v4906_v8  ;;  %2034 = vmatpush.msra.mxu1 %v4904_v7 }
 0x457   :  { %2015 = vmatpush.msrb.mxu3 %v4914_v23  ;;  %2035 = vmatpush.msra.mxu1 %v4912_v40 }
 0x458   :  { %v5109_v17 = vpop.f32.mrf.mxu0  ;;  %v5119_v46 = vpop.f32.mrf.mxu2 }
 0x459   :  { %2016 = vmatpush.msrb.mxu3 %v4922_v12  ;;  %2036 = vmatpush.msra.mxu1 %v4920_v11  ;;  %5985 = vst [vmem:[#allocation68_spill] sm:$0xff] %v5109_v17 }
 0x45a   :  { %5986 = vst [vmem:[#allocation69_spill] sm:$0xff] %v5119_v46 }
 0x45b   :  { %2017 = vmatpush.msrb.mxu3 %v4934_v22  ;;  %2037 = vmatpush.msra.mxu1 %v4932_v25 }
 0x45d   :  { %2018 = vmatpush.msrb.mxu3 %v4940_v26  ;;  %2038 = vmatpush.msra.mxu1 %v4938_v24 }
 0x45f   :  { %2019 = vmatpush.msrb.mxu3 %v4948_v29  ;;  %2039 = vmatpush.msra.mxu1 %v4946_v43 }
 0x460   :  { %v5123_v2 = vpop.f32.mrf.mxu0  ;;  %v5128_v59 = vpop.f32.mrf.mxu2 }
 0x461   :  { %2020 = vmatpush.msrb.mxu3 %v4956_v32  ;;  %2040 = vmatpush.msra.mxu1 %v4954_v30  ;;  %5987 = vst [vmem:[#allocation70_spill] sm:$0xff] %v5123_v2 }
 0x462   :  { %5988 = vst [vmem:[#allocation71_spill] sm:$0xff] %v5128_v59 }
 0x463   :  { %2021 = vmatpush.msrb.mxu3 %v4968_v36  ;;  %2041 = vmatpush.msra.mxu1 %v4966_v33 }
 0x465   :  { %2022 = vmatpush.msrb.mxu3 %v4974_v41  ;;  %2042 = vmatpush.msra.mxu1 %v4972_v37 }
 0x467   :  { %2023 = vmatpush.msrb.mxu3 %v4982_v42  ;;  %2043 = vmatpush.msra.mxu1 %v4980_v48 }
 0x468   :  { %v5130_v17 = vpop.f32.mrf.mxu0 }
 0x469   :  { %2024 = vmatpush.msrb.mxu3 %v4990_v50  ;;  %2044 = vmatpush.msra.mxu1 %v4988_v49  ;;  %5989 = vst [vmem:[#allocation72_spill] sm:$0xff] %v5130_v17 }
 0x46b   :  { %2025 = vmatpush.msrb.mxu3 %v5002_v13  ;;  %2045 = vmatpush.msra.mxu1 %v5000_v54  ;;  %v1237_v13 = vperm.slane %v1232_v62, 3 }
 0x46d   :  { %2026 = vmatpush.msrb.mxu3 %v5008_v58  ;;  %2046 = vmatpush.msra.mxu1 %v5006_v56  ;;  %v1461_v56 = vpop.f32.mrf.mxu2 }
 0x46f   :  { %2027 = vmatpush.msrb.mxu3 %v5016_v15  ;;  %2047 = vmatpush.msra.mxu1 %v5014_v51 }
 0x470   :  { %v5137_v51 = vpop.f32.mrf.mxu0 }
 0x471   :  { %5992 = vst [vmem:[#allocation75_spill] sm:$0xff] %v5137_v51 }
 0x478   :  { %v5139_v54 = vpop.f32.mrf.mxu0 }
 0x479   :  { %5993 = vst [vmem:[#allocation76_spill] sm:$0xff] %v5139_v54 }
 0x47d   :  { %v1283_v5 = vpop.f32.mrf.mxu1 }
 0x47e   :  { %v5132_v58 = vadd.f32 %v1283_v5, %v1235_v4 }
 0x480   :  { %5990 = vst [vmem:[#allocation73_spill] sm:$0xff] %v5132_v58  ;;  %v5135_v46 = vadd.f32 %v1461_v56, %v5132_v58  ;;  %v5145_v5 = vpop.f32.mrf.mxu0 }
 0x481   :  { %5995 = vst [vmem:[#allocation78_spill] sm:$0xff] %v5145_v5 }
 0x482   :  { %5991 = vst [vmem:[#allocation74_spill] sm:$0xff] %v5135_v46 }
 0x483   :  { %v1263_v15 = vpop.f32.mrf.mxu3 }
 0x484   :  { %v5153_v54 = vadd.f32 %v1263_v15, %v1234_v53 }
 0x485   :  { %v1323_v2 = vpop.f32.mrf.mxu1 }
 0x486   :  { %v1324_v17 = vadd.f32 %v1323_v2, %v1237_v13  ;;  %5999 = vst [vmem:[#allocation82_spill] sm:$0xff] %v5153_v54 }
 0x488   :  { %v5151_v16 = vpop.f32.mrf.mxu0 }
 0x489   :  { %5998 = vst [vmem:[#allocation81_spill] sm:$0xff] %v5151_v16 }
 0x48b   :  { %v1303_v61 = vpop.f32.mrf.mxu3 }
 0x48c   :  { %v1304_v56 = vadd.f32 %v1303_v61, %v1236_v18  ;;  %v1690_v61 = vpop.f32.mrf.mxu2  ;;  %v1649_v18 = vadd.f32 %v1399_v10, %v5153_v54 }
 0x48d   :  { %v1522_v20 = vpop.f32.mrf.mxu1 }
 0x493   :  { %v5141_v59 = vpop.f32.mrf.mxu3 }
 0x495   :  { %v1525_v45 = vpop.f32.mrf.mxu1 }
 0x496   :  { %v5143_v4 = vadd.f32 %v1525_v45, %v1324_v17  ;;  %v1650_v45 = vadd.f32 %v5047_v55, %v5132_v58 }
 0x498   :  { %5994 = vst [vmem:[#allocation77_spill] sm:$0xff] %v5143_v4 }
 0x49b   :  { %v1484_v46 = vpop.f32.mrf.mxu3 }
 0x49c   :  { %v5147_v49 = vadd.f32 %v1484_v46, %v1304_v56  ;;  %v1670_v46 = vpop.f32.mrf.mxu0 }
 0x49d   :  { %v1528_v51 = vpop.f32.mrf.mxu1 }
 0x49e   :  { %5996 = vst [vmem:[#allocation79_spill] sm:$0xff] %v5147_v49  ;;  %v5149_v50 = vadd.f32 %v1528_v51, %v1324_v17  ;;  %v1734_v51 = vadd.f32 %v1690_v61, %v1650_v45 }
 0x4a0   :  { %5997 = vst [vmem:[#allocation80_spill] sm:$0xff] %v5149_v50  ;;  %v1733_v50 = vadd.f32 %v1670_v46, %v1649_v18  ;;  %v3423_v15 = vmul.f32 -1.442695, %v1734_v51 }
 0x4a2   :  { %3513 = vpow2.f32 %v3423_v15 }
 0x4a3   :  { %v1487_v48 = vpop.f32.mrf.mxu3 }
 0x4a4   :  { %v5155_v13 = vadd.f32 %v1487_v48, %v1304_v56  ;;  %v3422_v48 = vmul.f32 -1.442695, %v1733_v50 }
 0x4a5   :  { %v1531_v2 = vpop.f32.mrf.mxu1 }
 0x4a6   :  { %6000 = vst [vmem:[#allocation83_spill] sm:$0xff] %v5155_v13  ;;  %v5159_v5 = vadd.f32 %v1531_v2, %v1324_v17  ;;  %3515 = vpow2.f32 %v3422_v48 }
 0x4a8   :  { %6001 = vst [vmem:[#allocation84_spill] sm:$0xff] %v5159_v5  ;;  %v3514_v10 = vpop.eup %3513 }
 0x4a9   :  { %v1759_v45 = vadd.f32 1.0, %v3514_v10 }
 0x4ab   :  { %v1490_v62 = vpop.f32.mrf.mxu3  ;;  %3517 = vrcp.f32 %v1759_v45  ;;  %vm1765_vm6 = vweird.f32 %v1759_v45 }
 0x4ac   :  { %v5162_v49 = vadd.f32 %v1490_v62, %v1304_v56  ;;  %v3516_v58 = vpop.eup %3515 }
 0x4ad   :  { %v1534_v53 = vpop.f32.mrf.mxu1  ;;  %v1740_v18 = vadd.f32 1.0, %v3516_v58 }
 0x4ae   :  { %6002 = vst [vmem:[#allocation85_spill] sm:$0xff] %v5162_v49  ;;  %v5164_v16 = vadd.f32 %v1534_v53, %v1324_v17 }
 0x4af   :  { %3519 = vrcp.f32 %v1740_v18  ;;  %vm1746_vm7 = vweird.f32 %v1740_v18 }
 0x4b0   :  { %6003 = vst [vmem:[#allocation86_spill] sm:$0xff] %v5164_v16  ;;  %v1652_v16 = vadd.f32 %v1522_v20, %v1324_v17  ;;  %v1771_v20 = vand.u32 2147483648, %v1759_v45 }
 0x4b3   :  { %v1493_v13 = vpop.f32.mrf.mxu3 }
 0x4b4   :  { %v5166_v55 = vadd.f32 %v1493_v13, %v1304_v56  ;;  %v3518_v13 = vpop.eup %3517 }
 0x4b5   :  { %v1537_v2 = vpop.f32.mrf.mxu1  ;;  %v3520_v48 = vpop.eup %3519  ;;  %vm1766_vm4 = vweird.f32 %v3518_v13 }
 0x4b6   :  { %6004 = vst [vmem:[#allocation87_spill] sm:$0xff] %v5166_v55  ;;  %v5168_v5 = vadd.f32 %v1537_v2, %v1324_v17  ;;  %v1742_v55 = vmul.f32 %v3520_v48, %v1740_v18  ;;  %vm1747_vm5 = vweird.f32 %v3520_v48  ;;  %vm1767_vm8 = vmor %vm1765_vm6, %vm1766_vm4 }
 0x4b7   :  { %vm1748_vm9 = vmor %vm1746_vm7, %vm1747_vm5 }
 0x4b8   :  { %6005 = vst [vmem:[#allocation88_spill] sm:$0xff] %v5168_v5  ;;  %v1761_v5 = vmul.f32 %v3518_v13, %v1759_v45 }
 0x4bb   :  { %v1496_v61 = vpop.f32.mrf.mxu3 }
 0x4bc   :  { %v5170_v46 = vadd.f32 %v1496_v61, %v1304_v56  ;;  %v1762_v61 = vsub.f32 1.0, %v1761_v5  ;;  %v1750_v5 = vand.u32 2147483647, %v1740_v18 }
 0x4bd   :  { %v1540_v62 = vpop.f32.mrf.mxu1 }
 0x4be   :  { %6006 = vst [vmem:[#allocation89_spill] sm:$0xff] %v5170_v46  ;;  %v5172_v51 = vadd.f32 %v1540_v62, %v1324_v17  ;;  %v1743_v46 = vsub.f32 1.0, %v1742_v55  ;;  %v1763_v4 = vmul.f32 %v3518_v13, %v1762_v61  ;;  %vm1751_vm10 = vcmp.eq.f32.partialorder %v1750_v5, 8.507059e+37 }
 0x4c0   :  { %6007 = vst [vmem:[#allocation90_spill] sm:$0xff] %v5172_v51  ;;  %v1744_v54 = vmul.f32 %v3520_v48, %v1743_v46 }
 0x4c3   :  { %v1499_v50 = vpop.f32.mrf.mxu3 }
 0x4c4   :  { %v5174_v53 = vadd.f32 %v1499_v50, %v1304_v56  ;;  %v1651_v50 = vadd.f32 %v5141_v59, %v1304_v56 }
 0x4c5   :  { %v1543_v15 = vpop.f32.mrf.mxu1 }
 0x4c6   :  { %6008 = vst [vmem:[#allocation91_spill] sm:$0xff] %v5174_v53  ;;  %v5176_v2 = vadd.f32 %v1543_v15, %v1324_v17  ;;  %v1745_v15 = vadd.f32 %v3520_v48, %v1744_v54  ;;  %v1752_v17 = vand.u32 2147483648, %v1740_v18 }
 0x4c8   :  { %6009 = vst [vmem:[#allocation92_spill] sm:$0xff] %v5176_v2  ;;  %v1764_v2 = vadd.f32 %v3518_v13, %v1763_v4 }
 0x4ca   :  { %v1768_v59 = vsel %vm1767_vm8, %v3518_v13, %v1764_v2 }
 0x4cb   :  { %v1502_v10 = vpop.f32.mrf.mxu3 }
 0x4cc   :  { %v5178_v58 = vadd.f32 %v1502_v10, %v1304_v56  ;;  %v1753_v56 = vor.u32 1.1754944e-38, %v1752_v17 }
 0x4cd   :  { %v1730_v62 = vpop.f32.mrf.mxu1 }
 0x4ce   :  { %6010 = vst [vmem:[#allocation93_spill] sm:$0xff] %v5178_v58  ;;  %v1736_v51 = vadd.f32 %v1730_v62, %v1652_v16  ;;  %v1769_v16 = vand.u32 2147483647, %v1759_v45 }
 0x4d0   :  { %v3424_v49 = vmul.f32 -1.442695, %v1736_v51  ;;  %v1749_v51 = vsel %vm1748_vm9, %v3520_v48, %v1745_v15  ;;  %vm1770_vm11 = vcmp.eq.f32.partialorder %v1769_v16, 8.507059e+37 }
 0x4d1   :  { %v1754_v4 = vsel %vm1751_vm10, %v1753_v56, %v1749_v51  ;;  %v6024_v51 = vld [vmem:[#allocation61_spill] sm:$0xff] }
 0x4d2   :  { %3521 = vpow2.f32 %v3424_v49  ;;  %v1772_v49 = vor.u32 1.1754944e-38, %v1771_v20  ;;  %v6027_v56 = vld [vmem:[#allocation49_spill] sm:$0xff] }
 0x4d3   :  { %v1710_v53 = vpop.f32.mrf.mxu3 }
 0x4d4   :  { %v1735_v42 = vadd.f32 %v1710_v53, %v1651_v50  ;;  %v1773_v53 = vsel %vm1770_vm11, %v1772_v49, %v1768_v59  ;;  %v6025_v59 = vld [vmem:[#allocation60_spill] sm:$0xff]  ;;  %v6026_v49 = vld [vmem:[#allocation53_spill] sm:$0xff] }
 0x4d5   :  { %v1795_v61 = vmul.f32 0.0, %v1773_v53  ;;  %v6030_v53 = vld [vmem:[#allocation82_spill] sm:$0xff] }
 0x4d6   :  { %3523 = vtanh.f32 %v1735_v42 }
 0x4d8   :  { %v3522_v55 = vpop.eup %3521 }
 0x4d9   :  { %v1779_v46 = vadd.f32 1.0, %v3522_v55  ;;  %v5191_v55 = vld [vmem:[#allocation28 + $0x1e8] sm:$0xff] }
 0x4db   :  { %3525 = vrcp.f32 %v1779_v46  ;;  %v1791_v50 = vand.u32 2147483648, %v1779_v46  ;;  %v1789_v13 = vand.u32 2147483647, %v1779_v46  ;;  %vm1785_vm13 = vweird.f32 %v1779_v46 }
 0x4dc   :  { %v3524_v54 = vpop.eup %3523 }
 0x4dd   :  { %v1796_v10 = vmul.f32 %v3524_v54, %v1754_v4  ;;  %v1792_v15 = vor.u32 1.1754944e-38, %v1791_v50  ;;  %vm1790_vm15 = vcmp.eq.f32.partialorder %v1789_v13, 8.507059e+37  ;;  %v6028_v54 = vld [vmem:[#allocation63_spill] sm:$0xff]  ;;  %v6029_v4 = vld [vmem:[#allocation62_spill] sm:$0xff]  ;;  %v6032_v50 = vld [vmem:[#allocation77_spill] sm:$0xff] }
 0x4df   :  { %v5181_v62 = vadd.f32 %v1796_v10, %v1795_v61  ;;  %v6031_v10 = vld [vmem:[#allocation68_spill] sm:$0xff] }
 0x4e0   :  { %v1808_v61 = vadd.f32 %v6031_v10, %v6030_v53 }
 0x4e1   :  { %v3526_v42 = vpop.eup %3525  ;;  %3527 = vtanh.f32 %v5181_v62 }
 0x4e2   :  { %v1781_v18 = vmul.f32 %v3526_v42, %v1779_v46  ;;  %vm1786_vm12 = vweird.f32 %v3526_v42  ;;  %v5197_v46 = vld [vmem:[#allocation28 + $0x1c8] sm:$0xff] }
 0x4e3   :  { %vm1787_vm14 = vmor %vm1785_vm13, %vm1786_vm12 }
 0x4e4   :  { %v1782_v45 = vsub.f32 1.0, %v1781_v18 }
 0x4e6   :  { %v1783_v48 = vmul.f32 %v3526_v42, %v1782_v45 }
 0x4e7   :  { %v3528_v17 = vpop.eup %3527 }
 0x4e8   :  { %v1784_v2 = vadd.f32 %v3526_v42, %v1783_v48 }
 0x4ea   :  { %v1788_v20 = vsel %vm1787_vm14, %v3526_v42, %v1784_v2 }
 0x4eb   :  { %v1793_v5 = vsel %vm1790_vm15, %v1792_v15, %v1788_v20  ;;  %v6033_v15 = vld [vmem:[#allocation73_spill] sm:$0xff]  ;;  %v6034_v20 = vld [vmem:[#allocation64_spill] sm:$0xff] }
 0x4ec   :  { %v5184_v16 = vmul.f32 %v3528_v17, %v1793_v5  ;;  %v1809_v17 = vadd.f32 %v6034_v20, %v6033_v15 }
 0x4ee   :  { %6011 = vst [vmem:[#allocation94_spill] sm:$0xff] %v5184_v16  ;;  %1828 = vmatmul.f32.vlgmr.msrb.gmra.mxu0 %v5184_v16  ;;  %1848 = vmatmul.f32.vlgmr.msra.gmra.mxu2 %v5184_v16 }
 0x4ef   :  { %1868 = vmatmul.f32.vlgmr.msra.gmra.mxu3 %v5184_v16  ;;  %1888 = vmatmul.f32.vlgmr.msrb.gmra.mxu1 %v5184_v16 }
 0x4f0   :  { %2132 = vmatpush.msrb.mxu0 %v4766_v0  ;;  %2152 = vmatpush.msra.mxu2 %v5191_v55  ;;  %v5203_v0 = vld [vmem:[#allocation28 + $0x1a8] sm:$0xff] }
 0x4f1   :  { %2172 = vmatpush.msra.mxu3 %v4890_v1  ;;  %2192 = vmatpush.msrb.mxu1 %v4888_v63 }
 0x4f2   :  { %2133 = vmatpush.msrb.mxu0 %v4773_v27  ;;  %2153 = vmatpush.msra.mxu2 %v5197_v46  ;;  %v5209_v27 = vld [vmem:[#allocation28 + $0x188] sm:$0xff] }
 0x4f3   :  { %2173 = vmatpush.msra.mxu3 %v4900_v21  ;;  %2193 = vmatpush.msrb.mxu1 %v4898_v19 }
 0x4f4   :  { %2134 = vmatpush.msrb.mxu0 %v4779_v31  ;;  %2154 = vmatpush.msra.mxu2 %v5203_v0  ;;  %v5215_v31 = vld [vmem:[#allocation28 + $0x168] sm:$0xff] }
 0x4f5   :  { %2174 = vmatpush.msra.mxu3 %v4906_v8  ;;  %2194 = vmatpush.msrb.mxu1 %v4904_v7 }
 0x4f6   :  { %2135 = vmatpush.msrb.mxu0 %v4785_v34  ;;  %2155 = vmatpush.msra.mxu2 %v5209_v27  ;;  %v5221_v34 = vld [vmem:[#allocation28 + $0x148] sm:$0xff] }
 0x4f7   :  { %2175 = vmatpush.msra.mxu3 %v4914_v23  ;;  %2195 = vmatpush.msrb.mxu1 %v4912_v40 }
 0x4f8   :  { %2136 = vmatpush.msrb.mxu0 %v4791_v38  ;;  %2156 = vmatpush.msra.mxu2 %v5215_v31  ;;  %v5227_v38 = vld [vmem:[#allocation28 + $0x128] sm:$0xff] }
 0x4f9   :  { %2176 = vmatpush.msra.mxu3 %v4922_v12  ;;  %2196 = vmatpush.msrb.mxu1 %v4920_v11 }
 0x4fa   :  { %2137 = vmatpush.msrb.mxu0 %v4797_v44  ;;  %2157 = vmatpush.msra.mxu2 %v5221_v34  ;;  %v6015_v44 = vld [vmem:[#allocation46_spill] sm:$0xff] }
 0x4fb   :  { %2177 = vmatpush.msra.mxu3 %v4934_v22  ;;  %2197 = vmatpush.msrb.mxu1 %v4932_v25 }
 0x4fc   :  { %2138 = vmatpush.msrb.mxu0 %v4803_v52  ;;  %2158 = vmatpush.msra.mxu2 %v5227_v38  ;;  %v6016_v52 = vld [vmem:[#allocation57_spill] sm:$0xff] }
 0x4fd   :  { %2178 = vmatpush.msra.mxu3 %v4940_v26  ;;  %2198 = vmatpush.msrb.mxu1 %v4938_v24 }
 0x4fe   :  { %2139 = vmatpush.msrb.mxu0 %v4807_v57  ;;  %2159 = vmatpush.msra.mxu2 %v4775_v28  ;;  %v6012_v28 = vld [vmem:[#allocation55_spill] sm:$0xff]  ;;  %v6017_v57 = vld [vmem:[#allocation56_spill] sm:$0xff] }
 0x4ff   :  { %2179 = vmatpush.msra.mxu3 %v4948_v29  ;;  %2199 = vmatpush.msrb.mxu1 %v4946_v43 }
 0x500   :  { %2140 = vmatpush.msrb.mxu0 %v4815_v60  ;;  %2160 = vmatpush.msra.mxu2 %v4781_v6  ;;  %v6013_v6 = vld [vmem:[#allocation54_spill] sm:$0xff]  ;;  %v6019_v60 = vld [vmem:[#allocation47_spill] sm:$0xff] }
 0x501   :  { %2180 = vmatpush.msra.mxu3 %v4956_v32  ;;  %2200 = vmatpush.msrb.mxu1 %v4954_v30 }
 0x502   :  { %2141 = vmatpush.msrb.mxu0 %v4821_v3  ;;  %2161 = vmatpush.msra.mxu2 %v4787_v35  ;;  %v6014_v35 = vld [vmem:[#allocation50_spill] sm:$0xff]  ;;  %v6020_v3 = vld [vmem:[#allocation59_spill] sm:$0xff] }
 0x503   :  { %2181 = vmatpush.msra.mxu3 %v4968_v36  ;;  %2201 = vmatpush.msrb.mxu1 %v4966_v33 }
 0x504   :  { %2142 = vmatpush.msrb.mxu0 %v4827_v9  ;;  %2162 = vmatpush.msra.mxu2 %v4793_v39  ;;  %v6018_v39 = vld [vmem:[#allocation51_spill] sm:$0xff]  ;;  %v6021_v9 = vld [vmem:[#allocation58_spill] sm:$0xff] }
 0x505   :  { %2182 = vmatpush.msra.mxu3 %v4974_v41  ;;  %2202 = vmatpush.msrb.mxu1 %v4972_v37 }
 0x506   :  { %2143 = vmatpush.msrb.mxu0 %v4831_v14  ;;  %2163 = vmatpush.msra.mxu2 %v4799_v47  ;;  %v6022_v47 = vld [vmem:[#allocation52_spill] sm:$0xff] }
 0x507   :  { %2183 = vmatpush.msra.mxu3 %v6012_v28  ;;  %2203 = vmatpush.msrb.mxu1 %v6013_v6  ;;  %v6023_v14 = vld [vmem:[#allocation48_spill] sm:$0xff] }
 0x508   :  { %2144 = vmatpush.msrb.mxu0 %v6014_v35  ;;  %2164 = vmatpush.msra.mxu2 %v6015_v44 }
 0x509   :  { %2184 = vmatpush.msra.mxu3 %v6016_v52  ;;  %2204 = vmatpush.msrb.mxu1 %v6017_v57 }
 0x50a   :  { %2145 = vmatpush.msrb.mxu0 %v6018_v39  ;;  %2165 = vmatpush.msra.mxu2 %v6019_v60 }
 0x50b   :  { %2185 = vmatpush.msra.mxu3 %v6020_v3  ;;  %2205 = vmatpush.msrb.mxu1 %v6021_v9 }
 0x50c   :  { %2146 = vmatpush.msrb.mxu0 %v6022_v47  ;;  %2166 = vmatpush.msra.mxu2 %v6023_v14 }
 0x50d   :  { %2186 = vmatpush.msra.mxu3 %v6024_v51  ;;  %2206 = vmatpush.msrb.mxu1 %v6025_v59 }
 0x50e   :  { %2147 = vmatpush.msrb.mxu0 %v6026_v49  ;;  %2167 = vmatpush.msra.mxu2 %v6027_v56 }
 0x50f   :  { %2187 = vmatpush.msra.mxu3 %v6028_v54  ;;  %2207 = vmatpush.msrb.mxu1 %v6029_v4 }
 0x56b   :  { %v1829_v42 = vpop.f32.mrf.mxu0 }
 0x56c   :  { %v1892_v18 = vadd.f32 %v1829_v42, %v1808_v61  ;;  %v1889_v45 = vpop.f32.mrf.mxu1  ;;  %v6035_v42 = vld [vmem:[#allocation79_spill] sm:$0xff] }
 0x56d   :  { %v1895_v48 = vadd.f32 %v1889_v45, %v6032_v50 }
 0x56e   :  { %v3425_v13 = vmul.f32 -1.442695, %v1892_v18 }
 0x56f   :  { %v3427_v2 = vmul.f32 -1.442695, %v1895_v48 }
 0x570   :  { %3529 = vpow2.f32 %v3425_v13 }
 0x571   :  { %3531 = vpow2.f32 %v3427_v2  ;;  %v1849_v5 = vpop.f32.mrf.mxu2 }
 0x572   :  { %v1893_v35 = vadd.f32 %v1849_v5, %v1809_v17  ;;  %v1869_v56 = vpop.f32.mrf.mxu3 }
 0x573   :  { %v1894_v18 = vadd.f32 %v1869_v56, %v6035_v42 }
 0x574   :  { %v3426_v44 = vmul.f32 -1.442695, %v1893_v35 }
 0x576   :  { %v3530_v39 = vpop.eup %3529  ;;  %3533 = vpow2.f32 %v3426_v44 }
 0x577   :  { %v3532_v60 = vpop.eup %3531  ;;  %v1899_v47 = vadd.f32 1.0, %v3530_v39 }
 0x578   :  { %v1938_v14 = vadd.f32 1.0, %v3532_v60 }
 0x579   :  { %3535 = vrcp.f32 %v1899_v47  ;;  %v1911_v48 = vand.u32 2147483648, %v1899_v47  ;;  %v1909_v20 = vand.u32 2147483647, %v1899_v47  ;;  %vm1905_vm1 = vweird.f32 %v1899_v47 }
 0x57a   :  { %3537 = vrcp.f32 %v1938_v14  ;;  %vm1944_vm9 = vweird.f32 %v1938_v14 }
 0x57b   :  { %v1912_v39 = vor.u32 1.1754944e-38, %v1911_v48  ;;  %vm1910_vm3 = vcmp.eq.f32.partialorder %v1909_v20, 8.507059e+37 }
 0x57c   :  { %v3534_v49 = vpop.eup %3533 }
 0x57d   :  { %v1918_v10 = vadd.f32 1.0, %v3534_v49 }
 0x57f   :  { %v3536_v61 = vpop.eup %3535  ;;  %3539 = vrcp.f32 %v1918_v10  ;;  %v1930_v56 = vand.u32 2147483648, %v1918_v10  ;;  %vm1924_vm5 = vweird.f32 %v1918_v10 }
 0x580   :  { %v1901_v45 = vmul.f32 %v3536_v61, %v1899_v47  ;;  %3541 = vtanh.f32 %v1894_v18  ;;  %v3538_v13 = vpop.eup %3537  ;;  %vm1906_vm0 = vweird.f32 %v3536_v61  ;;  %v1928_v18 = vand.u32 2147483647, %v1918_v10 }
 0x581   :  { %v1940_v44 = vmul.f32 %v3538_v13, %v1938_v14  ;;  %vm1907_vm2 = vmor %vm1905_vm1, %vm1906_vm0  ;;  %v1931_v53 = vor.u32 1.1754944e-38, %v1930_v56  ;;  %vm1945_vm8 = vweird.f32 %v3538_v13 }
 0x582   :  { %v1902_v50 = vsub.f32 1.0, %v1901_v45  ;;  %vm1929_vm7 = vcmp.eq.f32.partialorder %v1928_v18, 8.507059e+37  ;;  %vm1946_vm10 = vmor %vm1944_vm9, %vm1945_vm8 }
 0x584   :  { %v1903_v2 = vmul.f32 %v3536_v61, %v1902_v50  ;;  %v1941_v50 = vsub.f32 1.0, %v1940_v44 }
 0x585   :  { %v3540_v17 = vpop.eup %3539 }
 0x586   :  { %v1920_v5 = vmul.f32 %v3540_v17, %v1918_v10  ;;  %v1904_v35 = vadd.f32 %v3536_v61, %v1903_v2  ;;  %v3542_v58 = vpop.eup %3541  ;;  %vm1925_vm4 = vweird.f32 %v3540_v17  ;;  %v1942_v47 = vmul.f32 %v3538_v13, %v1941_v50 }
 0x587   :  { %vm1926_vm6 = vmor %vm1924_vm5, %vm1925_vm4 }
 0x588   :  { %v1921_v60 = vsub.f32 1.0, %v1920_v5  ;;  %v1908_v49 = vsel %vm1907_vm2, %v3536_v61, %v1904_v35  ;;  %v1943_v20 = vadd.f32 %v3538_v13, %v1942_v47  ;;  %v1950_v5 = vand.u32 2147483648, %v1938_v14 }
 0x589   :  { %v1913_v42 = vsel %vm1910_vm3, %v1912_v39, %v1908_v49  ;;  %v6053_v39 = vld [vmem:[#allocation73_spill] sm:$0xff] }
 0x58a   :  { %v1922_v45 = vmul.f32 %v3540_v17, %v1921_v60  ;;  %v1955_v16 = vmul.f32 %v3542_v58, %v1913_v42  ;;  %v1948_v58 = vand.u32 2147483647, %v1938_v14  ;;  %v1947_v10 = vsel %vm1946_vm10, %v3538_v13, %v1943_v20  ;;  %v6054_v60 = vld [vmem:[#allocation65_spill] sm:$0xff] }
 0x58b   :  { %v1951_v35 = vor.u32 1.1754944e-38, %v1950_v5  ;;  %v1969_v49 = vadd.f32 %v6054_v60, %v6053_v39 }
 0x58c   :  { %v1923_v15 = vadd.f32 %v3540_v17, %v1922_v45  ;;  %vm1949_vm11 = vcmp.eq.f32.partialorder %v1948_v58, 8.507059e+37  ;;  %v6055_v58 = vld [vmem:[#allocation83_spill] sm:$0xff] }
 0x58e   :  { %v1927_v2 = vsel %vm1926_vm6, %v3540_v17, %v1923_v15  ;;  %v1952_v15 = vsel %vm1949_vm11, %v1951_v35, %v1947_v10 }
 0x58f   :  { %v1932_v4 = vsel %vm1929_vm7, %v1931_v53, %v1927_v2  ;;  %v6052_v53 = vld [vmem:[#allocation80_spill] sm:$0xff] }
 0x590   :  { %v1954_v48 = vmul.f32 %v1932_v4, %v5181_v62  ;;  %v5284_v62 = vld [vmem:[#allocation28 + $0x1e0] sm:$0xff] }
 0x591   :  { %v5296_v4 = vld [vmem:[#allocation28 + $0x1a0] sm:$0xff] }
 0x592   :  { %v5275_v61 = vadd.f32 %v1955_v16, %v1954_v48  ;;  %v5290_v16 = vld [vmem:[#allocation28 + $0x1c0] sm:$0xff] }
 0x594   :  { %3543 = vtanh.f32 %v5275_v61 }
 0x59a   :  { %v3544_v44 = vpop.eup %3543 }
 0x59b   :  { %v5278_v17 = vmul.f32 %v3544_v44, %v1952_v15 }
 0x59d   :  { %6036 = vst [vmem:[#allocation55_spill] sm:$0xff] %v5278_v17  ;;  %1988 = vmatmul.f32.vlgmr.msra.gmra.mxu0 %v5278_v17  ;;  %2008 = vmatmul.f32.vlgmr.msrb.gmra.mxu2 %v5278_v17 }
 0x59e   :  { %2028 = vmatmul.f32.vlgmr.msrb.gmra.mxu3 %v5278_v17  ;;  %2048 = vmatmul.f32.vlgmr.msra.gmra.mxu1 %v5278_v17  ;;  %v5528_v17 = vld [vmem:[#allocation28 + $0x30] sm:$0xff] }
 0x59f   :  { %2292 = vmatpush.msra.mxu0 %v5284_v62  ;;  %2312 = vmatpush.msrb.mxu2 %v5191_v55  ;;  %6067 = vst [vmem:[#allocation65_spill] sm:$0xff] %v5528_v17 }
 0x5a0   :  { %2332 = vmatpush.msrb.mxu3 %v4890_v1  ;;  %2352 = vmatpush.msra.mxu1 %v4888_v63  ;;  %v5302_v63 = vld [vmem:[#allocation28 + $0x180] sm:$0xff] }
 0x5a1   :  { %2293 = vmatpush.msra.mxu0 %v5290_v16  ;;  %2313 = vmatpush.msrb.mxu2 %v5197_v46  ;;  %v5308_v1 = vld [vmem:[#allocation28 + $0x160] sm:$0xff] }
 0x5a2   :  { %2333 = vmatpush.msrb.mxu3 %v4900_v21  ;;  %2353 = vmatpush.msra.mxu1 %v4898_v19  ;;  %v5314_v19 = vld [vmem:[#allocation28 + $0x140] sm:$0xff] }
 0x5a3   :  { %2294 = vmatpush.msra.mxu0 %v5296_v4  ;;  %2314 = vmatpush.msrb.mxu2 %v5203_v0  ;;  %v5320_v21 = vld [vmem:[#allocation28 + $0x120] sm:$0xff] }
 0x5a4   :  { %2334 = vmatpush.msrb.mxu3 %v4906_v8  ;;  %2354 = vmatpush.msra.mxu1 %v4904_v7  ;;  %v5326_v7 = vld [vmem:[#allocation28 + $0x100] sm:$0xff]  ;;  %v5329_v8 = vld [vmem:[#allocation28 + $0x108] sm:$0xff] }
 0x5a5   :  { %2295 = vmatpush.msra.mxu0 %v5302_v63  ;;  %2315 = vmatpush.msrb.mxu2 %v5209_v27 }
 0x5a6   :  { %2335 = vmatpush.msrb.mxu3 %v4914_v23  ;;  %2355 = vmatpush.msra.mxu1 %v4912_v40  ;;  %v5334_v40 = vld [vmem:[#allocation28 + $0xe0] sm:$0xff]  ;;  %v5337_v23 = vld [vmem:[#allocation28 + $0xe8] sm:$0xff] }
 0x5a7   :  { %2296 = vmatpush.msra.mxu0 %v5308_v1  ;;  %2316 = vmatpush.msrb.mxu2 %v5215_v31 }
 0x5a8   :  { %2336 = vmatpush.msrb.mxu3 %v4922_v12  ;;  %2356 = vmatpush.msra.mxu1 %v4920_v11  ;;  %v5342_v11 = vld [vmem:[#allocation28 + $0xc0] sm:$0xff]  ;;  %v5345_v12 = vld [vmem:[#allocation28 + $0xc8] sm:$0xff] }
 0x5a9   :  { %2297 = vmatpush.msra.mxu0 %v5314_v19  ;;  %2317 = vmatpush.msrb.mxu2 %v5221_v34 }
 0x5aa   :  { %2337 = vmatpush.msrb.mxu3 %v4934_v22  ;;  %2357 = vmatpush.msra.mxu1 %v4932_v25  ;;  %v5350_v25 = vld [vmem:[#allocation28 + $0xa0] sm:$0xff]  ;;  %v5353_v22 = vld [vmem:[#allocation28 + $0xa8] sm:$0xff] }
 0x5ab   :  { %2298 = vmatpush.msra.mxu0 %v5320_v21  ;;  %2318 = vmatpush.msrb.mxu2 %v5227_v38  ;;  %6037 = vst [vmem:[#allocation54_spill] sm:$0xff] %v5350_v25 }
 0x5ac   :  { %2338 = vmatpush.msrb.mxu3 %v4940_v26  ;;  %2358 = vmatpush.msra.mxu1 %v4938_v24  ;;  %6038 = vst [vmem:[#allocation50_spill] sm:$0xff] %v5353_v22  ;;  %v5358_v24 = vld [vmem:[#allocation28 + $0x80] sm:$0xff]  ;;  %v5361_v26 = vld [vmem:[#allocation28 + $0x88] sm:$0xff] }
 0x5ad   :  { %2299 = vmatpush.msra.mxu0 %v5326_v7  ;;  %2319 = vmatpush.msrb.mxu2 %v5329_v8  ;;  %6039 = vst [vmem:[#allocation46_spill] sm:$0xff] %v5358_v24 }
 0x5ae   :  { %2339 = vmatpush.msrb.mxu3 %v4948_v29  ;;  %2359 = vmatpush.msra.mxu1 %v4946_v43  ;;  %6040 = vst [vmem:[#allocation57_spill] sm:$0xff] %v5361_v26  ;;  %v5366_v43 = vld [vmem:[#allocation28 + $0x60] sm:$0xff]  ;;  %v5369_v29 = vld [vmem:[#allocation28 + $0x68] sm:$0xff] }
 0x5af   :  { %2300 = vmatpush.msra.mxu0 %v5334_v40  ;;  %2320 = vmatpush.msrb.mxu2 %v5337_v23  ;;  %6041 = vst [vmem:[#allocation56_spill] sm:$0xff] %v5366_v43 }
 0x5b0   :  { %2340 = vmatpush.msrb.mxu3 %v4956_v32  ;;  %2360 = vmatpush.msra.mxu1 %v4954_v30  ;;  %6042 = vst [vmem:[#allocation51_spill] sm:$0xff] %v5369_v29  ;;  %v5374_v30 = vld [vmem:[#allocation28 + $0x40] sm:$0xff]  ;;  %v5377_v32 = vld [vmem:[#allocation28 + $0x48] sm:$0xff] }
 0x5b1   :  { %2301 = vmatpush.msra.mxu0 %v5342_v11  ;;  %2321 = vmatpush.msrb.mxu2 %v5345_v12  ;;  %6043 = vst [vmem:[#allocation47_spill] sm:$0xff] %v5374_v30 }
 0x5b2   :  { %2341 = vmatpush.msrb.mxu3 %v4968_v36  ;;  %2361 = vmatpush.msra.mxu1 %v4966_v33  ;;  %6044 = vst [vmem:[#allocation59_spill] sm:$0xff] %v5377_v32  ;;  %v5382_v33 = vld [vmem:[#allocation28 + $0x20] sm:$0xff]  ;;  %v5385_v36 = vld [vmem:[#allocation28 + $0x28] sm:$0xff] }
 0x5b3   :  { %2302 = vmatpush.msra.mxu0 %v5350_v25  ;;  %2322 = vmatpush.msrb.mxu2 %v5353_v22  ;;  %6045 = vst [vmem:[#allocation58_spill] sm:$0xff] %v5382_v33 }
 0x5b4   :  { %2342 = vmatpush.msrb.mxu3 %v4974_v41  ;;  %2362 = vmatpush.msra.mxu1 %v4972_v37  ;;  %6046 = vst [vmem:[#allocation52_spill] sm:$0xff] %v5385_v36  ;;  %v5390_v37 = vld [vmem:[#allocation28] sm:$0xff]  ;;  %v5393_v41 = vld [vmem:[#allocation28 + $0x8] sm:$0xff] }
 0x5b5   :  { %2303 = vmatpush.msra.mxu0 %v5358_v24  ;;  %2323 = vmatpush.msrb.mxu2 %v5361_v26  ;;  %6047 = vst [vmem:[#allocation48_spill] sm:$0xff] %v5390_v37 }
 0x5b6   :  { %2343 = vmatpush.msrb.mxu3 %v6012_v28  ;;  %2363 = vmatpush.msra.mxu1 %v6013_v6  ;;  %6048 = vst [vmem:[#allocation61_spill] sm:$0xff] %v5393_v41  ;;  %v6049_v28 = vld [vmem:[#allocation62_spill] sm:$0xff] }
 0x5b7   :  { %2304 = vmatpush.msra.mxu0 %v5366_v43  ;;  %2324 = vmatpush.msrb.mxu2 %v5369_v29  ;;  %v6050_v6 = vld [vmem:[#allocation82_spill] sm:$0xff] }
 0x5b8   :  { %2344 = vmatpush.msrb.mxu3 %v6016_v52  ;;  %2364 = vmatpush.msra.mxu1 %v6017_v57  ;;  %v6051_v52 = vld [vmem:[#allocation70_spill] sm:$0xff] }
 0x5b9   :  { %2305 = vmatpush.msra.mxu0 %v5374_v30  ;;  %2325 = vmatpush.msrb.mxu2 %v5377_v32  ;;  %v1968_v57 = vadd.f32 %v6051_v52, %v6050_v6 }
 0x5ba   :  { %2345 = vmatpush.msrb.mxu3 %v6020_v3  ;;  %2365 = vmatpush.msra.mxu1 %v6021_v9 }
 0x5bb   :  { %2306 = vmatpush.msra.mxu0 %v5382_v33  ;;  %2326 = vmatpush.msrb.mxu2 %v5385_v36 }
 0x5bc   :  { %2346 = vmatpush.msrb.mxu3 %v6024_v51  ;;  %2366 = vmatpush.msra.mxu1 %v6025_v59 }
 0x5bd   :  { %2307 = vmatpush.msra.mxu0 %v5390_v37  ;;  %2327 = vmatpush.msrb.mxu2 %v5393_v41 }
 0x5be   :  { %2347 = vmatpush.msrb.mxu3 %v6028_v54  ;;  %2367 = vmatpush.msra.mxu1 %v6049_v28 }
 0x61a   :  { %v1989_v3 = vpop.f32.mrf.mxu0 }
 0x61b   :  { %v2052_v9 = vadd.f32 %v1989_v3, %v1968_v57  ;;  %v2049_v51 = vpop.f32.mrf.mxu1 }
 0x61c   :  { %v2055_v59 = vadd.f32 %v2049_v51, %v6052_v53 }
 0x61d   :  { %v3428_v14 = vmul.f32 -1.442695, %v2052_v9 }
 0x61e   :  { %v3430_v13 = vmul.f32 -1.442695, %v2055_v59 }
 0x61f   :  { %3545 = vpow2.f32 %v3428_v14 }
 0x620   :  { %3547 = vpow2.f32 %v3430_v13  ;;  %v2009_v56 = vpop.f32.mrf.mxu2 }
 0x621   :  { %v2053_v42 = vadd.f32 %v2009_v56, %v1969_v49  ;;  %v2029_v48 = vpop.f32.mrf.mxu3 }
 0x622   :  { %v2054_v10 = vadd.f32 %v2029_v48, %v6055_v58 }
 0x623   :  { %v3429_v54 = vmul.f32 -1.442695, %v2053_v42 }
 0x625   :  { %v3546_v45 = vpop.eup %3545  ;;  %3549 = vpow2.f32 %v3429_v54 }
 0x626   :  { %v3548_v18 = vpop.eup %3547  ;;  %v2059_v50 = vadd.f32 1.0, %v3546_v45 }
 0x627   :  { %v2098_v2 = vadd.f32 1.0, %v3548_v18 }
 0x628   :  { %3551 = vrcp.f32 %v2059_v50  ;;  %v2071_v15 = vand.u32 2147483648, %v2059_v50  ;;  %v2069_v57 = vand.u32 2147483647, %v2059_v50  ;;  %vm2065_vm13 = vweird.f32 %v2059_v50 }
 0x629   :  { %3553 = vrcp.f32 %v2098_v2  ;;  %vm2104_vm5 = vweird.f32 %v2098_v2 }
 0x62a   :  { %v2072_v59 = vor.u32 1.1754944e-38, %v2071_v15  ;;  %vm2070_vm15 = vcmp.eq.f32.partialorder %v2069_v57, 8.507059e+37  ;;  %v2110_v15 = vand.u32 2147483648, %v2098_v2 }
 0x62b   :  { %v3550_v47 = vpop.eup %3549 }
 0x62c   :  { %v2078_v20 = vadd.f32 1.0, %v3550_v47  ;;  %v2111_v57 = vor.u32 1.1754944e-38, %v2110_v15  ;;  %v5499_v15 = vld [vmem:[#allocation28 + $0xb8] sm:$0xff] }
 0x62d   :  { %6060 = vst [vmem:[#allocation68_spill] sm:$0xff] %v5499_v15 }
 0x62e   :  { %v3552_v5 = vpop.eup %3551  ;;  %3555 = vrcp.f32 %v2078_v20  ;;  %v2090_v49 = vand.u32 2147483648, %v2078_v20  ;;  %v2088_v54 = vand.u32 2147483647, %v2078_v20  ;;  %vm2084_vm1 = vweird.f32 %v2078_v20 }
 0x62f   :  { %v2061_v35 = vmul.f32 %v3552_v5, %v2059_v50  ;;  %3557 = vtanh.f32 %v2054_v10  ;;  %v3554_v28 = vpop.eup %3553  ;;  %vm2066_vm12 = vweird.f32 %v3552_v5 }
 0x630   :  { %v2100_v53 = vmul.f32 %v3554_v28, %v2098_v2  ;;  %vm2067_vm14 = vmor %vm2065_vm13, %vm2066_vm12  ;;  %v2091_v48 = vor.u32 1.1754944e-38, %v2090_v49  ;;  %vm2089_vm3 = vcmp.eq.f32.partialorder %v2088_v54, 8.507059e+37  ;;  %vm2105_vm4 = vweird.f32 %v3554_v28  ;;  %v5448_v49 = vld [vmem:[#allocation28 + $0x170] sm:$0xff]  ;;  %v5459_v54 = vld [vmem:[#allocation28 + $0x158] sm:$0xff] }
 0x631   :  { %v2062_v44 = vsub.f32 1.0, %v2061_v35  ;;  %vm2106_vm6 = vmor %vm2104_vm5, %vm2105_vm4 }
 0x632   :  { %v2101_v18 = vsub.f32 1.0, %v2100_v53  ;;  %v5427_v53 = vld [vmem:[#allocation28 + $0x1d8] sm:$0xff] }
 0x633   :  { %v2063_v52 = vmul.f32 %v3552_v5, %v2062_v44 }
 0x634   :  { %v3556_v3 = vpop.eup %3555  ;;  %v2102_v50 = vmul.f32 %v3554_v28, %v2101_v18  ;;  %v5467_v18 = vld [vmem:[#allocation28 + $0x138] sm:$0xff] }
 0x635   :  { %v2080_v9 = vmul.f32 %v3556_v3, %v2078_v20  ;;  %v2064_v51 = vadd.f32 %v3552_v5, %v2063_v52  ;;  %v3558_v60 = vpop.eup %3557  ;;  %vm2085_vm0 = vweird.f32 %v3556_v3  ;;  %v2108_v52 = vand.u32 2147483647, %v2098_v2  ;;  %v5419_v2 = vld [vmem:[#allocation28 + $0x1f8] sm:$0xff] }
 0x636   :  { %vm2086_vm2 = vmor %vm2084_vm1, %vm2085_vm0  ;;  %v2103_v44 = vadd.f32 %v3554_v28, %v2102_v50  ;;  %v5483_v50 = vld [vmem:[#allocation28 + $0xf8] sm:$0xff] }
 0x637   :  { %v2081_v14 = vsub.f32 1.0, %v2080_v9  ;;  %v2068_v13 = vsel %vm2067_vm14, %v3552_v5, %v2064_v51  ;;  %vm2109_vm7 = vcmp.eq.f32.partialorder %v2108_v52, 8.507059e+37  ;;  %v5504_v52 = vld [vmem:[#allocation28 + $0x90] sm:$0xff] }
 0x638   :  { %v2073_v56 = vsel %vm2070_vm15, %v2072_v59, %v2068_v13  ;;  %v2107_v20 = vsel %vm2106_vm6, %v3554_v28, %v2103_v44  ;;  %v5424_v28 = vld [vmem:[#allocation28 + $0x1d0] sm:$0xff]  ;;  %6061 = vst [vmem:[#allocation77_spill] sm:$0xff] %v5504_v52 }
 0x639   :  { %v2082_v42 = vmul.f32 %v3556_v3, %v2081_v14  ;;  %v2115_v45 = vmul.f32 %v3558_v60, %v2073_v56  ;;  %v5432_v59 = vld [vmem:[#allocation28 + $0x1b0] sm:$0xff]  ;;  %v5435_v14 = vld [vmem:[#allocation28 + $0x1b8] sm:$0xff] }
 0x63a   :  { %v5440_v13 = vld [vmem:[#allocation28 + $0x190] sm:$0xff]  ;;  %v5443_v60 = vld [vmem:[#allocation28 + $0x198] sm:$0xff] }
 0x63b   :  { %v2083_v47 = vadd.f32 %v3556_v3, %v2082_v42  ;;  %v5451_v56 = vld [vmem:[#allocation28 + $0x178] sm:$0xff]  ;;  %v5456_v42 = vld [vmem:[#allocation28 + $0x150] sm:$0xff] }
 0x63c   :  { %v5496_v44 = vld [vmem:[#allocation28 + $0xb0] sm:$0xff] }
 0x63d   :  { %v2087_v58 = vsel %vm2086_vm2, %v3556_v3, %v2083_v47  ;;  %v2112_v3 = vsel %vm2109_vm7, %v2111_v57, %v2107_v20  ;;  %v5472_v47 = vld [vmem:[#allocation28 + $0x110] sm:$0xff]  ;;  %6059 = vst [vmem:[#allocation63_spill] sm:$0xff] %v5496_v44  ;;  %v5507_v20 = vld [vmem:[#allocation28 + $0x98] sm:$0xff] }
 0x63e   :  { %v2092_v10 = vsel %vm2089_vm3, %v2091_v48, %v2087_v58  ;;  %v5475_v48 = vld [vmem:[#allocation28 + $0x118] sm:$0xff]  ;;  %v5480_v58 = vld [vmem:[#allocation28 + $0xf0] sm:$0xff]  ;;  %6062 = vst [vmem:[#allocation64_spill] sm:$0xff] %v5507_v20 }
 0x63f   :  { %v2114_v35 = vmul.f32 %v2092_v10, %v5275_v61  ;;  %v5416_v61 = vld [vmem:[#allocation28 + $0x1f0] sm:$0xff] }
 0x640   :  { %v5488_v10 = vld [vmem:[#allocation28 + $0xd0] sm:$0xff] }
 0x641   :  { %v5405_v5 = vadd.f32 %v2115_v45, %v2114_v35  ;;  %v5464_v45 = vld [vmem:[#allocation28 + $0x130] sm:$0xff]  ;;  %6057 = vst [vmem:[#allocation53_spill] sm:$0xff] %v5488_v10  ;;  %v5491_v35 = vld [vmem:[#allocation28 + $0xd8] sm:$0xff] }
 0x642   :  { %6058 = vst [vmem:[#allocation49_spill] sm:$0xff] %v5491_v35  ;;  %v5512_v57 = vld [vmem:[#allocation28 + $0x70] sm:$0xff] }
 0x643   :  { %3559 = vtanh.f32 %v5405_v5  ;;  %6063 = vst [vmem:[#allocation79_spill] sm:$0xff] %v5512_v57 }
 0x649   :  { %v3560_v9 = vpop.eup %3559 }
 0x64a   :  { %v5408_v51 = vmul.f32 %v3560_v9, %v2112_v3  ;;  %v5515_v9 = vld [vmem:[#allocation28 + $0x78] sm:$0xff]  ;;  %v5520_v3 = vld [vmem:[#allocation28 + $0x50] sm:$0xff] }
 0x64b   :  { %6064 = vst [vmem:[#allocation62_spill] sm:$0xff] %v5515_v9 }
 0x64c   :  { %6056 = vst [vmem:[#allocation60_spill] sm:$0xff] %v5408_v51  ;;  %2148 = vmatmul.f32.vlgmr.msrb.gmra.mxu0 %v5408_v51  ;;  %2168 = vmatmul.f32.vlgmr.msra.gmra.mxu2 %v5408_v51 }
 0x64d   :  { %2188 = vmatmul.f32.vlgmr.msra.gmra.mxu3 %v5408_v51  ;;  %2208 = vmatmul.f32.vlgmr.msrb.gmra.mxu1 %v5408_v51  ;;  %6065 = vst [vmem:[#allocation70_spill] sm:$0xff] %v5520_v3  ;;  %v5523_v51 = vld [vmem:[#allocation28 + $0x58] sm:$0xff] }
 0x64e   :  { %2452 = vmatpush.msrb.mxu0 %v5284_v62  ;;  %2472 = vmatpush.msra.mxu2 %v5191_v55  ;;  %6066 = vst [vmem:[#allocation80_spill] sm:$0xff] %v5523_v51 }
 0x64f   :  { %2492 = vmatpush.msra.mxu3 %v5416_v61  ;;  %2512 = vmatpush.msrb.mxu1 %v5419_v2 }
 0x650   :  { %2453 = vmatpush.msrb.mxu0 %v5290_v16  ;;  %2473 = vmatpush.msra.mxu2 %v5197_v46 }
 0x651   :  { %2493 = vmatpush.msra.mxu3 %v5424_v28  ;;  %2513 = vmatpush.msrb.mxu1 %v5427_v53 }
 0x652   :  { %2454 = vmatpush.msrb.mxu0 %v5296_v4  ;;  %2474 = vmatpush.msra.mxu2 %v5203_v0 }
 0x653   :  { %2494 = vmatpush.msra.mxu3 %v5432_v59  ;;  %2514 = vmatpush.msrb.mxu1 %v5435_v14 }
 0x654   :  { %2455 = vmatpush.msrb.mxu0 %v5302_v63  ;;  %2475 = vmatpush.msra.mxu2 %v5209_v27 }
 0x655   :  { %2495 = vmatpush.msra.mxu3 %v5440_v13  ;;  %2515 = vmatpush.msrb.mxu1 %v5443_v60 }
 0x656   :  { %2456 = vmatpush.msrb.mxu0 %v5308_v1  ;;  %2476 = vmatpush.msra.mxu2 %v5215_v31 }
 0x657   :  { %2496 = vmatpush.msra.mxu3 %v5448_v49  ;;  %2516 = vmatpush.msrb.mxu1 %v5451_v56 }
 0x658   :  { %2457 = vmatpush.msrb.mxu0 %v5314_v19  ;;  %2477 = vmatpush.msra.mxu2 %v5221_v34 }
 0x659   :  { %2497 = vmatpush.msra.mxu3 %v5456_v42  ;;  %2517 = vmatpush.msrb.mxu1 %v5459_v54 }
 0x65a   :  { %2458 = vmatpush.msrb.mxu0 %v5320_v21  ;;  %2478 = vmatpush.msra.mxu2 %v5227_v38 }
 0x65b   :  { %2498 = vmatpush.msra.mxu3 %v5464_v45  ;;  %2518 = vmatpush.msrb.mxu1 %v5467_v18 }
 0x65c   :  { %2459 = vmatpush.msrb.mxu0 %v5326_v7  ;;  %2479 = vmatpush.msra.mxu2 %v5329_v8 }
 0x65d   :  { %2499 = vmatpush.msra.mxu3 %v5472_v47  ;;  %2519 = vmatpush.msrb.mxu1 %v5475_v48 }
 0x65e   :  { %2460 = vmatpush.msrb.mxu0 %v5334_v40  ;;  %2480 = vmatpush.msra.mxu2 %v5337_v23 }
 0x65f   :  { %2500 = vmatpush.msra.mxu3 %v5480_v58  ;;  %2520 = vmatpush.msrb.mxu1 %v5483_v50 }
 0x660   :  { %2461 = vmatpush.msrb.mxu0 %v5342_v11  ;;  %2481 = vmatpush.msra.mxu2 %v5345_v12 }
 0x661   :  { %2501 = vmatpush.msra.mxu3 %v5488_v10  ;;  %2521 = vmatpush.msrb.mxu1 %v5491_v35 }
 0x662   :  { %2462 = vmatpush.msrb.mxu0 %v5350_v25  ;;  %2482 = vmatpush.msra.mxu2 %v5353_v22 }
 0x663   :  { %2502 = vmatpush.msra.mxu3 %v5496_v44  ;;  %2522 = vmatpush.msrb.mxu1 %v5499_v15 }
 0x664   :  { %2463 = vmatpush.msrb.mxu0 %v5358_v24  ;;  %2483 = vmatpush.msra.mxu2 %v5361_v26 }
 0x665   :  { %2503 = vmatpush.msra.mxu3 %v5504_v52  ;;  %2523 = vmatpush.msrb.mxu1 %v5507_v20 }
 0x666   :  { %2464 = vmatpush.msrb.mxu0 %v5366_v43  ;;  %2484 = vmatpush.msra.mxu2 %v5369_v29 }
 0x667   :  { %2504 = vmatpush.msra.mxu3 %v5512_v57  ;;  %2524 = vmatpush.msrb.mxu1 %v5515_v9  ;;  %v5531_v9 = vld [vmem:[#allocation28 + $0x38] sm:$0xff]  ;;  %v6072_v57 = vld [vmem:[#allocation84_spill] sm:$0xff] }
 0x668   :  { %2465 = vmatpush.msrb.mxu0 %v5374_v30  ;;  %2485 = vmatpush.msra.mxu2 %v5377_v32  ;;  %6068 = vst [vmem:[#allocation83_spill] sm:$0xff] %v5531_v9 }
 0x669   :  { %2505 = vmatpush.msra.mxu3 %v5520_v3  ;;  %2525 = vmatpush.msrb.mxu1 %v5523_v51  ;;  %v5536_v3 = vld [vmem:[#allocation28 + $0x10] sm:$0xff]  ;;  %v5539_v51 = vld [vmem:[#allocation28 + $0x18] sm:$0xff] }
 0x66a   :  { %2466 = vmatpush.msrb.mxu0 %v5382_v33  ;;  %2486 = vmatpush.msra.mxu2 %v5385_v36  ;;  %6069 = vst [vmem:[#allocation95_spill] sm:$0xff] %v5536_v3  ;;  %v6071_v36 = vld [vmem:[#allocation72_spill] sm:$0xff] }
 0x66b   :  { %2506 = vmatpush.msra.mxu3 %v5528_v17  ;;  %2526 = vmatpush.msrb.mxu1 %v5531_v9  ;;  %6070 = vst [vmem:[#allocation96_spill] sm:$0xff] %v5539_v51  ;;  %v2128_v33 = vadd.f32 %v6071_v36, %v6050_v6 }
 0x66c   :  { %2467 = vmatpush.msrb.mxu0 %v5390_v37  ;;  %2487 = vmatpush.msra.mxu2 %v5393_v41  ;;  %v6073_v41 = vld [vmem:[#allocation66_spill] sm:$0xff] }
 0x66d   :  { %2507 = vmatpush.msra.mxu3 %v5536_v3  ;;  %2527 = vmatpush.msrb.mxu1 %v5539_v51  ;;  %v2129_v43 = vadd.f32 %v6073_v41, %v6053_v39 }
 0x6c9   :  { %v2149_v17 = vpop.f32.mrf.mxu0 }
 0x6ca   :  { %v2212_v32 = vadd.f32 %v2149_v17, %v2128_v33  ;;  %v2209_v30 = vpop.f32.mrf.mxu1 }
 0x6cb   :  { %v2215_v9 = vadd.f32 %v2209_v30, %v6072_v57 }
 0x6cc   :  { %v3431_v29 = vmul.f32 -1.442695, %v2212_v32 }
 0x6cd   :  { %v3433_v37 = vmul.f32 -1.442695, %v2215_v9 }
 0x6ce   :  { %3561 = vpow2.f32 %v3431_v29  ;;  %v6074_v29 = vld [vmem:[#allocation85_spill] sm:$0xff] }
 0x6cf   :  { %3563 = vpow2.f32 %v3433_v37  ;;  %v2169_v3 = vpop.f32.mrf.mxu2 }
 0x6d0   :  { %v2213_v20 = vadd.f32 %v2169_v3, %v2129_v43  ;;  %v2189_v33 = vpop.f32.mrf.mxu3 }
 0x6d1   :  { %v2214_v32 = vadd.f32 %v2189_v33, %v6074_v29 }
 0x6d2   :  { %v3432_v52 = vmul.f32 -1.442695, %v2213_v20 }
 0x6d4   :  { %v3562_v26 = vpop.eup %3561  ;;  %3565 = vpow2.f32 %v3432_v52 }
 0x6d5   :  { %v3564_v51 = vpop.eup %3563  ;;  %v2219_v24 = vadd.f32 1.0, %v3562_v26 }
 0x6d6   :  { %v2258_v36 = vadd.f32 1.0, %v3564_v51 }
 0x6d7   :  { %3567 = vrcp.f32 %v2219_v24  ;;  %v2231_v37 = vand.u32 2147483648, %v2219_v24  ;;  %v2229_v52 = vand.u32 2147483647, %v2219_v24  ;;  %vm2225_vm9 = vweird.f32 %v2219_v24 }
 0x6d8   :  { %3569 = vrcp.f32 %v2258_v36  ;;  %vm2264_vm1 = vweird.f32 %v2258_v36 }
 0x6d9   :  { %vm2230_vm11 = vcmp.eq.f32.partialorder %v2229_v52, 8.507059e+37 }
 0x6da   :  { %v3566_v17 = vpop.eup %3565 }
 0x6db   :  { %v2238_v6 = vadd.f32 1.0, %v3566_v17  ;;  %v2232_v17 = vor.u32 1.1754944e-38, %v2231_v37 }
 0x6dd   :  { %v3568_v30 = vpop.eup %3567  ;;  %3571 = vrcp.f32 %v2238_v6  ;;  %v2250_v33 = vand.u32 2147483648, %v2238_v6  ;;  %vm2244_vm13 = vweird.f32 %v2238_v6 }
 0x6de   :  { %v2221_v57 = vmul.f32 %v3568_v30, %v2219_v24  ;;  %3573 = vtanh.f32 %v2214_v32  ;;  %v3570_v43 = vpop.eup %3569  ;;  %vm2226_vm8 = vweird.f32 %v3568_v30  ;;  %v2248_v32 = vand.u32 2147483647, %v2238_v6 }
 0x6df   :  { %v2260_v51 = vmul.f32 %v3570_v43, %v2258_v36  ;;  %vm2227_vm10 = vmor %vm2225_vm9, %vm2226_vm8  ;;  %v2251_v35 = vor.u32 1.1754944e-38, %v2250_v33  ;;  %vm2265_vm0 = vweird.f32 %v3570_v43  ;;  %v6092_v33 = vld [vmem:[#allocation70_spill] sm:$0xff] }
 0x6e0   :  { %v2222_v41 = vsub.f32 1.0, %v2221_v57  ;;  %vm2249_vm15 = vcmp.eq.f32.partialorder %v2248_v32, 8.507059e+37  ;;  %vm2266_vm2 = vmor %vm2264_vm1, %vm2265_vm0  ;;  %v6095_v32 = vld [vmem:[#allocation52_spill] sm:$0xff] }
 0x6e2   :  { %v2223_v20 = vmul.f32 %v3568_v30, %v2222_v41  ;;  %v2261_v41 = vsub.f32 1.0, %v2260_v51  ;;  %v6090_v51 = vld [vmem:[#allocation47_spill] sm:$0xff] }
 0x6e3   :  { %v3572_v9 = vpop.eup %3571 }
 0x6e4   :  { %v2240_v26 = vmul.f32 %v3572_v9, %v2238_v6  ;;  %v2224_v3 = vadd.f32 %v3568_v30, %v2223_v20  ;;  %v3574_v44 = vpop.eup %3573  ;;  %vm2245_vm12 = vweird.f32 %v3572_v9  ;;  %v2262_v24 = vmul.f32 %v3570_v43, %v2261_v41  ;;  %v6096_v41 = vld [vmem:[#allocation65_spill] sm:$0xff] }
 0x6e5   :  { %vm2246_vm14 = vmor %vm2244_vm13, %vm2245_vm12 }
 0x6e6   :  { %v2241_v39 = vsub.f32 1.0, %v2240_v26  ;;  %v2228_v15 = vsel %vm2227_vm10, %v3568_v30, %v2224_v3  ;;  %v2263_v52 = vadd.f32 %v3570_v43, %v2262_v24  ;;  %v6089_v3 = vld [vmem:[#allocation62_spill] sm:$0xff]  ;;  %v6098_v24 = vld [vmem:[#allocation48_spill] sm:$0xff] }
 0x6e7   :  { %v2233_v29 = vsel %vm2230_vm11, %v2232_v17, %v2228_v15  ;;  %v2270_v15 = vand.u32 2147483648, %v2258_v36  ;;  %v6091_v17 = vld [vmem:[#allocation59_spill] sm:$0xff] }
 0x6e8   :  { %v2242_v57 = vmul.f32 %v3572_v9, %v2241_v39  ;;  %v2275_v22 = vmul.f32 %v3574_v44, %v2233_v29  ;;  %v2268_v39 = vand.u32 2147483647, %v2258_v36  ;;  %v2267_v6 = vsel %vm2266_vm2, %v3570_v43, %v2263_v52  ;;  %v6087_v36 = vld [vmem:[#allocation51_spill] sm:$0xff]  ;;  %v6093_v29 = vld [vmem:[#allocation80_spill] sm:$0xff] }
 0x6e9   :  { %v2271_v44 = vor.u32 1.1754944e-38, %v2270_v15  ;;  %v6088_v43 = vld [vmem:[#allocation79_spill] sm:$0xff]  ;;  %v6101_v15 = vld [vmem:[#allocation96_spill] sm:$0xff] }
 0x6ea   :  { %v2243_v25 = vadd.f32 %v3572_v9, %v2242_v57  ;;  %vm2269_vm3 = vcmp.eq.f32.partialorder %v2268_v39, 8.507059e+37  ;;  %v6094_v57 = vld [vmem:[#allocation58_spill] sm:$0xff]  ;;  %v6100_v52 = vld [vmem:[#allocation95_spill] sm:$0xff] }
 0x6eb   :  { %v6102_v39 = vld [vmem:[#allocation82_spill] sm:$0xff] }
 0x6ec   :  { %v2247_v20 = vsel %vm2246_vm14, %v3572_v9, %v2243_v25  ;;  %v2272_v25 = vsel %vm2269_vm3, %v2271_v44, %v2267_v6  ;;  %v6103_v6 = vld [vmem:[#allocation75_spill] sm:$0xff] }
 0x6ed   :  { %v2252_v10 = vsel %vm2249_vm15, %v2251_v35, %v2247_v20  ;;  %v6086_v35 = vld [vmem:[#allocation56_spill] sm:$0xff]  ;;  %v6097_v20 = vld [vmem:[#allocation83_spill] sm:$0xff]  ;;  %v2288_v44 = vadd.f32 %v6103_v6, %v6102_v39 }
 0x6ee   :  { %v2274_v37 = vmul.f32 %v2252_v10, %v5405_v5  ;;  %v6084_v5 = vld [vmem:[#allocation77_spill] sm:$0xff]  ;;  %v6085_v10 = vld [vmem:[#allocation64_spill] sm:$0xff] }
 0x6f0   :  { %v5549_v30 = vadd.f32 %v2275_v22, %v2274_v37  ;;  %v6083_v22 = vld [vmem:[#allocation57_spill] sm:$0xff] }
 0x6f1   :  { %v6099_v37 = vld [vmem:[#allocation61_spill] sm:$0xff] }
 0x6f2   :  { %3575 = vtanh.f32 %v5549_v30 }
 0x6f8   :  { %v3576_v26 = vpop.eup %3575 }
 0x6f9   :  { %v5552_v9 = vmul.f32 %v3576_v26, %v2272_v25 }
 0x6fb   :  { %6075 = vst [vmem:[#allocation72_spill] sm:$0xff] %v5552_v9  ;;  %2308 = vmatmul.f32.vlgmr.msra.gmra.mxu0 %v5552_v9  ;;  %2328 = vmatmul.f32.vlgmr.msrb.gmra.mxu2 %v5552_v9 }
 0x6fc   :  { %2348 = vmatmul.f32.vlgmr.msrb.gmra.mxu3 %v5552_v9  ;;  %2368 = vmatmul.f32.vlgmr.msra.gmra.mxu1 %v5552_v9 }
 0x6fd   :  { %2612 = vmatpush.msra.mxu0 %v5284_v62  ;;  %2632 = vmatpush.msrb.mxu2 %v5191_v55  ;;  %v6076_v55 = vld [vmem:[#allocation53_spill] sm:$0xff] }
 0x6fe   :  { %2652 = vmatpush.msrb.mxu3 %v5416_v61  ;;  %2672 = vmatpush.msra.mxu1 %v5419_v2 }
 0x6ff   :  { %2613 = vmatpush.msra.mxu0 %v5290_v16  ;;  %2633 = vmatpush.msrb.mxu2 %v5197_v46  ;;  %v6077_v46 = vld [vmem:[#allocation49_spill] sm:$0xff] }
 0x700   :  { %2653 = vmatpush.msrb.mxu3 %v5424_v28  ;;  %2673 = vmatpush.msra.mxu1 %v5427_v53 }
 0x701   :  { %2614 = vmatpush.msra.mxu0 %v5296_v4  ;;  %2634 = vmatpush.msrb.mxu2 %v5203_v0  ;;  %v6078_v0 = vld [vmem:[#allocation54_spill] sm:$0xff] }
 0x702   :  { %2654 = vmatpush.msrb.mxu3 %v5432_v59  ;;  %2674 = vmatpush.msra.mxu1 %v5435_v14 }
 0x703   :  { %2615 = vmatpush.msra.mxu0 %v5302_v63  ;;  %2635 = vmatpush.msrb.mxu2 %v5209_v27  ;;  %v6079_v27 = vld [vmem:[#allocation50_spill] sm:$0xff] }
 0x704   :  { %2655 = vmatpush.msrb.mxu3 %v5440_v13  ;;  %2675 = vmatpush.msra.mxu1 %v5443_v60 }
 0x705   :  { %2616 = vmatpush.msra.mxu0 %v5308_v1  ;;  %2636 = vmatpush.msrb.mxu2 %v5215_v31  ;;  %v6080_v31 = vld [vmem:[#allocation63_spill] sm:$0xff] }
 0x706   :  { %2656 = vmatpush.msrb.mxu3 %v5448_v49  ;;  %2676 = vmatpush.msra.mxu1 %v5451_v56 }
 0x707   :  { %2617 = vmatpush.msra.mxu0 %v5314_v19  ;;  %2637 = vmatpush.msrb.mxu2 %v5221_v34  ;;  %v6081_v34 = vld [vmem:[#allocation68_spill] sm:$0xff] }
 0x708   :  { %2657 = vmatpush.msrb.mxu3 %v5456_v42  ;;  %2677 = vmatpush.msra.mxu1 %v5459_v54 }
 0x709   :  { %2618 = vmatpush.msra.mxu0 %v5320_v21  ;;  %2638 = vmatpush.msrb.mxu2 %v5227_v38  ;;  %v6082_v38 = vld [vmem:[#allocation46_spill] sm:$0xff] }
 0x70a   :  { %2658 = vmatpush.msrb.mxu3 %v5464_v45  ;;  %2678 = vmatpush.msra.mxu1 %v5467_v18 }
 0x70b   :  { %2619 = vmatpush.msra.mxu0 %v5326_v7  ;;  %2639 = vmatpush.msrb.mxu2 %v5329_v8 }
 0x70c   :  { %2659 = vmatpush.msrb.mxu3 %v5472_v47  ;;  %2679 = vmatpush.msra.mxu1 %v5475_v48 }
 0x70d   :  { %2620 = vmatpush.msra.mxu0 %v5334_v40  ;;  %2640 = vmatpush.msrb.mxu2 %v5337_v23 }
 0x70e   :  { %2660 = vmatpush.msrb.mxu3 %v5480_v58  ;;  %2680 = vmatpush.msra.mxu1 %v5483_v50 }
 0x70f   :  { %2621 = vmatpush.msra.mxu0 %v5342_v11  ;;  %2641 = vmatpush.msrb.mxu2 %v5345_v12 }
 0x710   :  { %2661 = vmatpush.msrb.mxu3 %v6076_v55  ;;  %2681 = vmatpush.msra.mxu1 %v6077_v46 }
 0x711   :  { %2622 = vmatpush.msra.mxu0 %v6078_v0  ;;  %2642 = vmatpush.msrb.mxu2 %v6079_v27 }
 0x712   :  { %2662 = vmatpush.msrb.mxu3 %v6080_v31  ;;  %2682 = vmatpush.msra.mxu1 %v6081_v34 }
 0x713   :  { %2623 = vmatpush.msra.mxu0 %v6082_v38  ;;  %2643 = vmatpush.msrb.mxu2 %v6083_v22 }
 0x714   :  { %2663 = vmatpush.msrb.mxu3 %v6084_v5  ;;  %2683 = vmatpush.msra.mxu1 %v6085_v10 }
 0x715   :  { %2624 = vmatpush.msra.mxu0 %v6086_v35  ;;  %2644 = vmatpush.msrb.mxu2 %v6087_v36 }
 0x716   :  { %2664 = vmatpush.msrb.mxu3 %v6088_v43  ;;  %2684 = vmatpush.msra.mxu1 %v6089_v3 }
 0x717   :  { %2625 = vmatpush.msra.mxu0 %v6090_v51  ;;  %2645 = vmatpush.msrb.mxu2 %v6091_v17 }
 0x718   :  { %2665 = vmatpush.msrb.mxu3 %v6092_v33  ;;  %2685 = vmatpush.msra.mxu1 %v6093_v29  ;;  %v6106_v33 = vld [vmem:[#allocation67_spill] sm:$0xff] }
 0x719   :  { %2626 = vmatpush.msra.mxu0 %v6094_v57  ;;  %2646 = vmatpush.msrb.mxu2 %v6095_v32  ;;  %v6104_v57 = vld [vmem:[#allocation86_spill] sm:$0xff] }
 0x71a   :  { %2666 = vmatpush.msrb.mxu3 %v6096_v41  ;;  %2686 = vmatpush.msra.mxu1 %v6097_v20  ;;  %v6105_v20 = vld [vmem:[#allocation73_spill] sm:$0xff] }
 0x71b   :  { %2627 = vmatpush.msra.mxu0 %v6098_v24  ;;  %2647 = vmatpush.msrb.mxu2 %v6099_v37  ;;  %v2289_v24 = vadd.f32 %v6106_v33, %v6105_v20 }
 0x71c   :  { %2667 = vmatpush.msrb.mxu3 %v6100_v52  ;;  %2687 = vmatpush.msra.mxu1 %v6101_v15 }
 0x778   :  { %v2309_v26 = vpop.f32.mrf.mxu0 }
 0x779   :  { %v2372_v25 = vadd.f32 %v2309_v26, %v2288_v44  ;;  %v2369_v9 = vpop.f32.mrf.mxu1 }
 0x77a   :  { %v2375_v32 = vadd.f32 %v2369_v9, %v6104_v57 }
 0x77b   :  { %v3434_v29 = vmul.f32 -1.442695, %v2372_v25 }
 0x77c   :  { %v3436_v41 = vmul.f32 -1.442695, %v2375_v32 }
 0x77d   :  { %3577 = vpow2.f32 %v3434_v29  ;;  %v6107_v29 = vld [vmem:[#allocation87_spill] sm:$0xff] }
 0x77e   :  { %3579 = vpow2.f32 %v3436_v41  ;;  %v2329_v37 = vpop.f32.mrf.mxu2 }
 0x77f   :  { %v2373_v17 = vadd.f32 %v2329_v37, %v2289_v24  ;;  %v2349_v26 = vpop.f32.mrf.mxu3 }
 0x780   :  { %v2374_v57 = vadd.f32 %v2349_v26, %v6107_v29 }
 0x781   :  { %v3435_v52 = vmul.f32 -1.442695, %v2373_v17 }
 0x783   :  { %v3578_v51 = vpop.eup %3577  ;;  %3581 = vpow2.f32 %v3435_v52 }
 0x784   :  { %v3580_v15 = vpop.eup %3579  ;;  %v2379_v3 = vadd.f32 1.0, %v3578_v51 }
 0x785   :  { %v2418_v6 = vadd.f32 1.0, %v3580_v15 }
 0x786   :  { %3583 = vrcp.f32 %v2379_v3  ;;  %v2391_v41 = vand.u32 2147483648, %v2379_v3  ;;  %v2389_v37 = vand.u32 2147483647, %v2379_v3  ;;  %vm2385_vm5 = vweird.f32 %v2379_v3 }
 0x787   :  { %3585 = vrcp.f32 %v2418_v6  ;;  %vm2424_vm13 = vweird.f32 %v2418_v6 }
 0x788   :  { %vm2390_vm7 = vcmp.eq.f32.partialorder %v2389_v37, 8.507059e+37 }
 0x789   :  { %v3582_v44 = vpop.eup %3581 }
 0x78a   :  { %v2398_v39 = vadd.f32 1.0, %v3582_v44  ;;  %v2392_v44 = vor.u32 1.1754944e-38, %v2391_v41 }
 0x78c   :  { %v3584_v9 = vpop.eup %3583  ;;  %3587 = vrcp.f32 %v2398_v39  ;;  %v2410_v26 = vand.u32 2147483648, %v2398_v39  ;;  %vm2404_vm9 = vweird.f32 %v2398_v39 }
 0x78d   :  { %v2381_v32 = vmul.f32 %v3584_v9, %v2379_v3  ;;  %3589 = vtanh.f32 %v2374_v57  ;;  %v3586_v24 = vpop.eup %3585  ;;  %vm2386_vm4 = vweird.f32 %v3584_v9  ;;  %v2408_v57 = vand.u32 2147483647, %v2398_v39 }
 0x78e   :  { %v2420_v15 = vmul.f32 %v3586_v24, %v2418_v6  ;;  %vm2387_vm6 = vmor %vm2385_vm5, %vm2386_vm4  ;;  %v2411_v5 = vor.u32 1.1754944e-38, %v2410_v26  ;;  %vm2425_vm12 = vweird.f32 %v3586_v24 }
 0x78f   :  { %v2382_v33 = vsub.f32 1.0, %v2381_v32  ;;  %vm2409_vm11 = vcmp.eq.f32.partialorder %v2408_v57, 8.507059e+37  ;;  %vm2426_vm14 = vmor %vm2424_vm13, %vm2425_vm12  ;;  %v6132_v57 = vld [vmem:[#allocation89_spill] sm:$0xff] }
 0x791   :  { %v2383_v17 = vmul.f32 %v3584_v9, %v2382_v33  ;;  %v2421_v33 = vsub.f32 1.0, %v2420_v15 }
 0x792   :  { %v3588_v52 = vpop.eup %3587 }
 0x793   :  { %v2400_v51 = vmul.f32 %v3588_v52, %v2398_v39  ;;  %v2384_v25 = vadd.f32 %v3584_v9, %v2383_v17  ;;  %v3590_v36 = vpop.eup %3589  ;;  %vm2405_vm8 = vweird.f32 %v3588_v52  ;;  %v2422_v3 = vmul.f32 %v3586_v24, %v2421_v33 }
 0x794   :  { %vm2406_vm10 = vmor %vm2404_vm9, %vm2405_vm8 }
 0x795   :  { %v2401_v20 = vsub.f32 1.0, %v2400_v51  ;;  %v2388_v43 = vsel %vm2387_vm6, %v3584_v9, %v2384_v25  ;;  %v2423_v37 = vadd.f32 %v3586_v24, %v2422_v3 }
 0x796   :  { %v2393_v29 = vsel %vm2390_vm7, %v2392_v44, %v2388_v43  ;;  %v2430_v43 = vand.u32 2147483648, %v2418_v6 }
 0x797   :  { %v2402_v32 = vmul.f32 %v3588_v52, %v2401_v20  ;;  %v2435_v35 = vmul.f32 %v3590_v36, %v2393_v29  ;;  %v2428_v36 = vand.u32 2147483647, %v2418_v6  ;;  %v2427_v20 = vsel %vm2426_vm14, %v3586_v24, %v2423_v37 }
 0x798   :  { %v2431_v39 = vor.u32 1.1754944e-38, %v2430_v43 }
 0x799   :  { %v2403_v10 = vadd.f32 %v3588_v52, %v2402_v32  ;;  %vm2429_vm15 = vcmp.eq.f32.partialorder %v2428_v36, 8.507059e+37 }
 0x79b   :  { %v2407_v17 = vsel %vm2406_vm10, %v3588_v52, %v2403_v10  ;;  %v2432_v10 = vsel %vm2429_vm15, %v2431_v39, %v2427_v20 }
 0x79c   :  { %v2412_v22 = vsel %vm2409_vm11, %v2411_v5, %v2407_v17  ;;  %v3739_v5 = vld [vmem:[#allocation28 + $0x1a8] sm:$0xff] }
 0x79d   :  { %v2434_v41 = vmul.f32 %v2412_v22, %v5549_v30  ;;  %v3737_v30 = vld [vmem:[#allocation28 + $0x1e8] sm:$0xff] }
 0x79e   :  { %v3738_v22 = vld [vmem:[#allocation28 + $0x1c8] sm:$0xff] }
 0x79f   :  { %v5629_v9 = vadd.f32 %v2435_v35, %v2434_v41 }
 0x7a1   :  { %3591 = vtanh.f32 %v5629_v9 }
 0x7a7   :  { %v3592_v51 = vpop.eup %3591 }
 0x7a8   :  { %v5632_v52 = vmul.f32 %v3592_v51, %v2432_v10 }
 0x7aa   :  { %2468 = vmatmul.f32.vlgmr.msrb.gmra.mxu0 %v5632_v52  ;;  %2488 = vmatmul.f32.vlgmr.msra.gmra.mxu2 %v5632_v52 }
 0x7ab   :  { %2508 = vmatmul.f32.vlgmr.msra.gmra.mxu3 %v5632_v52  ;;  %2528 = vmatmul.f32.vlgmr.msrb.gmra.mxu1 %v5632_v52 }
 0x7ac   :  { %2772 = vmatpush.msrb.mxu0 %v5284_v62  ;;  %2792 = vmatpush.msra.mxu2 %v3737_v30  ;;  %v3740_v62 = vld [vmem:[#allocation28 + $0x188] sm:$0xff] }
 0x7ad   :  { %2812 = vmatpush.msra.mxu3 %v5416_v61  ;;  %2832 = vmatpush.msrb.mxu1 %v5419_v2  ;;  %v6117_v61 = vld [vmem:[#allocation70_spill] sm:$0xff]  ;;  %v6118_v2 = vld [vmem:[#allocation80_spill] sm:$0xff] }
 0x7ae   :  { %2773 = vmatpush.msrb.mxu0 %v5290_v16  ;;  %2793 = vmatpush.msra.mxu2 %v3738_v22  ;;  %v3741_v16 = vld [vmem:[#allocation28 + $0x168] sm:$0xff] }
 0x7af   :  { %2813 = vmatpush.msra.mxu3 %v5424_v28  ;;  %2833 = vmatpush.msrb.mxu1 %v5427_v53  ;;  %v6119_v28 = vld [vmem:[#allocation58_spill] sm:$0xff]  ;;  %v6120_v53 = vld [vmem:[#allocation52_spill] sm:$0xff] }
 0x7b0   :  { %2774 = vmatpush.msrb.mxu0 %v5296_v4  ;;  %2794 = vmatpush.msra.mxu2 %v3739_v5  ;;  %v3742_v4 = vld [vmem:[#allocation28 + $0x148] sm:$0xff] }
 0x7b1   :  { %2814 = vmatpush.msra.mxu3 %v5432_v59  ;;  %2834 = vmatpush.msrb.mxu1 %v5435_v14  ;;  %v6121_v59 = vld [vmem:[#allocation65_spill] sm:$0xff]  ;;  %v6122_v14 = vld [vmem:[#allocation83_spill] sm:$0xff] }
 0x7b2   :  { %2775 = vmatpush.msrb.mxu0 %v5302_v63  ;;  %2795 = vmatpush.msra.mxu2 %v3740_v62  ;;  %v3743_v63 = vld [vmem:[#allocation28 + $0x128] sm:$0xff] }
 0x7b3   :  { %2815 = vmatpush.msra.mxu3 %v5440_v13  ;;  %2835 = vmatpush.msrb.mxu1 %v5443_v60  ;;  %v6123_v13 = vld [vmem:[#allocation48_spill] sm:$0xff]  ;;  %v6124_v60 = vld [vmem:[#allocation61_spill] sm:$0xff] }
 0x7b4   :  { %2776 = vmatpush.msrb.mxu0 %v5308_v1  ;;  %2796 = vmatpush.msra.mxu2 %v3741_v16  ;;  %v6108_v1 = vld [vmem:[#allocation57_spill] sm:$0xff] }
 0x7b5   :  { %2816 = vmatpush.msra.mxu3 %v5448_v49  ;;  %2836 = vmatpush.msrb.mxu1 %v5451_v56  ;;  %v6125_v49 = vld [vmem:[#allocation95_spill] sm:$0xff]  ;;  %v6126_v56 = vld [vmem:[#allocation96_spill] sm:$0xff] }
 0x7b6   :  { %2777 = vmatpush.msrb.mxu0 %v5314_v19  ;;  %2797 = vmatpush.msra.mxu2 %v3742_v4  ;;  %v6109_v19 = vld [vmem:[#allocation77_spill] sm:$0xff] }
 0x7b7   :  { %2817 = vmatpush.msra.mxu3 %v5456_v42  ;;  %2837 = vmatpush.msrb.mxu1 %v5459_v54  ;;  %v6127_v42 = vld [vmem:[#allocation82_spill] sm:$0xff]  ;;  %v6128_v54 = vld [vmem:[#allocation76_spill] sm:$0xff] }
 0x7b8   :  { %2778 = vmatpush.msrb.mxu0 %v5320_v21  ;;  %2798 = vmatpush.msra.mxu2 %v3743_v63  ;;  %v6110_v21 = vld [vmem:[#allocation64_spill] sm:$0xff] }
 0x7b9   :  { %2818 = vmatpush.msra.mxu3 %v5464_v45  ;;  %2838 = vmatpush.msrb.mxu1 %v5467_v18  ;;  %v2448_v45 = vadd.f32 %v6128_v54, %v6127_v42  ;;  %v2957_v54 = vld [vmem:[#allocation30 + $0xe0] sm:$0xff] }
 0x7ba   :  { %2779 = vmatpush.msrb.mxu0 %v5326_v7  ;;  %2799 = vmatpush.msra.mxu2 %v5329_v8  ;;  %v6111_v7 = vld [vmem:[#allocation56_spill] sm:$0xff]  ;;  %v6112_v8 = vld [vmem:[#allocation51_spill] sm:$0xff] }
 0x7bb   :  { %2819 = vmatpush.msra.mxu3 %v5472_v47  ;;  %2839 = vmatpush.msrb.mxu1 %v5475_v48 }
 0x7bc   :  { %2780 = vmatpush.msrb.mxu0 %v5334_v40  ;;  %2800 = vmatpush.msra.mxu2 %v5337_v23  ;;  %v6113_v40 = vld [vmem:[#allocation79_spill] sm:$0xff]  ;;  %v6114_v23 = vld [vmem:[#allocation62_spill] sm:$0xff] }
 0x7bd   :  { %2820 = vmatpush.msra.mxu3 %v5480_v58  ;;  %2840 = vmatpush.msrb.mxu1 %v5483_v50  ;;  %v6129_v58 = vld [vmem:[#allocation88_spill] sm:$0xff] }
 0x7be   :  { %2781 = vmatpush.msrb.mxu0 %v5342_v11  ;;  %2801 = vmatpush.msra.mxu2 %v5345_v12  ;;  %v6115_v11 = vld [vmem:[#allocation47_spill] sm:$0xff] }
 0x7bf   :  { %2821 = vmatpush.msra.mxu3 %v6076_v55  ;;  %2841 = vmatpush.msrb.mxu1 %v6077_v46  ;;  %v6116_v12 = vld [vmem:[#allocation59_spill] sm:$0xff] }
 0x7c0   :  { %2782 = vmatpush.msrb.mxu0 %v6078_v0  ;;  %2802 = vmatpush.msra.mxu2 %v6079_v27  ;;  %v6130_v0 = vld [vmem:[#allocation73_spill] sm:$0xff] }
 0x7c1   :  { %2822 = vmatpush.msra.mxu3 %v6080_v31  ;;  %2842 = vmatpush.msrb.mxu1 %v6081_v34  ;;  %v6131_v27 = vld [vmem:[#allocation69_spill] sm:$0xff] }
 0x7c2   :  { %2783 = vmatpush.msrb.mxu0 %v6082_v38  ;;  %2803 = vmatpush.msra.mxu2 %v6108_v1  ;;  %v2449_v31 = vadd.f32 %v6131_v27, %v6130_v0  ;;  %v6134_v27 = vld [vmem:[#allocation90_spill] sm:$0xff] }
 0x7c3   :  { %2823 = vmatpush.msra.mxu3 %v6109_v19  ;;  %2843 = vmatpush.msrb.mxu1 %v6110_v21 }
 0x7c4   :  { %2784 = vmatpush.msrb.mxu0 %v6111_v7  ;;  %2804 = vmatpush.msra.mxu2 %v6112_v8 }
 0x7c5   :  { %2824 = vmatpush.msra.mxu3 %v6113_v40  ;;  %2844 = vmatpush.msrb.mxu1 %v6114_v23 }
 0x7c6   :  { %2785 = vmatpush.msrb.mxu0 %v6115_v11  ;;  %2805 = vmatpush.msra.mxu2 %v6116_v12 }
 0x7c7   :  { %2825 = vmatpush.msra.mxu3 %v6117_v61  ;;  %2845 = vmatpush.msrb.mxu1 %v6118_v2 }
 0x7c8   :  { %2786 = vmatpush.msrb.mxu0 %v6119_v28  ;;  %2806 = vmatpush.msra.mxu2 %v6120_v53 }
 0x7c9   :  { %2826 = vmatpush.msra.mxu3 %v6121_v59  ;;  %2846 = vmatpush.msrb.mxu1 %v6122_v14 }
 0x7ca   :  { %2787 = vmatpush.msrb.mxu0 %v6123_v13  ;;  %2807 = vmatpush.msra.mxu2 %v6124_v60 }
 0x7cb   :  { %2827 = vmatpush.msra.mxu3 %v6125_v49  ;;  %2847 = vmatpush.msrb.mxu1 %v6126_v56  ;;  %v2960_v56 = vld [vmem:[#allocation30 + $0xf8] sm:$0xff] }
 0x827   :  { %v2469_v18 = vpop.f32.mrf.mxu0 }
 0x828   :  { %v2532_v47 = vadd.f32 %v2469_v18, %v2448_v45  ;;  %v2529_v48 = vpop.f32.mrf.mxu1  ;;  %v2958_v45 = vld [vmem:[#allocation30 + $0xe8] sm:$0xff]  ;;  %v6133_v18 = vld [vmem:[#allocation78_spill] sm:$0xff] }
 0x829   :  { %v2535_v50 = vadd.f32 %v2529_v48, %v6129_v58  ;;  %v2955_v58 = vld [vmem:[#allocation30 + $0xd0] sm:$0xff] }
 0x82a   :  { %v3437_v55 = vmul.f32 -1.442695, %v2532_v47  ;;  %v2608_v47 = vadd.f32 %v6133_v18, %v6127_v42 }
 0x82b   :  { %v3439_v46 = vmul.f32 -1.442695, %v2535_v50  ;;  %v2956_v50 = vld [vmem:[#allocation30 + $0xd8] sm:$0xff] }
 0x82c   :  { %3593 = vpow2.f32 %v3437_v55 }
 0x82d   :  { %3595 = vpow2.f32 %v3439_v46  ;;  %v2489_v34 = vpop.f32.mrf.mxu2 }
 0x82e   :  { %v2533_v38 = vadd.f32 %v2489_v34, %v2449_v31  ;;  %v2509_v26 = vpop.f32.mrf.mxu3  ;;  %v2953_v34 = vld [vmem:[#allocation30 + $0xc0] sm:$0xff] }
 0x82f   :  { %v2534_v33 = vadd.f32 %v2509_v26, %v6132_v57 }
 0x830   :  { %v3438_v35 = vmul.f32 -1.442695, %v2533_v38  ;;  %v2954_v38 = vld [vmem:[#allocation30 + $0xc8] sm:$0xff] }
 0x832   :  { %v3594_v6 = vpop.eup %3593  ;;  %3597 = vpow2.f32 %v3438_v35 }
 0x833   :  { %v3596_v24 = vpop.eup %3595  ;;  %v2539_v25 = vadd.f32 1.0, %v3594_v6 }
 0x834   :  { %v2578_v15 = vadd.f32 1.0, %v3596_v24  ;;  %v2951_v24 = vld [vmem:[#allocation30 + $0xb0] sm:$0xff] }
 0x835   :  { %3599 = vrcp.f32 %v2539_v25  ;;  %v2551_v41 = vand.u32 2147483648, %v2539_v25  ;;  %v2549_v36 = vand.u32 2147483647, %v2539_v25  ;;  %vm2545_vm1 = vweird.f32 %v2539_v25 }
 0x836   :  { %3601 = vrcp.f32 %v2578_v15  ;;  %v2590_v28 = vand.u32 2147483648, %v2578_v15  ;;  %vm2584_vm9 = vweird.f32 %v2578_v15  ;;  %v2588_v53 = vand.u32 2147483647, %v2578_v15 }
 0x837   :  { %v2552_v30 = vor.u32 1.1754944e-38, %v2551_v41  ;;  %vm2550_vm3 = vcmp.eq.f32.partialorder %v2549_v36, 8.507059e+37  ;;  %v2945_v41 = vld [vmem:[#allocation30 + $0x80] sm:$0xff]  ;;  %v2944_v36 = vld [vmem:[#allocation30 + $0x78] sm:$0xff] }
 0x838   :  { %v3598_v44 = vpop.eup %3597  ;;  %v2591_v14 = vor.u32 1.1754944e-38, %v2590_v28  ;;  %vm2589_vm11 = vcmp.eq.f32.partialorder %v2588_v53, 8.507059e+37  ;;  %v2932_v28 = vld [vmem:[#allocation30 + $0x18] sm:$0xff] }
 0x839   :  { %v2558_v29 = vadd.f32 1.0, %v3598_v44 }
 0x83b   :  { %v3600_v32 = vpop.eup %3599  ;;  %3603 = vrcp.f32 %v2558_v29  ;;  %v2570_v16 = vand.u32 2147483648, %v2558_v29  ;;  %v2568_v1 = vand.u32 2147483647, %v2558_v29  ;;  %vm2564_vm5 = vweird.f32 %v2558_v29 }
 0x83c   :  { %v2541_v17 = vmul.f32 %v3600_v32, %v2539_v25  ;;  %3605 = vtanh.f32 %v2534_v33  ;;  %v3602_v37 = vpop.eup %3601  ;;  %vm2546_vm0 = vweird.f32 %v3600_v32  ;;  %v2952_v25 = vld [vmem:[#allocation30 + $0xb8] sm:$0xff]  ;;  %v2947_v33 = vld [vmem:[#allocation30 + $0x90] sm:$0xff] }
 0x83d   :  { %v2580_v10 = vmul.f32 %v3602_v37, %v2578_v15  ;;  %vm2547_vm2 = vmor %vm2545_vm1, %vm2546_vm0  ;;  %v2571_v8 = vor.u32 1.1754944e-38, %v2570_v16  ;;  %vm2569_vm7 = vcmp.eq.f32.partialorder %v2568_v1, 8.507059e+37  ;;  %vm2585_vm8 = vweird.f32 %v3602_v37  ;;  %v6135_v15 = vld [vmem:[#allocation71_spill] sm:$0xff] }
 0x83e   :  { %v2542_v3 = vsub.f32 1.0, %v2541_v17  ;;  %vm2586_vm10 = vmor %vm2584_vm9, %vm2585_vm8  ;;  %v2609_v44 = vadd.f32 %v6135_v15, %v6130_v0  ;;  %v2948_v17 = vld [vmem:[#allocation30 + $0x98] sm:$0xff]  ;;  %v2938_v16 = vld [vmem:[#allocation30 + $0x48] sm:$0xff] }
 0x83f   :  { %v2581_v21 = vsub.f32 1.0, %v2580_v10  ;;  %v2942_v10 = vld [vmem:[#allocation30 + $0x68] sm:$0xff] }
 0x840   :  { %v2543_v43 = vmul.f32 %v3600_v32, %v2542_v3 }
 0x841   :  { %v3604_v20 = vpop.eup %3603  ;;  %v2582_v23 = vmul.f32 %v3602_v37, %v2581_v21  ;;  %v2936_v21 = vld [vmem:[#allocation30 + $0x38] sm:$0xff] }
 0x842   :  { %v2560_v39 = vmul.f32 %v3604_v20, %v2558_v29  ;;  %v2544_v51 = vadd.f32 %v3600_v32, %v2543_v43  ;;  %v3606_v62 = vpop.eup %3605  ;;  %vm2565_vm4 = vweird.f32 %v3604_v20  ;;  %v2949_v29 = vld [vmem:[#allocation30 + $0xa0] sm:$0xff]  ;;  %v2943_v43 = vld [vmem:[#allocation30 + $0x70] sm:$0xff] }
 0x843   :  { %vm2566_vm6 = vmor %vm2564_vm5, %vm2565_vm4  ;;  %v2583_v2 = vadd.f32 %v3602_v37, %v2582_v23  ;;  %v2933_v23 = vld [vmem:[#allocation30 + $0x20] sm:$0xff] }
 0x844   :  { %v2561_v22 = vsub.f32 1.0, %v2560_v39  ;;  %v2548_v5 = vsel %vm2547_vm2, %v3600_v32, %v2544_v51  ;;  %v2950_v32 = vld [vmem:[#allocation30 + $0xa8] sm:$0xff]  ;;  %v2941_v51 = vld [vmem:[#allocation30 + $0x60] sm:$0xff] }
 0x845   :  { %v2553_v4 = vsel %vm2550_vm3, %v2552_v30, %v2548_v5  ;;  %v2587_v59 = vsel %vm2586_vm10, %v3602_v37, %v2583_v2  ;;  %v2946_v37 = vld [vmem:[#allocation30 + $0x88] sm:$0xff]  ;;  %v2939_v30 = vld [vmem:[#allocation30 + $0x50] sm:$0xff] }
 0x846   :  { %v2562_v63 = vmul.f32 %v3604_v20, %v2561_v22  ;;  %v2595_v19 = vmul.f32 %v3606_v62, %v2553_v4  ;;  %v2592_v60 = vsel %vm2589_vm11, %v2591_v14, %v2587_v59  ;;  %v2940_v22 = vld [vmem:[#allocation30 + $0x58] sm:$0xff]  ;;  %v2937_v62 = vld [vmem:[#allocation30 + $0x40] sm:$0xff]  ;;  %v2931_v2 = vld [vmem:[#allocation30 + $0x10] sm:$0xff] }
 0x847   :  { %v2929_v14 = vld [vmem:[#allocation30] sm:$0xff] }
 0x848   :  { %v2563_v7 = vadd.f32 %v3604_v20, %v2562_v63 }
 0x84a   :  { %v2567_v40 = vsel %vm2566_vm6, %v3604_v20, %v2563_v7 }
 0x84b   :  { %v2572_v11 = vsel %vm2569_vm7, %v2571_v8, %v2567_v40  ;;  %v6136_v8 = vld [vmem:[#allocation91_spill] sm:$0xff] }
 0x84c   :  { %v2594_v12 = vmul.f32 %v2572_v11, %v5629_v9  ;;  %v2959_v9 = vld [vmem:[#allocation30 + $0xf0] sm:$0xff]  ;;  %v2934_v11 = vld [vmem:[#allocation30 + $0x28] sm:$0xff] }
 0x84e   :  { %v5702_v61 = vadd.f32 %v2595_v19, %v2594_v12  ;;  %v2935_v19 = vld [vmem:[#allocation30 + $0x30] sm:$0xff] }
 0x850   :  { %3607 = vtanh.f32 %v5702_v61 }
 0x856   :  { %v3608_v13 = vpop.eup %3607 }
 0x857   :  { %v5705_v49 = vmul.f32 %v3608_v13, %v2592_v60  ;;  %v2930_v13 = vld [vmem:[#allocation30 + $0x8] sm:$0xff] }
 0x859   :  { %2628 = vmatmul.f32.vlgmr.msra.gmra.mxu0 %v5705_v49  ;;  %2648 = vmatmul.f32.vlgmr.msrb.gmra.mxu2 %v5705_v49 }
 0x85a   :  { %2668 = vmatmul.f32.vlgmr.msrb.gmra.mxu3 %v5705_v49  ;;  %2688 = vmatmul.f32.vlgmr.msra.gmra.mxu1 %v5705_v49 }
 0x85b   :  { %2967 = vmatpush.msra.mxu0 %v2959_v9  ;;  %3008 = vmatpush.msrb.mxu2 %v2960_v56 }
 0x85d   :  { %2968 = vmatpush.msra.mxu0 %v2957_v54  ;;  %3009 = vmatpush.msrb.mxu2 %v2958_v45 }
 0x85f   :  { %2969 = vmatpush.msra.mxu0 %v2955_v58  ;;  %3010 = vmatpush.msrb.mxu2 %v2956_v50 }
 0x861   :  { %2970 = vmatpush.msra.mxu0 %v2953_v34  ;;  %3011 = vmatpush.msrb.mxu2 %v2954_v38 }
 0x863   :  { %2971 = vmatpush.msra.mxu0 %v2951_v24  ;;  %3012 = vmatpush.msrb.mxu2 %v2952_v25 }
 0x865   :  { %2972 = vmatpush.msra.mxu0 %v2949_v29  ;;  %3013 = vmatpush.msrb.mxu2 %v2950_v32 }
 0x867   :  { %2973 = vmatpush.msra.mxu0 %v2947_v33  ;;  %3014 = vmatpush.msrb.mxu2 %v2948_v17 }
 0x869   :  { %2974 = vmatpush.msra.mxu0 %v2945_v41  ;;  %3015 = vmatpush.msrb.mxu2 %v2946_v37 }
 0x86b   :  { %2975 = vmatpush.msra.mxu0 %v2943_v43  ;;  %3016 = vmatpush.msrb.mxu2 %v2944_v36  ;;  %v6138_v36 = vld [vmem:[#allocation55_spill] sm:$0xff] }
 0x86d   :  { %2976 = vmatpush.msra.mxu0 %v2941_v51  ;;  %3017 = vmatpush.msrb.mxu2 %v2942_v10  ;;  %v3096_v51 = vld [vmem:[#allocation31 + $0xf8] sm:$0xff]  ;;  %v3078_v10 = vld [vmem:[#allocation31 + $0x68] sm:$0xff] }
 0x86e   :  { %3142 = vmatpush.msra.mxu1 %v3096_v51 }
 0x86f   :  { %2977 = vmatpush.msra.mxu0 %v2939_v30  ;;  %3018 = vmatpush.msrb.mxu2 %v2940_v22  ;;  %v3095_v30 = vld [vmem:[#allocation31 + $0xf0] sm:$0xff]  ;;  %v3094_v22 = vld [vmem:[#allocation31 + $0xe8] sm:$0xff] }
 0x870   :  { %3143 = vmatpush.msra.mxu1 %v3095_v30 }
 0x871   :  { %2978 = vmatpush.msra.mxu0 %v2937_v62  ;;  %3019 = vmatpush.msrb.mxu2 %v2938_v16  ;;  %v3076_v62 = vld [vmem:[#allocation31 + $0x58] sm:$0xff]  ;;  %v3093_v16 = vld [vmem:[#allocation31 + $0xe0] sm:$0xff] }
 0x872   :  { %3144 = vmatpush.msra.mxu1 %v3094_v22 }
 0x873   :  { %2979 = vmatpush.msra.mxu0 %v2935_v19  ;;  %3020 = vmatpush.msrb.mxu2 %v2936_v21  ;;  %v3074_v19 = vld [vmem:[#allocation31 + $0x48] sm:$0xff]  ;;  %v3091_v21 = vld [vmem:[#allocation31 + $0xd0] sm:$0xff] }
 0x874   :  { %3145 = vmatpush.msra.mxu1 %v3093_v16 }
 0x875   :  { %2980 = vmatpush.msra.mxu0 %v2933_v23  ;;  %3021 = vmatpush.msrb.mxu2 %v2934_v11  ;;  %v3090_v23 = vld [vmem:[#allocation31 + $0xc8] sm:$0xff] }
 0x876   :  { %v3070_v11 = vld [vmem:[#allocation31 + $0x28] sm:$0xff] }
 0x877   :  { %2981 = vmatpush.msra.mxu0 %v2931_v2  ;;  %3022 = vmatpush.msrb.mxu2 %v2932_v28  ;;  %v3069_v2 = vld [vmem:[#allocation31 + $0x20] sm:$0xff]  ;;  %v3088_v28 = vld [vmem:[#allocation31 + $0xb8] sm:$0xff] }
 0x879   :  { %2982 = vmatpush.msra.mxu0 %v2929_v14  ;;  %3023 = vmatpush.msrb.mxu2 %v2930_v13  ;;  %v3066_v14 = vld [vmem:[#allocation31 + $0x8] sm:$0xff]  ;;  %v3085_v13 = vld [vmem:[#allocation31 + $0xa0] sm:$0xff] }
 0x8d6   :  { %v2629_v48 = vpop.f32.mrf.mxu0 }
 0x8d7   :  { %v2692_v55 = vadd.f32 %v2629_v48, %v2608_v47  ;;  %v2689_v46 = vpop.f32.mrf.mxu1 }
 0x8d8   :  { %v2695_v31 = vadd.f32 %v2689_v46, %v6134_v27 }
 0x8d9   :  { %v3440_v35 = vmul.f32 -1.442695, %v2692_v55 }
 0x8da   :  { %v3442_v6 = vmul.f32 -1.442695, %v2695_v31 }
 0x8db   :  { %3609 = vpow2.f32 %v3440_v35 }
 0x8dc   :  { %3611 = vpow2.f32 %v3442_v6  ;;  %v2649_v26 = vpop.f32.mrf.mxu2 }
 0x8dd   :  { %v2693_v57 = vadd.f32 %v2649_v26, %v2609_v44  ;;  %v2669_v63 = vpop.f32.mrf.mxu3 }
 0x8de   :  { %v2694_v40 = vadd.f32 %v2669_v63, %v6136_v8  ;;  %v3075_v63 = vld [vmem:[#allocation31 + $0x50] sm:$0xff]  ;;  %v3072_v8 = vld [vmem:[#allocation31 + $0x38] sm:$0xff] }
 0x8df   :  { %v3441_v3 = vmul.f32 -1.442695, %v2693_v57 }
 0x8e1   :  { %v3610_v20 = vpop.eup %3609  ;;  %3613 = vpow2.f32 %v3441_v3 }
 0x8e2   :  { %v3612_v0 = vpop.eup %3611  ;;  %v2699_v39 = vadd.f32 1.0, %v3610_v20  ;;  %v6139_v20 = vld [vmem:[#allocation60_spill] sm:$0xff] }
 0x8e3   :  { %v5716_v5 = vadd.f32 1.0, %v3612_v0  ;;  %v3080_v0 = vld [vmem:[#allocation31 + $0x78] sm:$0xff] }
 0x8e4   :  { %3615 = vrcp.f32 %v2699_v39  ;;  %v2711_v59 = vand.u32 2147483648, %v2699_v39  ;;  %v2709_v56 = vand.u32 2147483647, %v2699_v39  ;;  %vm2705_vm13 = vweird.f32 %v2699_v39  ;;  %3101 = vmatpush.msrb.mxu3 %v3080_v0 }
 0x8e5   :  { %3617 = vrcp.f32 %v5716_v5  ;;  %v2750_v57 = vand.u32 2147483648, %v5716_v5  ;;  %vm2744_vm5 = vweird.f32 %v5716_v5  ;;  %v2748_v33 = vand.u32 2147483647, %v5716_v5 }
 0x8e6   :  { %v2712_v48 = vor.u32 1.1754944e-38, %v2711_v59  ;;  %vm2710_vm15 = vcmp.eq.f32.partialorder %v2709_v56, 8.507059e+37  ;;  %v3067_v59 = vld [vmem:[#allocation31 + $0x10] sm:$0xff] }
 0x8e7   :  { %v3614_v4 = vpop.eup %3613  ;;  %v2751_v3 = vor.u32 1.1754944e-38, %v2750_v57  ;;  %vm2749_vm7 = vcmp.eq.f32.partialorder %v2748_v33, 8.507059e+37  ;;  %v3083_v56 = vld [vmem:[#allocation31 + $0x90] sm:$0xff] }
 0x8e8   :  { %v2718_v1 = vadd.f32 1.0, %v3614_v4  ;;  %v6140_v4 = vld [vmem:[#allocation72_spill] sm:$0xff] }
 0x8ea   :  { %v3616_v7 = vpop.eup %3615  ;;  %3619 = vrcp.f32 %v2718_v1  ;;  %v2730_v46 = vand.u32 2147483648, %v2718_v1  ;;  %v2728_v34 = vand.u32 2147483647, %v2718_v1  ;;  %vm2724_vm1 = vweird.f32 %v2718_v1 }
 0x8eb   :  { %v2701_v12 = vmul.f32 %v3616_v7, %v2699_v39  ;;  %3621 = vtanh.f32 %v2694_v40  ;;  %v3618_v60 = vpop.eup %3617  ;;  %vm2706_vm12 = vweird.f32 %v3616_v7  ;;  %v3079_v39 = vld [vmem:[#allocation31 + $0x70] sm:$0xff] }
 0x8ec   :  { %v2740_v47 = vmul.f32 %v3618_v60, %v5716_v5  ;;  %vm2707_vm14 = vmor %vm2705_vm13, %vm2706_vm12  ;;  %v2731_v24 = vor.u32 1.1754944e-38, %v2730_v46  ;;  %vm2729_vm3 = vcmp.eq.f32.partialorder %v2728_v34, 8.507059e+37  ;;  %vm2745_vm4 = vweird.f32 %v3618_v60  ;;  %3102 = vmatpush.msrb.mxu3 %v3079_v39  ;;  %v3077_v5 = vld [vmem:[#allocation31 + $0x60] sm:$0xff]  ;;  %v3071_v40 = vld [vmem:[#allocation31 + $0x30] sm:$0xff] }
 0x8ed   :  { %v2702_v53 = vsub.f32 1.0, %v2701_v12  ;;  %vm2746_vm6 = vmor %vm2744_vm5, %vm2745_vm4  ;;  %v3089_v12 = vld [vmem:[#allocation31 + $0xc0] sm:$0xff] }
 0x8ee   :  { %v2741_v35 = vsub.f32 1.0, %v2740_v47  ;;  %3103 = vmatpush.msrb.mxu3 %v3078_v10  ;;  %v6144_v10 = vld [vmem:[#allocation93_spill] sm:$0xff] }
 0x8ef   :  { %v2703_v9 = vmul.f32 %v3616_v7, %v2702_v53  ;;  %v3087_v53 = vld [vmem:[#allocation31 + $0xb0] sm:$0xff] }
 0x8f0   :  { %v3620_v54 = vpop.eup %3619  ;;  %v2742_v15 = vmul.f32 %v3618_v60, %v2741_v35  ;;  %3104 = vmatpush.msrb.mxu3 %v3077_v5 }
 0x8f1   :  { %v2720_v45 = vmul.f32 %v3620_v54, %v2718_v1  ;;  %v2704_v18 = vadd.f32 %v3616_v7, %v2703_v9  ;;  %v3622_v55 = vpop.eup %3621  ;;  %vm2725_vm0 = vweird.f32 %v3620_v54  ;;  %v3092_v1 = vld [vmem:[#allocation31 + $0xd8] sm:$0xff] }
 0x8f2   :  { %vm2726_vm2 = vmor %vm2724_vm1, %vm2725_vm0  ;;  %v2743_v32 = vadd.f32 %v3618_v60, %v2742_v15  ;;  %3105 = vmatpush.msrb.mxu3 %v3076_v62  ;;  %3146 = vmatpush.msra.mxu1 %v3092_v1  ;;  %v3084_v9 = vld [vmem:[#allocation31 + $0x98] sm:$0xff] }
 0x8f3   :  { %v2721_v58 = vsub.f32 1.0, %v2720_v45  ;;  %v2708_v50 = vsel %vm2707_vm14, %v3616_v7, %v2704_v18  ;;  %v3073_v7 = vld [vmem:[#allocation31 + $0x40] sm:$0xff]  ;;  %v6141_v18 = vld [vmem:[#allocation81_spill] sm:$0xff] }
 0x8f4   :  { %v2713_v27 = vsel %vm2710_vm15, %v2712_v48, %v2708_v50  ;;  %v2747_v17 = vsel %vm2746_vm6, %v3618_v60, %v2743_v32  ;;  %3106 = vmatpush.msrb.mxu3 %v3075_v63  ;;  %3147 = vmatpush.msra.mxu1 %v3091_v21  ;;  %v3065_v60 = vld [vmem:[#allocation31] sm:$0xff]  ;;  %v2768_v47 = vadd.f32 %v6141_v18, %v6127_v42 }
 0x8f5   :  { %v2722_v31 = vmul.f32 %v3620_v54, %v2721_v58  ;;  %v2755_v38 = vmul.f32 %v3622_v55, %v2713_v27  ;;  %v2752_v37 = vsel %vm2749_vm7, %v2751_v3, %v2747_v17  ;;  %v3081_v45 = vld [vmem:[#allocation31 + $0x80] sm:$0xff]  ;;  %v6142_v55 = vld [vmem:[#allocation92_spill] sm:$0xff] }
 0x8f6   :  { %3107 = vmatpush.msrb.mxu3 %v3074_v19  ;;  %3148 = vmatpush.msra.mxu1 %v3090_v23  ;;  %v2961_v27 = vld [vmem:[%s5832_s23] sm:$0x3] }
 0x8f7   :  { %v2723_v6 = vadd.f32 %v3620_v54, %v2722_v31  ;;  %v5750_v32 = vperm.slane %v2961_v27, 1 }
 0x8f8   :  { %3108 = vmatpush.msrb.mxu3 %v3073_v7  ;;  %3149 = vmatpush.msra.mxu1 %v3089_v12 }
 0x8f9   :  { %v2727_v25 = vsel %vm2726_vm2, %v3620_v54, %v2723_v6  ;;  %v3082_v54 = vld [vmem:[#allocation31 + $0x88] sm:$0xff]  ;;  %v6143_v6 = vld [vmem:[#allocation74_spill] sm:$0xff] }
 0x8fa   :  { %v2732_v44 = vsel %vm2729_vm3, %v2731_v24, %v2727_v25  ;;  %3109 = vmatpush.msrb.mxu3 %v3072_v8  ;;  %3150 = vmatpush.msra.mxu1 %v3088_v28 }
 0x8fb   :  { %v2754_v26 = vmul.f32 %v2732_v44, %v5702_v61  ;;  %v6137_v61 = vld [vmem:[#allocation94_spill] sm:$0xff] }
 0x8fc   :  { %3110 = vmatpush.msrb.mxu3 %v3071_v40  ;;  %3151 = vmatpush.msra.mxu1 %v3087_v53 }
 0x8fd   :  { %v5722_v29 = vadd.f32 %v2755_v38, %v2754_v26  ;;  %v5746_v38 = vperm.slane %v2961_v27, 0  ;;  %v3206_v27 = vld [vmem:[#allocation33 + $0x78] sm:$0xff] }
 0x8fe   :  { %3111 = vmatpush.msrb.mxu3 %v3070_v11 }
 0x8ff   :  { %3623 = vtanh.f32 %v5722_v29 }
 0x900   :  { %3112 = vmatpush.msrb.mxu3 %v3069_v2 }
 0x905   :  { %v3624_v41 = vpop.eup %3623 }
 0x906   :  { %v2758_v43 = vmul.f32 %v3624_v41, %v2752_v37 }
 0x908   :  { %2788 = vmatmul.f32.vlgmr.msrb.gmra.mxu0 %v2758_v43  ;;  %2808 = vmatmul.f32.vlgmr.msra.gmra.mxu2 %v2758_v43 }
 0x909   :  { %2828 = vmatmul.f32.vlgmr.msra.gmra.mxu3 %v2758_v43  ;;  %2848 = vmatmul.f32.vlgmr.msrb.gmra.mxu1 %v2758_v43 }
 0x90a   :  { %3211 = vmatpush.msrb.mxu0 %v3206_v27 }
 0x910   :  { %2983 = vmatmul.f32.vlgmr.msra.gmra.mxu0 %v6137_v61  ;;  %3024 = vmatmul.f32.vlgmr.msrb.gmra.mxu2 %v6137_v61 }
 0x918   :  { %2986 = vmatmul.f32.gmra.mxu0 %v6138_v36  ;;  %3027 = vmatmul.f32.gmra.mxu2 %v6138_v36 }
 0x920   :  { %2989 = vmatmul.f32.gmra.mxu0 %v6139_v20  ;;  %3030 = vmatmul.f32.gmra.mxu2 %v6139_v20 }
 0x928   :  { %2992 = vmatmul.f32.gmra.mxu0 %v6140_v4  ;;  %3033 = vmatmul.f32.gmra.mxu2 %v6140_v4 }
 0x930   :  { %2995 = vmatmul.f32.gmra.mxu0 %v5632_v52  ;;  %3036 = vmatmul.f32.gmra.mxu2 %v5632_v52  ;;  %v3068_v52 = vld [vmem:[#allocation31 + $0x18] sm:$0xff] }
 0x931   :  { %3113 = vmatpush.msrb.mxu3 %v3068_v52 }
 0x933   :  { %3114 = vmatpush.msrb.mxu3 %v3067_v59 }
 0x935   :  { %3115 = vmatpush.msrb.mxu3 %v3066_v14 }
 0x937   :  { %3116 = vmatpush.msrb.mxu3 %v3065_v60 }
 0x938   :  { %2998 = vmatmul.f32.gmra.mxu0 %v5705_v49  ;;  %3039 = vmatmul.f32.gmra.mxu2 %v5705_v49  ;;  %v3086_v49 = vld [vmem:[#allocation31 + $0xa8] sm:$0xff] }
 0x939   :  { %3152 = vmatpush.msra.mxu1 %v3086_v49 }
 0x93b   :  { %3153 = vmatpush.msra.mxu1 %v3085_v13 }
 0x93d   :  { %3154 = vmatpush.msra.mxu1 %v3084_v9 }
 0x93f   :  { %3155 = vmatpush.msra.mxu1 %v3083_v56 }
 0x940   :  { %3001 = vmatmul.f32.gmra.mxu0 %v2758_v43  ;;  %3042 = vmatmul.f32.gmra.mxu2 %v2758_v43 }
 0x941   :  { %3156 = vmatpush.msra.mxu1 %v3082_v54 }
 0x943   :  { %3157 = vmatpush.msra.mxu1 %v3081_v45 }
 0x985   :  { %v2789_v48 = vpop.f32.mrf.mxu0 }
 0x986   :  { %v2852_v58 = vadd.f32 %v2789_v48, %v2768_v47  ;;  %v2849_v50 = vpop.f32.mrf.mxu1 }
 0x987   :  { %v2855_v46 = vadd.f32 %v2849_v50, %v6142_v55 }
 0x988   :  { %v3443_v31 = vmul.f32 -1.442695, %v2852_v58 }
 0x989   :  { %v3445_v34 = vmul.f32 -1.442695, %v2855_v46 }
 0x98a   :  { %3625 = vpow2.f32 %v3443_v31  ;;  %v3205_v31 = vld [vmem:[#allocation33 + $0x70] sm:$0xff] }
 0x98b   :  { %3627 = vpow2.f32 %v3445_v34  ;;  %v2809_v35 = vpop.f32.mrf.mxu2  ;;  %3212 = vmatpush.msrb.mxu0 %v3205_v31 }
 0x98c   :  { %v2853_v24 = vadd.f32 %v2809_v35, %v6143_v6  ;;  %v2829_v61 = vpop.f32.mrf.mxu3 }
 0x98d   :  { %v2984_v25 = vpop.f32.mrf.mxu0  ;;  %v2854_v30 = vadd.f32 %v2829_v61, %v6144_v10  ;;  %v3201_v61 = vld [vmem:[#allocation33 + $0x50] sm:$0xff] }
 0x98e   :  { %v3444_v42 = vmul.f32 -1.442695, %v2853_v24  ;;  %v2985_v15 = vadd.f32 %v2984_v25, %v5746_v38  ;;  %v3204_v24 = vld [vmem:[#allocation33 + $0x68] sm:$0xff] }
 0x98f   :  { %3213 = vmatpush.msrb.mxu0 %v3204_v24 }
 0x990   :  { %v3626_v44 = vpop.eup %3625  ;;  %3629 = vpow2.f32 %v3444_v42  ;;  %v3049_v26 = vmax.f32 %v2985_v15, 0.0 }
 0x991   :  { %v3628_v57 = vpop.eup %3627  ;;  %v2859_v33 = vadd.f32 1.0, %v3626_v44  ;;  %v3203_v44 = vld [vmem:[#allocation33 + $0x60] sm:$0xff] }
 0x992   :  { %3117 = vmatmul.f32.vlgmr.msrb.gmra.mxu3 %v3049_v26  ;;  %v5752_v3 = vadd.f32 1.0, %v3628_v57  ;;  %3214 = vmatpush.msrb.mxu0 %v3203_v44 }
 0x993   :  { %3631 = vrcp.f32 %v2859_v33  ;;  %v3025_v17 = vpop.f32.mrf.mxu2  ;;  %v2869_v4 = vand.u32 2147483647, %v2859_v33  ;;  %v2871_v63 = vand.u32 2147483648, %v2859_v33  ;;  %vm2865_vm9 = vweird.f32 %v2859_v33 }
 0x994   :  { %v3026_v41 = vadd.f32 %v3025_v17, %v5750_v32  ;;  %3633 = vrcp.f32 %v5752_v3  ;;  %vm2904_vm1 = vweird.f32 %v5752_v3 }
 0x995   :  { %v2987_v37 = vpop.f32.mrf.mxu0  ;;  %v2872_v28 = vor.u32 1.1754944e-38, %v2871_v63  ;;  %vm2870_vm11 = vcmp.eq.f32.partialorder %v2869_v4, 8.507059e+37  ;;  %v3198_v4 = vld [vmem:[#allocation33 + $0x38] sm:$0xff] }
 0x996   :  { %v3630_v43 = vpop.eup %3629  ;;  %v3050_v36 = vmax.f32 %v3026_v41, 0.0  ;;  %v2988_v20 = vadd.f32 %v2987_v37, %v5746_v38  ;;  %v3202_v41 = vld [vmem:[#allocation33 + $0x58] sm:$0xff]  ;;  %v2908_v37 = vand.u32 2147483647, %v5752_v3 }
 0x997   :  { %v2878_v0 = vadd.f32 1.0, %v3630_v43  ;;  %3215 = vmatpush.msrb.mxu0 %v3202_v41 }
 0x998   :  { %v3051_v39 = vmax.f32 %v2988_v20, 0.0  ;;  %3158 = vmatmul.f32.vlgmr.msra.gmra.mxu1 %v3050_v36  ;;  %vm2909_vm3 = vcmp.eq.f32.partialorder %v2908_v37, 8.507059e+37 }
 0x999   :  { %v3632_v51 = vpop.eup %3631  ;;  %3635 = vrcp.f32 %v2878_v0  ;;  %v2890_v49 = vand.u32 2147483648, %v2878_v0  ;;  %v2888_v13 = vand.u32 2147483647, %v2878_v0  ;;  %vm2884_vm13 = vweird.f32 %v2878_v0  ;;  %3216 = vmatpush.msrb.mxu0 %v3201_v61 }
 0x99a   :  { %v2861_v22 = vmul.f32 %v3632_v51, %v2859_v33  ;;  %3120 = vmatmul.f32.gmra.mxu3 %v3051_v39  ;;  %3637 = vtanh.f32 %v2854_v30  ;;  %v5759_v19 = vpop.eup %3633  ;;  %vm2866_vm8 = vweird.f32 %v3632_v51 }
 0x99b   :  { %v3028_v5 = vpop.f32.mrf.mxu2  ;;  %v2900_v2 = vmul.f32 %v5759_v19, %v5752_v3  ;;  %vm2867_vm10 = vmor %vm2865_vm9, %vm2866_vm8  ;;  %v2891_v50 = vor.u32 1.1754944e-38, %v2890_v49  ;;  %vm2889_vm15 = vcmp.eq.f32.partialorder %v2888_v13, 8.507059e+37  ;;  %vm2905_vm0 = vweird.f32 %v5759_v19  ;;  %v3192_v49 = vld [vmem:[#allocation33 + $0x8] sm:$0xff]  ;;  %v5784_v13 = vld [vmem:[%s6145_s16] ss:$0 sm:$0xff] }
 0x99c   :  { %v2862_v62 = vsub.f32 1.0, %v2861_v22  ;;  %v3029_v16 = vadd.f32 %v3028_v5, %v5750_v32  ;;  %vm2906_vm2 = vmor %vm2904_vm1, %vm2905_vm0  ;;  %v3199_v5 = vld [vmem:[#allocation33 + $0x40] sm:$0xff] }
 0x99d   :  { %v2990_v1 = vpop.f32.mrf.mxu0  ;;  %v2901_v18 = vsub.f32 1.0, %v2900_v2 }
 0x99e   :  { %v2863_v21 = vmul.f32 %v3632_v51, %v2862_v62  ;;  %v3052_v7 = vmax.f32 %v3029_v16, 0.0  ;;  %v2991_v8 = vadd.f32 %v2990_v1, %v5746_v38  ;;  %v3197_v1 = vld [vmem:[#allocation33 + $0x30] sm:$0xff] }
 0x99f   :  { %v3636_v40 = vpop.eup %3635  ;;  %v2902_v35 = vmul.f32 %v5759_v19, %v2901_v18 }
 0x9a0   :  { %v2880_v23 = vmul.f32 %v3636_v40, %v2878_v0  ;;  %v2864_v11 = vadd.f32 %v3632_v51, %v2863_v21  ;;  %v3053_v12 = vmax.f32 %v2991_v8, 0.0  ;;  %3161 = vmatmul.f32.gmra.mxu1 %v3052_v7  ;;  %v3638_v59 = vpop.eup %3637  ;;  %vm2885_vm12 = vweird.f32 %v3636_v40  ;;  %v3200_v0 = vld [vmem:[#allocation33 + $0x48] sm:$0xff] }
 0x9a1   :  { %vm2886_vm14 = vmor %vm2884_vm13, %vm2885_vm12  ;;  %v2903_v57 = vadd.f32 %v5759_v19, %v2902_v35  ;;  %3217 = vmatpush.msrb.mxu0 %v3200_v0  ;;  %v3196_v21 = vld [vmem:[#allocation33 + $0x28] sm:$0xff] }
 0x9a2   :  { %v2881_v52 = vsub.f32 1.0, %v2880_v23  ;;  %v2868_v53 = vsel %vm2867_vm10, %v3632_v51, %v2864_v11  ;;  %3123 = vmatmul.f32.gmra.mxu3 %v3053_v12 }
 0x9a3   :  { %v2873_v14 = vsel %vm2870_vm11, %v2872_v28, %v2868_v53  ;;  %v3031_v60 = vpop.f32.mrf.mxu2  ;;  %v2907_v36 = vsel %vm2906_vm2, %v5759_v19, %v2903_v57  ;;  %3218 = vmatpush.msrb.mxu0 %v3199_v5  ;;  %v3194_v53 = vld [vmem:[#allocation33 + $0x18] sm:$0xff] }
 0x9a4   :  { %v2882_v9 = vmul.f32 %v3636_v40, %v2881_v52  ;;  %v2915_v56 = vmul.f32 %v3638_v59, %v2873_v14  ;;  %v3032_v54 = vadd.f32 %v3031_v60, %v5750_v32  ;;  %v3193_v59 = vld [vmem:[#allocation33 + $0x10] sm:$0xff]  ;;  %v3191_v14 = vld [vmem:[#allocation33] sm:$0xff] }
 0x9a5   :  { %v2993_v45 = vpop.f32.mrf.mxu0  ;;  %3219 = vmatpush.msrb.mxu0 %v3198_v4 }
 0x9a6   :  { %v2883_v47 = vadd.f32 %v3636_v40, %v2882_v9  ;;  %v3054_v48 = vmax.f32 %v3032_v54, 0.0  ;;  %v2994_v58 = vadd.f32 %v2993_v45, %v5746_v38 }
 0x9a7   :  { %3220 = vmatpush.msrb.mxu0 %v3197_v1 }
 0x9a8   :  { %v2887_v55 = vsel %vm2886_vm14, %v3636_v40, %v2883_v47  ;;  %v3055_v46 = vmax.f32 %v2994_v58, 0.0  ;;  %3164 = vmatmul.f32.gmra.mxu1 %v3054_v48  ;;  %v3195_v40 = vld [vmem:[#allocation33 + $0x20] sm:$0xff] }
 0x9a9   :  { %v2892_v34 = vsel %vm2889_vm15, %v2891_v50, %v2887_v55  ;;  %3221 = vmatpush.msrb.mxu0 %v3196_v21 }
 0x9aa   :  { %v2914_v6 = vmul.f32 %v2892_v34, %v5722_v29  ;;  %3126 = vmatmul.f32.gmra.mxu3 %v3055_v46  ;;  %v2910_v29 = vand.u32 2147483648, %v5752_v3 }
 0x9ab   :  { %v3034_v25 = vpop.f32.mrf.mxu2  ;;  %3222 = vmatpush.msrb.mxu0 %v3195_v40 }
 0x9ac   :  { %v2916_v42 = vadd.f32 %v2915_v56, %v2914_v6  ;;  %v3035_v15 = vadd.f32 %v3034_v25, %v5750_v32  ;;  %v2911_v20 = vor.u32 1.1754944e-38, %v2910_v29 }
 0x9ad   :  { %v2996_v26 = vpop.f32.mrf.mxu0  ;;  %3223 = vmatpush.msrb.mxu0 %v3194_v53 }
 0x9ae   :  { %3639 = vtanh.f32 %v2916_v42  ;;  %v3056_v33 = vmax.f32 %v3035_v15, 0.0  ;;  %v2997_v17 = vadd.f32 %v2996_v26, %v5746_v38  ;;  %v2912_v30 = vsel %vm2909_vm3, %v2911_v20, %v2907_v36 }
 0x9af   :  { %3224 = vmatpush.msrb.mxu0 %v3193_v59 }
 0x9b0   :  { %v3057_v43 = vmax.f32 %v2997_v17, 0.0  ;;  %3167 = vmatmul.f32.gmra.mxu1 %v3056_v33 }
 0x9b1   :  { %3225 = vmatpush.msrb.mxu0 %v3192_v49 }
 0x9b2   :  { %3129 = vmatmul.f32.gmra.mxu3 %v3057_v43 }
 0x9b3   :  { %v3037_v39 = vpop.f32.mrf.mxu2  ;;  %3226 = vmatpush.msrb.mxu0 %v3191_v14 }
 0x9b4   :  { %v3640_v51 = vpop.eup %3639  ;;  %v3038_v10 = vadd.f32 %v3037_v39, %v5750_v32 }
 0x9b5   :  { %v2999_v22 = vpop.f32.mrf.mxu0  ;;  %v2918_v3 = vmul.f32 %v3640_v51, %v2912_v30 }
 0x9b6   :  { %v3058_v62 = vmax.f32 %v3038_v10, 0.0  ;;  %v3000_v16 = vadd.f32 %v2999_v22, %v5746_v38 }
 0x9b7   :  { %3004 = vmatmul.f32.gmra.mxu0 %v2918_v3  ;;  %3045 = vmatmul.f32.gmra.mxu2 %v2918_v3 }
 0x9b8   :  { %v3059_v63 = vmax.f32 %v3000_v16, 0.0  ;;  %3170 = vmatmul.f32.gmra.mxu1 %v3058_v62 }
 0x9ba   :  { %3132 = vmatmul.f32.gmra.mxu3 %v3059_v63 }
 0x9bb   :  { %v3040_v19 = vpop.f32.mrf.mxu2 }
 0x9bc   :  { %v3041_v7 = vadd.f32 %v3040_v19, %v5750_v32 }
 0x9bd   :  { %v3002_v8 = vpop.f32.mrf.mxu0 }
 0x9be   :  { %v3060_v23 = vmax.f32 %v3041_v7, 0.0  ;;  %v3003_v11 = vadd.f32 %v3002_v8, %v5746_v38 }
 0x9c0   :  { %v3061_v12 = vmax.f32 %v3003_v11, 0.0  ;;  %3173 = vmatmul.f32.gmra.mxu1 %v3060_v23 }
 0x9c2   :  { %3135 = vmatmul.f32.gmra.mxu3 %v3061_v12 }
 0x9c3   :  { %v3043_v2 = vpop.f32.mrf.mxu2 }
 0x9c4   :  { %v3044_v28 = vadd.f32 %v3043_v2, %v5750_v32 }
 0x9c6   :  { %v3062_v52 = vmax.f32 %v3044_v28, 0.0 }
 0x9c8   :  { %3176 = vmatmul.f32.gmra.mxu1 %v3062_v52 }
 0xa15   :  { %v3118_v60 = vpop.f32.mrf.mxu3  ;;  %v3159_v9 = vpop.f32.mrf.mxu1 }
 0xa16   :  { %v3119_v56 = vadd.f32 %v5784_v13, %v3118_v60 }
 0xa18   :  { %v3160_v54 = vadd.f32 %v3159_v9, %v3119_v56 }
 0xa1a   :  { %v3183_v45 = vmax.f32 %v3160_v54, 0.0 }
 0xa1c   :  { %3227 = vmatmul.f32.vlgmr.msrb.gmra.mxu0 %v3183_v45 }
 0xa1d   :  { %v3121_v18 = vpop.f32.mrf.mxu3  ;;  %v3162_v47 = vpop.f32.mrf.mxu1 }
 0xa1e   :  { %v3122_v48 = vadd.f32 %v5784_v13, %v3121_v18 }
 0xa20   :  { %v3163_v58 = vadd.f32 %v3162_v47, %v3122_v48 }
 0xa22   :  { %v3184_v50 = vmax.f32 %v3163_v58, 0.0 }
 0xa24   :  { %3230 = vmatmul.f32.gmra.mxu0 %v3184_v50 }
 0xa25   :  { %v3124_v55 = vpop.f32.mrf.mxu3  ;;  %v3165_v46 = vpop.f32.mrf.mxu1 }
 0xa26   :  { %v3125_v27 = vadd.f32 %v5784_v13, %v3124_v55 }
 0xa28   :  { %v3166_v31 = vadd.f32 %v3165_v46, %v3125_v27 }
 0xa2a   :  { %v3185_v34 = vmax.f32 %v3166_v31, 0.0 }
 0xa2c   :  { %3233 = vmatmul.f32.gmra.mxu0 %v3185_v34 }
 0xa2d   :  { %v3127_v35 = vpop.f32.mrf.mxu3  ;;  %v3168_v6 = vpop.f32.mrf.mxu1 }
 0xa2e   :  { %v3128_v24 = vadd.f32 %v5784_v13, %v3127_v35 }
 0xa30   :  { %v3169_v25 = vadd.f32 %v3168_v6, %v3128_v24 }
 0xa32   :  { %v3186_v42 = vmax.f32 %v3169_v25, 0.0 }
 0xa34   :  { %v3005_v15 = vpop.f32.mrf.mxu0  ;;  %3236 = vmatmul.f32.gmra.mxu0 %v3186_v42 }
 0xa35   :  { %v3006_v44 = vadd.f32 %v3005_v15, %v5746_v38  ;;  %v3130_v26 = vpop.f32.mrf.mxu3  ;;  %v3171_v57 = vpop.f32.mrf.mxu1 }
 0xa36   :  { %v3131_v33 = vadd.f32 %v5784_v13, %v3130_v26 }
 0xa37   :  { %v3063_v17 = vmax.f32 %v3006_v44, 0.0 }
 0xa38   :  { %v3172_v29 = vadd.f32 %v3171_v57, %v3131_v33 }
 0xa39   :  { %3138 = vmatmul.f32.gmra.mxu3 %v3063_v17 }
 0xa3a   :  { %v3187_v41 = vmax.f32 %v3172_v29, 0.0  ;;  %v3046_v37 = vpop.f32.mrf.mxu2 }
 0xa3b   :  { %v3047_v43 = vadd.f32 %v3046_v37, %v5750_v32  ;;  %v3512_v32 = vld [vmem:[%s6146_s15] ss:$0 sm:$0xff] }
 0xa3c   :  { %3239 = vmatmul.f32.gmra.mxu0 %v3187_v41 }
 0xa3d   :  { %v3064_v61 = vmax.f32 %v3047_v43, 0.0  ;;  %v3133_v36 = vpop.f32.mrf.mxu3  ;;  %v3174_v20 = vpop.f32.mrf.mxu1 }
 0xa3e   :  { %v3134_v0 = vadd.f32 %v5784_v13, %v3133_v36 }
 0xa3f   :  { %3179 = vmatmul.f32.gmra.mxu1 %v3064_v61 }
 0xa40   :  { %v3175_v39 = vadd.f32 %v3174_v20, %v3134_v0 }
 0xa42   :  { %v3188_v38 = vmax.f32 %v3175_v39, 0.0 }
 0xa44   :  { %3242 = vmatmul.f32.gmra.mxu0 %v3188_v38 }
 0xa45   :  { %v3136_v51 = vpop.f32.mrf.mxu3  ;;  %v3177_v30 = vpop.f32.mrf.mxu1 }
 0xa46   :  { %v3137_v10 = vadd.f32 %v5784_v13, %v3136_v51 }
 0xa48   :  { %v3178_v22 = vadd.f32 %v3177_v30, %v3137_v10 }
 0xa4a   :  { %v3189_v3 = vmax.f32 %v3178_v22, 0.0 }
 0xa4c   :  { %3245 = vmatmul.f32.gmra.mxu0 %v3189_v3 }
 0xa99   :  { %v3228_v5 = vpop.f32.mrf.mxu0 }
 0xa9a   :  { %v3229_v62 = vadd.f32 %v3512_v32, %v3228_v5 }
 0xa9c   :  { %3252 = vmax.xlane.f32.xlu0 %v3229_v62 }
 0xaa1   :  { %v3231_v16 = vpop.f32.mrf.mxu0 }
 0xaa2   :  { %v3232_v4 = vadd.f32 %v3512_v32, %v3231_v16 }
 0xaa4   :  { %3254 = vmax.xlane.f32.xlu0 %v3232_v4 }
 0xaa9   :  { %v3234_v63 = vpop.f32.mrf.mxu0 }
 0xaaa   :  { %v3235_v1 = vadd.f32 %v3512_v32, %v3234_v63 }
 0xaac   :  { %3256 = vmax.xlane.f32.xlu1 %v3235_v1 }
 0xab1   :  { %v3237_v19 = vpop.f32.mrf.mxu0 }
 0xab2   :  { %v3238_v21 = vadd.f32 %v3512_v32, %v3237_v19 }
 0xab4   :  { %3258 = vmax.xlane.f32.xlu1 %v3238_v21 }
 0xab9   :  { %v3240_v7 = vpop.f32.mrf.mxu0 }
 0xaba   :  { %v3241_v8 = vadd.f32 %v3512_v32, %v3240_v7 }
 0xabc   :  { %3260 = vmax.xlane.f32.xlu2 %v3241_v8  ;;  %v3139_v40 = vpop.f32.mrf.mxu3  ;;  %v3180_v11 = vpop.f32.mrf.mxu1 }
 0xabd   :  { %v3140_v23 = vadd.f32 %v5784_v13, %v3139_v40 }
 0xabf   :  { %v3181_v12 = vadd.f32 %v3180_v11, %v3140_v23 }
 0xac1   :  { %v3190_v2 = vmax.f32 %v3181_v12, 0.0  ;;  %v3243_v28 = vpop.f32.mrf.mxu0 }
 0xac2   :  { %v3244_v52 = vadd.f32 %v3512_v32, %v3243_v28 }
 0xac3   :  { %3248 = vmatmul.f32.gmra.mxu0 %v3190_v2 }
 0xac4   :  { %3262 = vmax.xlane.f32.xlu2 %v3244_v52 }
 0xac9   :  { %v3246_v53 = vpop.f32.mrf.mxu0 }
 0xaca   :  { %v3247_v59 = vadd.f32 %v3512_v32, %v3246_v53 }
 0xacc   :  { %3264 = vmax.xlane.f32.xlu0 %v3247_v59 }
 0xb0f   :  { %v3253_v49 = vpop.xlane.xlu0 %3252 }
 0xb10   :  { %v3268_v14 = vsub.f32 %v3229_v62, %v3253_v49 }
 0xb12   :  { %v3276_v60 = vmul.f32 1.442695, %v3268_v14 }
 0xb14   :  { %3641 = vpow2.f32 %v3276_v60 }
 0xb17   :  { %v3255_v9 = vpop.xlane.xlu0 %3254 }
 0xb18   :  { %v3269_v56 = vsub.f32 %v3232_v4, %v3255_v9 }
 0xb1a   :  { %v3642_v54 = vpop.eup %3641  ;;  %v3278_v45 = vmul.f32 1.442695, %v3269_v56 }
 0xb1b   :  { %3292 = vadd.xlane.f32.xlu2 %v3642_v54 }
 0xb1c   :  { %3643 = vpow2.f32 %v3278_v45 }
 0xb1f   :  { %v3257_v13 = vpop.xlane.xlu1 %3256 }
 0xb20   :  { %v5799_v34 = vsub.f32 %v3235_v1, %v3257_v13 }
 0xb22   :  { %v3644_v18 = vpop.eup %3643  ;;  %v3280_v35 = vmul.f32 1.442695, %v5799_v34 }
 0xb23   :  { %3294 = vadd.xlane.f32.xlu0 %v3644_v18 }
 0xb27   :  { %v3259_v47 = vpop.xlane.xlu1 %3258 }
 0xb28   :  { %v3271_v48 = vsub.f32 %v3238_v21, %v3259_v47 }
 0xb2a   :  { %v3282_v58 = vmul.f32 1.442695, %v3271_v48 }
 0xb2c   :  { %3645 = vpow2.f32 %v3282_v58 }
 0xb2f   :  { %v3261_v50 = vpop.xlane.xlu2 %3260 }
 0xb30   :  { %v3272_v55 = vsub.f32 %v3241_v8, %v3261_v50 }
 0xb32   :  { %v3646_v46 = vpop.eup %3645  ;;  %v3284_v27 = vmul.f32 1.442695, %v3272_v55 }
 0xb33   :  { %3298 = vadd.xlane.f32.xlu2 %v3646_v46 }
 0xb34   :  { %3647 = vpow2.f32 %v3284_v27 }
 0xb35   :  { %3649 = vpow2.f32 %v3280_v35 }
 0xb37   :  { %v3263_v42 = vpop.xlane.xlu2 %3262 }
 0xb38   :  { %v3273_v26 = vsub.f32 %v3244_v52, %v3263_v42 }
 0xb3a   :  { %v3648_v31 = vpop.eup %3647  ;;  %v3286_v57 = vmul.f32 1.442695, %v3273_v26 }
 0xb3b   :  { %3300 = vadd.xlane.f32.xlu0 %v3648_v31  ;;  %v3650_v33 = vpop.eup %3649 }
 0xb3f   :  { %v3265_v6 = vpop.xlane.xlu0 %3264 }
 0xb40   :  { %v3274_v24 = vsub.f32 %v3247_v59, %v3265_v6  ;;  %v3249_v25 = vpop.f32.mrf.mxu0 }
 0xb41   :  { %v3250_v15 = vadd.f32 %v3512_v32, %v3249_v25 }
 0xb42   :  { %v3288_v44 = vmul.f32 1.442695, %v3274_v24 }
 0xb43   :  { %3266 = vmax.xlane.f32.xlu1 %v3250_v15 }
 0xb44   :  { %3651 = vpow2.f32 %v3288_v44 }
 0xb45   :  { %3653 = vpow2.f32 %v3286_v57 }
 0xb4a   :  { %v3652_v17 = vpop.eup %3651 }
 0xb4b   :  { %3304 = vadd.xlane.f32.xlu2 %v3652_v17  ;;  %3296 = vadd.xlane.f32.xlu1 %v3650_v33  ;;  %v3654_v29 = vpop.eup %3653 }
 0xb53   :  { %3302 = vadd.xlane.f32.xlu1 %v3654_v29 }
 0xb8e   :  { %v3293_v41 = vpop.xlane.xlu2 %3292 }
 0xb8f   :  { %3655 = vlog2.f32 %v3293_v41 }
 0xb95   :  { %v3656_v37 = vpop.eup %3655 }
 0xb96   :  { %v3309_v43 = vmul.f32 0.6931472, %v3656_v37  ;;  %v3295_v61 = vpop.xlane.xlu0 %3294 }
 0xb97   :  { %3657 = vlog2.f32 %v3295_v61 }
 0xb98   :  { %v3324_v36 = vsub.f32 %v3268_v14, %v3309_v43 }
 0xb9a   :  { %3332 = vst [vmem:[#allocation34] sm:$0xff] %v3324_v36 }
 0xb9d   :  { %v3658_v20 = vpop.eup %3657 }
 0xb9e   :  { %v3311_v0 = vmul.f32 0.6931472, %v3658_v20 }
 0xba0   :  { %v3325_v39 = vsub.f32 %v3269_v56, %v3311_v0 }
 0xba2   :  { %3333 = vst [vmem:[#allocation34 + $0x8] sm:$0xff] %v3325_v39 }
 0xba6   :  { %v3299_v38 = vpop.xlane.xlu2 %3298 }
 0xba7   :  { %3659 = vlog2.f32 %v3299_v38 }
 0xbad   :  { %v3660_v51 = vpop.eup %3659 }
 0xbae   :  { %v3315_v10 = vmul.f32 0.6931472, %v3660_v51  ;;  %v3301_v30 = vpop.xlane.xlu0 %3300 }
 0xbaf   :  { %3661 = vlog2.f32 %v3301_v30 }
 0xbb0   :  { %v3327_v22 = vsub.f32 %v3271_v48, %v3315_v10 }
 0xbb2   :  { %3335 = vst [vmem:[#allocation34 + $0x18] sm:$0xff] %v3327_v22 }
 0xbb5   :  { %v3662_v3 = vpop.eup %3661 }
 0xbb6   :  { %v3317_v32 = vmul.f32 0.6931472, %v3662_v3  ;;  %v3267_v5 = vpop.xlane.xlu1 %3266 }
 0xbb7   :  { %v3275_v62 = vsub.f32 %v3250_v15, %v3267_v5 }
 0xbb8   :  { %v3328_v16 = vsub.f32 %v3272_v55, %v3317_v32 }
 0xbb9   :  { %v3290_v4 = vmul.f32 1.442695, %v3275_v62 }
 0xbba   :  { %3336 = vst [vmem:[#allocation34 + $0x20] sm:$0xff] %v3328_v16 }
 0xbbb   :  { %3663 = vpow2.f32 %v3290_v4 }
 0xbbe   :  { %v3305_v63 = vpop.xlane.xlu2 %3304  ;;  %v3297_v1 = vpop.xlane.xlu1 %3296 }
 0xbbf   :  { %3665 = vlog2.f32 %v3305_v63 }
 0xbc0   :  { %3667 = vlog2.f32 %v3297_v1 }
 0xbc1   :  { %v3664_v19 = vpop.eup %3663 }
 0xbc2   :  { %3306 = vadd.xlane.f32.xlu0 %v3664_v19 }
 0xbc5   :  { %v3666_v21 = vpop.eup %3665 }
 0xbc6   :  { %v3668_v7 = vpop.eup %3667  ;;  %v3321_v8 = vmul.f32 0.6931472, %v3666_v21  ;;  %v3303_v40 = vpop.xlane.xlu1 %3302 }
 0xbc7   :  { %v3313_v23 = vmul.f32 0.6931472, %v3668_v7  ;;  %3669 = vlog2.f32 %v3303_v40 }
 0xbc8   :  { %v3330_v11 = vsub.f32 %v3274_v24, %v3321_v8 }
 0xbc9   :  { %v3326_v12 = vsub.f32 %v5799_v34, %v3313_v23 }
 0xbca   :  { %3338 = vst [vmem:[#allocation34 + $0x30] sm:$0xff] %v3330_v11 }
 0xbcb   :  { %3334 = vst [vmem:[#allocation34 + $0x10] sm:$0xff] %v3326_v12 }
 0xbcd   :  { %v3670_v2 = vpop.eup %3669 }
 0xbce   :  { %v3319_v28 = vmul.f32 0.6931472, %v3670_v2 }
 0xbd0   :  { %v3329_v52 = vsub.f32 %v3273_v26, %v3319_v28 }
 0xbd2   :  { %3337 = vst [vmem:[#allocation34 + $0x28] sm:$0xff] %v3329_v52 }
 0xc35   :  { %v3307_v53 = vpop.xlane.xlu0 %3306 }
 0xc36   :  { %3671 = vlog2.f32 %v3307_v53 }
 0xc3c   :  { %v3672_v59 = vpop.eup %3671 }
 0xc3d   :  { %v3323_v49 = vmul.f32 0.6931472, %v3672_v59 }
 0xc3f   :  { %v3331_v14 = vsub.f32 %v3275_v62, %v3323_v49 }
 0xc41   :  { %3339 = vst [vmem:[#allocation34 + $0x38] sm:$0xff] %v3331_v14 }
 0xc42   :  { %3352 = dma.vmem_to_hbm [thread:$0]  %s3345_s2, 1024, %s3347_s7, [#allocation6], %s4252_s13, %s4252_s13, %s4253_s5  }
 0xc43   :  { %4244 = dma.done.wait [#allocation6], 1024  }
 0xc44   :  { %4245 = vsyncadd [#allocation6], 4294966272 }
 0xc45   :  { %3357 = vsyncpa [#allocation5], 1 }
 0xc46   :  { %3358 = vsyncpa [#allocation8], 1 }
 0xc47   :  { %3359 = vsyncpa [#allocation11], 1 }
 0xc48   :  { %3360 = vsyncpa [#allocation14], 1 }
 0xc49   :  { %3361 = vsyncpa [#allocation17], 1 }
 0xc4a   :  { %3362 = vsyncpa [#allocation20], 1 }
 0xc4b   :  { %3363 = vsyncpa [#allocation23], 1 }
 0xc4c   :  { %3364 = vsyncpa [#allocation26], 1 }
 0xc4d   :  { %3365 = vsyncpa [#allocation29], 1 }
 0xc4e   :  { %3366 = vsyncpa [#allocation32], 1 }
 0xc4f   :  { %3367 = vsyncpa [#allocation6], 1 }

</bundles_post_ra>
